<compile_context>
chip_gen: v6e
topology: v6e:2x2x1
jax: 0.10.0
libtpu: 0.0.40
codegen_flags: <defaults>
</compile_context>

<pallas_src>
import math

import jax
import jax.numpy as jnp
from jax import lax
from jax.experimental import pallas as pl
from jax.experimental.pallas import tpu as pltpu

_VMEM = pltpu.MemorySpace.VMEM


# ------------------------------ fused kernel --------------------------------

def _lstm_step(gx_i, gx_f, gx_g, gx_o, h, c, whh_i, whh_f, whh_g, whh_o):
    """One LSTM cell step from pre-computed per-gate input projections.

    Gate order matches PyTorch nn.LSTM: i, f, g, o. All per-gate operands are
    lane-aligned at offset 0 (no cross-lane slicing on the serial chain).
    """
    i_g = jax.nn.sigmoid(gx_i + jnp.dot(h, whh_i, preferred_element_type=jnp.float32))
    f_g = jax.nn.sigmoid(gx_f + jnp.dot(h, whh_f, preferred_element_type=jnp.float32))
    g_g = jnp.tanh(gx_g + jnp.dot(h, whh_g, preferred_element_type=jnp.float32))
    o_g = jax.nn.sigmoid(gx_o + jnp.dot(h, whh_o, preferred_element_type=jnp.float32))
    c_new = f_g * c + i_g * g_g
    h_new = o_g * jnp.tanh(c_new)
    return h_new, c_new


def _tagger_kernel(cidx_ref, widx_ref, clen_ref,
                   cemb_ref, wemb_ref,
                   c_wih_ref, c_whh_ref, c_b_ref,
                   w_wih_w_ref, w_wih_c_ref, w_whh_ref, w_b_ref,
                   cls_w_ref, cls_b_ref,
                   out_ref):
    """Whole lstm_tagger forward in one kernel.

    cidx_ref:    (L*W, 1) int32   time-major padded char indices (row t*W+w)
    widx_ref:    (T, 1)   int32   word indices (T == W)
    clen_ref:    (W, 1)   int32   true char lengths per word
    cemb_ref:    (n_char, Dc)     char embedding table
    wemb_ref:    (n_word, Dw)     word embedding table
    c_wih_ref:   (4, Dc, Hc)      char LSTM input->gate weights (per gate, transposed)
    c_whh_ref:   (4, Hc, Hc)      char LSTM hidden->gate weights
    c_b_ref:     (4, 1, Hc)       char LSTM combined bias (b_ih + b_hh)
    w_wih_w_ref: (4, Dw, Hw)      word LSTM input->gate weights, word-embedding block
    w_wih_c_ref: (4, Hc, Hw)      word LSTM input->gate weights, char-feature block
    w_whh_ref:   (4, Hw, Hw)      word LSTM hidden->gate weights
    w_b_ref:     (4, 1, Hw)       word LSTM combined bias
    cls_w_ref:   (Hw, n_tag)      classifier weight (transposed)
    cls_b_ref:   (1, n_tag)       classifier bias
    out_ref:     (T, n_tag)       logits
    """
    n_char, _ = cemb_ref.shape
    n_word, _ = wemb_ref.shape
    Hc = c_whh_ref.shape[1]
    Hw = w_whh_ref.shape[1]
    T = widx_ref.shape[0]
    W = clen_ref.shape[0]
    LW = cidx_ref.shape[0]
    L = LW // W

    # ---- in-kernel embedding gathers (one-hot @ table; tables are tiny) ----
    cidx = cidx_ref[...]                                             # (L*W, 1)
    c_oh = (lax.broadcasted_iota(jnp.int32, (LW, n_char), 1) == cidx
            ).astype(jnp.float32)
    c_x = jnp.dot(c_oh, cemb_ref[...],
                  preferred_element_type=jnp.float32)                # (L*W, Dc)

    widx = widx_ref[...]                                             # (T, 1)
    w_oh = (lax.broadcasted_iota(jnp.int32, (T, n_word), 1) == widx
            ).astype(jnp.float32)
    word_x = jnp.dot(w_oh, wemb_ref[...],
                     preferred_element_type=jnp.float32)             # (T, Dw)

    lens = clen_ref[...]                                             # (W, 1)

    # ---- char LSTM: all words batched on the sublane axis, time-major ----
    # Hoisted per-gate input projections stay register-resident (no scratch).
    c_gx = [jnp.dot(c_x, c_wih_ref[g], preferred_element_type=jnp.float32)
            + c_b_ref[g] for g in range(4)]                          # 4 x (L*W, Hc)
    c_whh = [c_whh_ref[g] for g in range(4)]                         # 4 x (Hc, Hc)

    h = jnp.zeros((W, Hc), jnp.float32)
    c = jnp.zeros((W, Hc), jnp.float32)
    for t in range(L):                                               # static unroll
        sl = slice(t * W, (t + 1) * W)                               # static slice
        h_new, c_new = _lstm_step(c_gx[0][sl, :], c_gx[1][sl, :],
                                  c_gx[2][sl, :], c_gx[3][sl, :],
                                  h, c, *c_whh)
        valid = t < lens                                             # (W, 1) bool
        h = jnp.where(valid, h_new, h)                               # length mask:
        c = jnp.where(valid, c_new, c)                               # keep last valid
    char_feat = h                                                    # (W, Hc), in vregs

    # ---- word LSTM: concat-free split input projection ----
    w_gx = [jnp.dot(word_x, w_wih_w_ref[g], preferred_element_type=jnp.float32)
            + jnp.dot(char_feat, w_wih_c_ref[g], preferred_element_type=jnp.float32)
            + w_b_ref[g] for g in range(4)]                          # 4 x (T, Hw)
    w_whh = [w_whh_ref[g] for g in range(4)]                         # 4 x (Hw, Hw)

    h = jnp.zeros((1, Hw), jnp.float32)
    c = jnp.zeros((1, Hw), jnp.float32)
    hs = []
    for t in range(T):                                               # static unroll
        h, c = _lstm_step(w_gx[0][t:t + 1, :], w_gx[1][t:t + 1, :],
                          w_gx[2][t:t + 1, :], w_gx[3][t:t + 1, :],
                          h, c, *w_whh)
        hs.append(h)                                                 # values, no h_buf
    h_all = jnp.concatenate(hs, axis=0)                              # (T, Hw)

    # ---- fused classifier epilogue ----
    out_ref[...] = (jnp.dot(h_all, cls_w_ref[...],
                            preferred_element_type=jnp.float32) + cls_b_ref[...])


# ------------------------------ kernel wrapper -------------------------------

@jax.jit
def lstm_tagger_forward(params, word_idx, char_idx_tm, char_lens):
    """word_idx: (T, 1) int32; char_idx_tm: (L*W, 1) int32 time-major padded;
    char_lens: (W, 1) int32. Returns (T, n_tag) logits (== x.view(-1, h) path)."""
    T = word_idx.shape[0]
    n_tag = params['cls_b'].shape[1]
    return pl.pallas_call(
        _tagger_kernel,
        out_shape=jax.ShapeDtypeStruct((T, n_tag), jnp.float32),
        in_specs=[pl.BlockSpec(memory_space=_VMEM)] * 14,
        out_specs=pl.BlockSpec(memory_space=_VMEM),
    )(char_idx_tm, word_idx, char_lens,
      params['char_embed'], params['word_embed'],
      params['c_wih'], params['c_whh'], params['c_b'],
      params['w_wih_word'], params['w_wih_char'], params['w_whh'], params['w_b'],
      params['cls_w_t'], params['cls_b'])


# ------------------------- parameters (deterministic) ------------------------

def prepare_params(raw):
    """One-time layout prep: per-gate transposed weights, combined biases,
    split word-LSTM W_ih into word-embedding / char-feature blocks."""
    f32 = lambda a: jnp.asarray(a, jnp.float32)

    def per_gate_t(w):                       # (4H, D) -> (4, D, H)
        w = f32(w)
        h4, _ = w.shape
        hh = h4 // 4
        return jnp.stack([w[g * hh:(g + 1) * hh, :].T for g in range(4)], axis=0)

    def per_gate_b(b):                       # (4H,) -> (4, 1, H)
        b = f32(b)
        return b.reshape(4, 1, b.shape[0] // 4)

    dw = raw['word_embed'].shape[1]
    w_ih = f32(raw['w_w_ih'])                # (4Hw, Dw + Hc)
    return dict(
        char_embed=f32(raw['char_embed']),
        word_embed=f32(raw['word_embed']),
        c_wih=per_gate_t(raw['c_w_ih']),
        c_whh=per_gate_t(raw['c_w_hh']),
        c_b=per_gate_b(raw['c_b_ih'] + raw['c_b_hh']),
        w_wih_word=per_gate_t(w_ih[:, :dw]),
        w_wih_char=per_gate_t(w_ih[:, dw:]),
        w_whh=per_gate_t(raw['w_w_hh']),
        w_b=per_gate_b(raw['w_b_ih'] + raw['w_b_hh']),
        cls_w_t=f32(raw['cls_w']).T,
        cls_b=f32(raw['cls_b']).reshape(1, -1),
    )


def init_raw_params(key, n_word, n_char, char_dim, word_dim,
                    char_hidden, word_hidden, n_tag):
    ks = jax.random.split(key, 12)

    def uni(k, shape, scale):
        return jax.random.uniform(k, shape, jnp.float32, -scale, scale)

    cs = 1.0 / math.sqrt(char_hidden)
    ws = 1.0 / math.sqrt(word_hidden)
    ls = 1.0 / math.sqrt(word_hidden)
    return dict(
        word_embed=jax.random.normal(ks[0], (n_word, word_dim), jnp.float32),
        char_embed=jax.random.normal(ks[1], (n_char, char_dim), jnp.float32),
        # char_lstm.lstm (PyTorch shapes)
        c_w_ih=uni(ks[2], (4 * char_hidden, char_dim), cs),
        c_w_hh=uni(ks[3], (4 * char_hidden, char_hidden), cs),
        c_b_ih=uni(ks[4], (4 * char_hidden,), cs),
        c_b_hh=uni(ks[5], (4 * char_hidden,), cs),
        # word_lstm
        w_w_ih=uni(ks[6], (4 * word_hidden, word_dim + char_hidden), ws),
        w_w_hh=uni(ks[7], (4 * word_hidden, word_hidden), ws),
        w_b_ih=uni(ks[8], (4 * word_hidden,), ws),
        w_b_hh=uni(ks[9], (4 * word_hidden,), ws),
        # classify
        cls_w=uni(ks[10], (n_tag, word_hidden), ls),
        cls_b=uni(ks[11], (n_tag,), ls),
    )


# ----------------------- pure-JAX reference (correctness) --------------------

def _ref_lstm(x, w_ih, w_hh, b_ih, b_hh):
    """x: (T, D) -> (T, H) hidden states; PyTorch nn.LSTM gate math."""
    hdim = w_hh.shape[1]
    h = jnp.zeros((hdim,), jnp.float32)
    c = jnp.zeros((hdim,), jnp.float32)
    outs = []
    for t in range(x.shape[0]):
        gates = w_ih @ x[t] + b_ih + w_hh @ h + b_hh
        i = jax.nn.sigmoid(gates[0:hdim])
        f = jax.nn.sigmoid(gates[hdim:2 * hdim])
        g = jnp.tanh(gates[2 * hdim:3 * hdim])
        o = jax.nn.sigmoid(gates[3 * hdim:4 * hdim])
        c = f * c + i * g
        h = o * jnp.tanh(c)
        outs.append(h)
    return jnp.stack(outs, axis=0)


def ref_forward(raw, words, word_to_idx, char_to_idx):
    char_feats = []
    for w in words:
        cid = jnp.array([char_to_idx[ch] for ch in w.lower()], jnp.int32)
        cx = raw['char_embed'][cid]
        hs = _ref_lstm(cx, raw['c_w_ih'], raw['c_w_hh'], raw['c_b_ih'], raw['c_b_hh'])
        char_feats.append(hs[-1])
    char_feat = jnp.stack(char_feats, axis=0)
    wid = jnp.array([word_to_idx[w.lower()] for w in words], jnp.int32)
    x = jnp.concatenate([raw['word_embed'][wid], char_feat], axis=-1)
    hs = _ref_lstm(x, raw['w_w_ih'], raw['w_w_hh'], raw['w_b_ih'], raw['w_b_hh'])
    return hs @ raw['cls_w'].T + raw['cls_b']


# ----------------------------------- main ------------------------------------

if __name__ == "__main__":
    test_sent = 'Everybody ate the apple'
    words = test_sent.split()

    word_to_idx = {}
    for w in words:
        word_to_idx.setdefault(w.lower(), len(word_to_idx))
    char_to_idx = {}
    for w in words:
        for ch in w.lower():
            char_to_idx.setdefault(ch, len(char_to_idx))

    n_word, n_char = len(word_to_idx), len(char_to_idx)
    char_dim, word_dim = 8, 16
    char_hidden, word_hidden = 16, 32
    n_tag = 3

    raw = init_raw_params(jax.random.PRNGKey(0), n_word, n_char, char_dim,
                          word_dim, char_hidden, word_hidden, n_tag)
    params = prepare_params(raw)

    # make_sequence(...).unsqueeze(0): batch=1 is squeezed; indices go in as (T, 1).
    word_idx = jnp.array([[word_to_idx[w.lower()]] for w in words], jnp.int32)

    # padded char indices, time-major flattened (row t*W + w); pad id 0 is
    # harmless (masked by char_lens).
    W = len(words)
    max_len = max(len(w) for w in words)
    cid = [[char_to_idx[c] for c in w.lower()] + [0] * (max_len - len(w))
           for w in words]                                         # (W, L) python
    char_idx_tm = jnp.array([[cid[w][t]] for t in range(max_len) for w in range(W)],
                            jnp.int32)                             # (L*W, 1)
    char_lens = jnp.array([[len(w)] for w in words], jnp.int32)    # (W, 1)

    out = lstm_tagger_forward(params, word_idx, char_idx_tm, char_lens)
    out = jax.block_until_ready(out)

    assert out.shape == (len(words), n_tag), out.shape
    assert out.dtype == jnp.float32
    ref = ref_forward(raw, words, word_to_idx, char_to_idx)
    assert bool(jnp.allclose(out, ref, rtol=2e-3, atol=2e-3)), (out, ref)
    print("KERNEL_OK")
</pallas_src>

<mosaic_0001>
module attributes {stable_mosaic.version = 11 : i64} {
  func.func @_tagger_kernel(%arg0: memref<36x1xi32, #tpu.memory_space<vmem>>, %arg1: memref<4x1xi32, #tpu.memory_space<vmem>>, %arg2: memref<4x1xi32, #tpu.memory_space<vmem>>, %arg3: memref<12x8xf32, #tpu.memory_space<vmem>>, %arg4: memref<4x16xf32, #tpu.memory_space<vmem>>, %arg5: memref<4x8x16xf32, #tpu.memory_space<vmem>>, %arg6: memref<4x16x16xf32, #tpu.memory_space<vmem>>, %arg7: memref<4x1x16xf32, #tpu.memory_space<vmem>>, %arg8: memref<4x16x32xf32, #tpu.memory_space<vmem>>, %arg9: memref<4x16x32xf32, #tpu.memory_space<vmem>>, %arg10: memref<4x32x32xf32, #tpu.memory_space<vmem>>, %arg11: memref<4x1x32xf32, #tpu.memory_space<vmem>>, %arg12: memref<32x3xf32, #tpu.memory_space<vmem>>, %arg13: memref<1x3xf32, #tpu.memory_space<vmem>>, %arg14: memref<4x3xf32, #tpu.memory_space<vmem>>) attributes {dimension_semantics = [], scalar_prefetch = 0 : i64, scratch_operands = 0 : i64, tpu.core_type = #tpu.core_type<tc>} {
    %c0 = arith.constant 0 : index
    %c0_0 = arith.constant 0 : index
    %0 = vector.load %arg0[%c0, %c0_0] : memref<36x1xi32, #tpu.memory_space<vmem>>, vector<36x1xi32>
    %1 = tpu.iota {dimensions = array<i32: 1>} : vector<36x12xi32>
    %2 = vector.broadcast %0 : vector<36x1xi32> to vector<36x12xi32>
    %3 = arith.cmpi eq, %1, %2 : vector<36x12xi32>
    %4 = arith.extui %3 : vector<36x12xi1> to vector<36x12xi32>
    %5 = arith.sitofp %4 : vector<36x12xi32> to vector<36x12xf32>
    %c0_1 = arith.constant 0 : index
    %c0_2 = arith.constant 0 : index
    %6 = vector.load %arg3[%c0_1, %c0_2] : memref<12x8xf32, #tpu.memory_space<vmem>>, vector<12x8xf32>
    %cst = arith.constant dense<0.000000e+00> : vector<36x8xf32>
    %7 = tpu.matmul %5, %6, %cst {dimension_numbers = #tpu.dot_dimension_numbers<[1], [0], [0], [1], [0, 0, 1, 1], [], []>} : vector<36x12xf32>, vector<12x8xf32>, vector<36x8xf32> -> vector<36x8xf32>
    %c0_3 = arith.constant 0 : index
    %c0_4 = arith.constant 0 : index
    %8 = vector.load %arg1[%c0_3, %c0_4] : memref<4x1xi32, #tpu.memory_space<vmem>>, vector<4x1xi32>
    %9 = tpu.iota {dimensions = array<i32: 1>} : vector<4x4xi32>
    %10 = vector.broadcast %8 : vector<4x1xi32> to vector<4x4xi32>
    %11 = arith.cmpi eq, %9, %10 : vector<4x4xi32>
    %12 = arith.extui %11 : vector<4x4xi1> to vector<4x4xi32>
    %13 = arith.sitofp %12 : vector<4x4xi32> to vector<4x4xf32>
    %c0_5 = arith.constant 0 : index
    %c0_6 = arith.constant 0 : index
    %14 = vector.load %arg4[%c0_5, %c0_6] : memref<4x16xf32, #tpu.memory_space<vmem>>, vector<4x16xf32>
    %cst_7 = arith.constant dense<0.000000e+00> : vector<4x16xf32>
    %15 = tpu.matmul %13, %14, %cst_7 {dimension_numbers = #tpu.dot_dimension_numbers<[1], [0], [0], [1], [0, 0, 1, 1], [], []>} : vector<4x4xf32>, vector<4x16xf32>, vector<4x16xf32> -> vector<4x16xf32>
    %c0_8 = arith.constant 0 : index
    %c0_9 = arith.constant 0 : index
    %16 = vector.load %arg2[%c0_8, %c0_9] : memref<4x1xi32, #tpu.memory_space<vmem>>, vector<4x1xi32>
    %c0_10 = arith.constant 0 : index
    %c0_11 = arith.constant 0 : index
    %c0_12 = arith.constant 0 : index
    %17 = vector.load %arg5[%c0_10, %c0_11, %c0_12] : memref<4x8x16xf32, #tpu.memory_space<vmem>>, vector<1x8x16xf32>
    %18 = vector.shape_cast %17 : vector<1x8x16xf32> to vector<8x16xf32>
    %cst_13 = arith.constant dense<0.000000e+00> : vector<36x16xf32>
    %19 = tpu.matmul %7, %18, %cst_13 {dimension_numbers = #tpu.dot_dimension_numbers<[1], [0], [0], [1], [0, 0, 1, 1], [], []>} : vector<36x8xf32>, vector<8x16xf32>, vector<36x16xf32> -> vector<36x16xf32>
    %c0_14 = arith.constant 0 : index
    %c0_15 = arith.constant 0 : index
    %c0_16 = arith.constant 0 : index
    %20 = vector.load %arg7[%c0_14, %c0_15, %c0_16] : memref<4x1x16xf32, #tpu.memory_space<vmem>>, vector<1x1x16xf32>
    %21 = vector.shape_cast %20 : vector<1x1x16xf32> to vector<1x16xf32>
    %22 = vector.broadcast %21 : vector<1x16xf32> to vector<36x16xf32>
    %23 = arith.addf %19, %22 : vector<36x16xf32>
    %c1 = arith.constant 1 : index
    %c0_17 = arith.constant 0 : index
    %c0_18 = arith.constant 0 : index
    %24 = vector.load %arg5[%c1, %c0_17, %c0_18] : memref<4x8x16xf32, #tpu.memory_space<vmem>>, vector<1x8x16xf32>
    %25 = vector.shape_cast %24 : vector<1x8x16xf32> to vector<8x16xf32>
    %cst_19 = arith.constant dense<0.000000e+00> : vector<36x16xf32>
    %26 = tpu.matmul %7, %25, %cst_19 {dimension_numbers = #tpu.dot_dimension_numbers<[1], [0], [0], [1], [0, 0, 1, 1], [], []>} : vector<36x8xf32>, vector<8x16xf32>, vector<36x16xf32> -> vector<36x16xf32>
    %c1_20 = arith.constant 1 : index
    %c0_21 = arith.constant 0 : index
    %c0_22 = arith.constant 0 : index
    %27 = vector.load %arg7[%c1_20, %c0_21, %c0_22] : memref<4x1x16xf32, #tpu.memory_space<vmem>>, vector<1x1x16xf32>
    %28 = vector.shape_cast %27 : vector<1x1x16xf32> to vector<1x16xf32>
    %29 = vector.broadcast %28 : vector<1x16xf32> to vector<36x16xf32>
    %30 = arith.addf %26, %29 : vector<36x16xf32>
    %c2 = arith.constant 2 : index
    %c0_23 = arith.constant 0 : index
    %c0_24 = arith.constant 0 : index
    %31 = vector.load %arg5[%c2, %c0_23, %c0_24] : memref<4x8x16xf32, #tpu.memory_space<vmem>>, vector<1x8x16xf32>
    %32 = vector.shape_cast %31 : vector<1x8x16xf32> to vector<8x16xf32>
    %cst_25 = arith.constant dense<0.000000e+00> : vector<36x16xf32>
    %33 = tpu.matmul %7, %32, %cst_25 {dimension_numbers = #tpu.dot_dimension_numbers<[1], [0], [0], [1], [0, 0, 1, 1], [], []>} : vector<36x8xf32>, vector<8x16xf32>, vector<36x16xf32> -> vector<36x16xf32>
    %c2_26 = arith.constant 2 : index
    %c0_27 = arith.constant 0 : index
    %c0_28 = arith.constant 0 : index
    %34 = vector.load %arg7[%c2_26, %c0_27, %c0_28] : memref<4x1x16xf32, #tpu.memory_space<vmem>>, vector<1x1x16xf32>
    %35 = vector.shape_cast %34 : vector<1x1x16xf32> to vector<1x16xf32>
    %36 = vector.broadcast %35 : vector<1x16xf32> to vector<36x16xf32>
    %37 = arith.addf %33, %36 : vector<36x16xf32>
    %c3 = arith.constant 3 : index
    %c0_29 = arith.constant 0 : index
    %c0_30 = arith.constant 0 : index
    %38 = vector.load %arg5[%c3, %c0_29, %c0_30] : memref<4x8x16xf32, #tpu.memory_space<vmem>>, vector<1x8x16xf32>
    %39 = vector.shape_cast %38 : vector<1x8x16xf32> to vector<8x16xf32>
    %cst_31 = arith.constant dense<0.000000e+00> : vector<36x16xf32>
    %40 = tpu.matmul %7, %39, %cst_31 {dimension_numbers = #tpu.dot_dimension_numbers<[1], [0], [0], [1], [0, 0, 1, 1], [], []>} : vector<36x8xf32>, vector<8x16xf32>, vector<36x16xf32> -> vector<36x16xf32>
    %c3_32 = arith.constant 3 : index
    %c0_33 = arith.constant 0 : index
    %c0_34 = arith.constant 0 : index
    %41 = vector.load %arg7[%c3_32, %c0_33, %c0_34] : memref<4x1x16xf32, #tpu.memory_space<vmem>>, vector<1x1x16xf32>
    %42 = vector.shape_cast %41 : vector<1x1x16xf32> to vector<1x16xf32>
    %43 = vector.broadcast %42 : vector<1x16xf32> to vector<36x16xf32>
    %44 = arith.addf %40, %43 : vector<36x16xf32>
    %c0_35 = arith.constant 0 : index
    %c0_36 = arith.constant 0 : index
    %c0_37 = arith.constant 0 : index
    %45 = vector.load %arg6[%c0_35, %c0_36, %c0_37] : memref<4x16x16xf32, #tpu.memory_space<vmem>>, vector<1x16x16xf32>
    %46 = vector.shape_cast %45 : vector<1x16x16xf32> to vector<16x16xf32>
    %c1_38 = arith.constant 1 : index
    %c0_39 = arith.constant 0 : index
    %c0_40 = arith.constant 0 : index
    %47 = vector.load %arg6[%c1_38, %c0_39, %c0_40] : memref<4x16x16xf32, #tpu.memory_space<vmem>>, vector<1x16x16xf32>
    %48 = vector.shape_cast %47 : vector<1x16x16xf32> to vector<16x16xf32>
    %c2_41 = arith.constant 2 : index
    %c0_42 = arith.constant 0 : index
    %c0_43 = arith.constant 0 : index
    %49 = vector.load %arg6[%c2_41, %c0_42, %c0_43] : memref<4x16x16xf32, #tpu.memory_space<vmem>>, vector<1x16x16xf32>
    %50 = vector.shape_cast %49 : vector<1x16x16xf32> to vector<16x16xf32>
    %c3_44 = arith.constant 3 : index
    %c0_45 = arith.constant 0 : index
    %c0_46 = arith.constant 0 : index
    %51 = vector.load %arg6[%c3_44, %c0_45, %c0_46] : memref<4x16x16xf32, #tpu.memory_space<vmem>>, vector<1x16x16xf32>
    %52 = vector.shape_cast %51 : vector<1x16x16xf32> to vector<16x16xf32>
    %cst_47 = arith.constant 0.000000e+00 : f32
    %53 = vector.broadcast %cst_47 : f32 to vector<4x16xf32>
    %cst_48 = arith.constant 0.000000e+00 : f32
    %54 = vector.broadcast %cst_48 : f32 to vector<4x16xf32>
    %55 = vector.extract_strided_slice %23 {offsets = [0, 0], sizes = [4, 16], strides = [1, 1]} : vector<36x16xf32> to vector<4x16xf32>
    %56 = vector.extract_strided_slice %30 {offsets = [0, 0], sizes = [4, 16], strides = [1, 1]} : vector<36x16xf32> to vector<4x16xf32>
    %57 = vector.extract_strided_slice %37 {offsets = [0, 0], sizes = [4, 16], strides = [1, 1]} : vector<36x16xf32> to vector<4x16xf32>
    %58 = vector.extract_strided_slice %44 {offsets = [0, 0], sizes = [4, 16], strides = [1, 1]} : vector<36x16xf32> to vector<4x16xf32>
    %cst_49 = arith.constant dense<0.000000e+00> : vector<4x16xf32>
    %59 = tpu.matmul %53, %46, %cst_49 {dimension_numbers = #tpu.dot_dimension_numbers<[1], [0], [0], [1], [0, 0, 1, 1], [], []>} : vector<4x16xf32>, vector<16x16xf32>, vector<4x16xf32> -> vector<4x16xf32>
    %60 = arith.addf %55, %59 : vector<4x16xf32>
    %61 = arith.negf %60 : vector<4x16xf32>
    %62 = math.exp %61 : vector<4x16xf32>
    %cst_50 = arith.constant 1.000000e+00 : f32
    %63 = vector.broadcast %cst_50 : f32 to vector<4x16xf32>
    %64 = arith.addf %63, %62 : vector<4x16xf32>
    %65 = arith.divf %63, %64 : vector<4x16xf32>
    %cst_51 = arith.constant dense<0.000000e+00> : vector<4x16xf32>
    %66 = tpu.matmul %53, %48, %cst_51 {dimension_numbers = #tpu.dot_dimension_numbers<[1], [0], [0], [1], [0, 0, 1, 1], [], []>} : vector<4x16xf32>, vector<16x16xf32>, vector<4x16xf32> -> vector<4x16xf32>
    %67 = arith.addf %56, %66 : vector<4x16xf32>
    %68 = arith.negf %67 : vector<4x16xf32>
    %69 = math.exp %68 : vector<4x16xf32>
    %cst_52 = arith.constant 1.000000e+00 : f32
    %70 = vector.broadcast %cst_52 : f32 to vector<4x16xf32>
    %71 = arith.addf %70, %69 : vector<4x16xf32>
    %72 = arith.divf %70, %71 : vector<4x16xf32>
    %cst_53 = arith.constant dense<0.000000e+00> : vector<4x16xf32>
    %73 = tpu.matmul %53, %50, %cst_53 {dimension_numbers = #tpu.dot_dimension_numbers<[1], [0], [0], [1], [0, 0, 1, 1], [], []>} : vector<4x16xf32>, vector<16x16xf32>, vector<4x16xf32> -> vector<4x16xf32>
    %74 = arith.addf %57, %73 : vector<4x16xf32>
    %75 = math.tanh %74 : vector<4x16xf32>
    %cst_54 = arith.constant dense<0.000000e+00> : vector<4x16xf32>
    %76 = tpu.matmul %53, %52, %cst_54 {dimension_numbers = #tpu.dot_dimension_numbers<[1], [0], [0], [1], [0, 0, 1, 1], [], []>} : vector<4x16xf32>, vector<16x16xf32>, vector<4x16xf32> -> vector<4x16xf32>
    %77 = arith.addf %58, %76 : vector<4x16xf32>
    %78 = arith.negf %77 : vector<4x16xf32>
    %79 = math.exp %78 : vector<4x16xf32>
    %cst_55 = arith.constant 1.000000e+00 : f32
    %80 = vector.broadcast %cst_55 : f32 to vector<4x16xf32>
    %81 = arith.addf %80, %79 : vector<4x16xf32>
    %82 = arith.divf %80, %81 : vector<4x16xf32>
    %83 = arith.mulf %72, %54 : vector<4x16xf32>
    %84 = arith.mulf %65, %75 : vector<4x16xf32>
    %85 = arith.addf %83, %84 : vector<4x16xf32>
    %86 = math.tanh %85 : vector<4x16xf32>
    %87 = arith.mulf %82, %86 : vector<4x16xf32>
    %c0_i32 = arith.constant 0 : i32
    %88 = vector.broadcast %c0_i32 : i32 to vector<4x1xi32>
    %89 = arith.cmpi sgt, %16, %88 : vector<4x1xi32>
    %90 = vector.shape_cast %89 : vector<4x1xi1> to vector<4x1xi1>
    %91 = vector.broadcast %90 : vector<4x1xi1> to vector<4x16xi1>
    %92 = arith.select %91, %87, %53 : vector<4x16xi1>, vector<4x16xf32>
    %93 = vector.shape_cast %89 : vector<4x1xi1> to vector<4x1xi1>
    %94 = vector.broadcast %93 : vector<4x1xi1> to vector<4x16xi1>
    %95 = arith.select %94, %85, %54 : vector<4x16xi1>, vector<4x16xf32>
    %96 = vector.extract_strided_slice %23 {offsets = [4, 0], sizes = [4, 16], strides = [1, 1]} : vector<36x16xf32> to vector<4x16xf32>
    %97 = vector.extract_strided_slice %30 {offsets = [4, 0], sizes = [4, 16], strides = [1, 1]} : vector<36x16xf32> to vector<4x16xf32>
    %98 = vector.extract_strided_slice %37 {offsets = [4, 0], sizes = [4, 16], strides = [1, 1]} : vector<36x16xf32> to vector<4x16xf32>
    %99 = vector.extract_strided_slice %44 {offsets = [4, 0], sizes = [4, 16], strides = [1, 1]} : vector<36x16xf32> to vector<4x16xf32>
    %cst_56 = arith.constant dense<0.000000e+00> : vector<4x16xf32>
    %100 = tpu.matmul %92, %46, %cst_56 {dimension_numbers = #tpu.dot_dimension_numbers<[1], [0], [0], [1], [0, 0, 1, 1], [], []>} : vector<4x16xf32>, vector<16x16xf32>, vector<4x16xf32> -> vector<4x16xf32>
    %101 = arith.addf %96, %100 : vector<4x16xf32>
    %102 = arith.negf %101 : vector<4x16xf32>
    %103 = math.exp %102 : vector<4x16xf32>
    %cst_57 = arith.constant 1.000000e+00 : f32
    %104 = vector.broadcast %cst_57 : f32 to vector<4x16xf32>
    %105 = arith.addf %104, %103 : vector<4x16xf32>
    %106 = arith.divf %104, %105 : vector<4x16xf32>
    %cst_58 = arith.constant dense<0.000000e+00> : vector<4x16xf32>
    %107 = tpu.matmul %92, %48, %cst_58 {dimension_numbers = #tpu.dot_dimension_numbers<[1], [0], [0], [1], [0, 0, 1, 1], [], []>} : vector<4x16xf32>, vector<16x16xf32>, vector<4x16xf32> -> vector<4x16xf32>
    %108 = arith.addf %97, %107 : vector<4x16xf32>
    %109 = arith.negf %108 : vector<4x16xf32>
    %110 = math.exp %109 : vector<4x16xf32>
    %cst_59 = arith.constant 1.000000e+00 : f32
    %111 = vector.broadcast %cst_59 : f32 to vector<4x16xf32>
    %112 = arith.addf %111, %110 : vector<4x16xf32>
    %113 = arith.divf %111, %112 : vector<4x16xf32>
    %cst_60 = arith.constant dense<0.000000e+00> : vector<4x16xf32>
    %114 = tpu.matmul %92, %50, %cst_60 {dimension_numbers = #tpu.dot_dimension_numbers<[1], [0], [0], [1], [0, 0, 1, 1], [], []>} : vector<4x16xf32>, vector<16x16xf32>, vector<4x16xf32> -> vector<4x16xf32>
    %115 = arith.addf %98, %114 : vector<4x16xf32>
    %116 = math.tanh %115 : vector<4x16xf32>
    %cst_61 = arith.constant dense<0.000000e+00> : vector<4x16xf32>
    %117 = tpu.matmul %92, %52, %cst_61 {dimension_numbers = #tpu.dot_dimension_numbers<[1], [0], [0], [1], [0, 0, 1, 1], [], []>} : vector<4x16xf32>, vector<16x16xf32>, vector<4x16xf32> -> vector<4x16xf32>
    %118 = arith.addf %99, %117 : vector<4x16xf32>
    %119 = arith.negf %118 : vector<4x16xf32>
    %120 = math.exp %119 : vector<4x16xf32>
    %cst_62 = arith.constant 1.000000e+00 : f32
    %121 = vector.broadcast %cst_62 : f32 to vector<4x16xf32>
    %122 = arith.addf %121, %120 : vector<4x16xf32>
    %123 = arith.divf %121, %122 : vector<4x16xf32>
    %124 = arith.mulf %113, %95 : vector<4x16xf32>
    %125 = arith.mulf %106, %116 : vector<4x16xf32>
    %126 = arith.addf %124, %125 : vector<4x16xf32>
    %127 = math.tanh %126 : vector<4x16xf32>
    %128 = arith.mulf %123, %127 : vector<4x16xf32>
    %c1_i32 = arith.constant 1 : i32
    %129 = vector.broadcast %c1_i32 : i32 to vector<4x1xi32>
    %130 = arith.cmpi sgt, %16, %129 : vector<4x1xi32>
    %131 = vector.shape_cast %130 : vector<4x1xi1> to vector<4x1xi1>
    %132 = vector.broadcast %131 : vector<4x1xi1> to vector<4x16xi1>
    %133 = arith.select %132, %128, %92 : vector<4x16xi1>, vector<4x16xf32>
    %134 = vector.shape_cast %130 : vector<4x1xi1> to vector<4x1xi1>
    %135 = vector.broadcast %134 : vector<4x1xi1> to vector<4x16xi1>
    %136 = arith.select %135, %126, %95 : vector<4x16xi1>, vector<4x16xf32>
    %137 = vector.extract_strided_slice %23 {offsets = [8, 0], sizes = [4, 16], strides = [1, 1]} : vector<36x16xf32> to vector<4x16xf32>
    %138 = vector.extract_strided_slice %30 {offsets = [8, 0], sizes = [4, 16], strides = [1, 1]} : vector<36x16xf32> to vector<4x16xf32>
    %139 = vector.extract_strided_slice %37 {offsets = [8, 0], sizes = [4, 16], strides = [1, 1]} : vector<36x16xf32> to vector<4x16xf32>
    %140 = vector.extract_strided_slice %44 {offsets = [8, 0], sizes = [4, 16], strides = [1, 1]} : vector<36x16xf32> to vector<4x16xf32>
    %cst_63 = arith.constant dense<0.000000e+00> : vector<4x16xf32>
    %141 = tpu.matmul %133, %46, %cst_63 {dimension_numbers = #tpu.dot_dimension_numbers<[1], [0], [0], [1], [0, 0, 1, 1], [], []>} : vector<4x16xf32>, vector<16x16xf32>, vector<4x16xf32> -> vector<4x16xf32>
    %142 = arith.addf %137, %141 : vector<4x16xf32>
    %143 = arith.negf %142 : vector<4x16xf32>
    %144 = math.exp %143 : vector<4x16xf32>
    %cst_64 = arith.constant 1.000000e+00 : f32
    %145 = vector.broadcast %cst_64 : f32 to vector<4x16xf32>
    %146 = arith.addf %145, %144 : vector<4x16xf32>
    %147 = arith.divf %145, %146 : vector<4x16xf32>
    %cst_65 = arith.constant dense<0.000000e+00> : vector<4x16xf32>
    %148 = tpu.matmul %133, %48, %cst_65 {dimension_numbers = #tpu.dot_dimension_numbers<[1], [0], [0], [1], [0, 0, 1, 1], [], []>} : vector<4x16xf32>, vector<16x16xf32>, vector<4x16xf32> -> vector<4x16xf32>
    %149 = arith.addf %138, %148 : vector<4x16xf32>
    %150 = arith.negf %149 : vector<4x16xf32>
    %151 = math.exp %150 : vector<4x16xf32>
    %cst_66 = arith.constant 1.000000e+00 : f32
    %152 = vector.broadcast %cst_66 : f32 to vector<4x16xf32>
    %153 = arith.addf %152, %151 : vector<4x16xf32>
    %154 = arith.divf %152, %153 : vector<4x16xf32>
    %cst_67 = arith.constant dense<0.000000e+00> : vector<4x16xf32>
    %155 = tpu.matmul %133, %50, %cst_67 {dimension_numbers = #tpu.dot_dimension_numbers<[1], [0], [0], [1], [0, 0, 1, 1], [], []>} : vector<4x16xf32>, vector<16x16xf32>, vector<4x16xf32> -> vector<4x16xf32>
    %156 = arith.addf %139, %155 : vector<4x16xf32>
    %157 = math.tanh %156 : vector<4x16xf32>
    %cst_68 = arith.constant dense<0.000000e+00> : vector<4x16xf32>
    %158 = tpu.matmul %133, %52, %cst_68 {dimension_numbers = #tpu.dot_dimension_numbers<[1], [0], [0], [1], [0, 0, 1, 1], [], []>} : vector<4x16xf32>, vector<16x16xf32>, vector<4x16xf32> -> vector<4x16xf32>
    %159 = arith.addf %140, %158 : vector<4x16xf32>
    %160 = arith.negf %159 : vector<4x16xf32>
    %161 = math.exp %160 : vector<4x16xf32>
    %cst_69 = arith.constant 1.000000e+00 : f32
    %162 = vector.broadcast %cst_69 : f32 to vector<4x16xf32>
    %163 = arith.addf %162, %161 : vector<4x16xf32>
    %164 = arith.divf %162, %163 : vector<4x16xf32>
    %165 = arith.mulf %154, %136 : vector<4x16xf32>
    %166 = arith.mulf %147, %157 : vector<4x16xf32>
    %167 = arith.addf %165, %166 : vector<4x16xf32>
    %168 = math.tanh %167 : vector<4x16xf32>
    %169 = arith.mulf %164, %168 : vector<4x16xf32>
    %c2_i32 = arith.constant 2 : i32
    %170 = vector.broadcast %c2_i32 : i32 to vector<4x1xi32>
    %171 = arith.cmpi sgt, %16, %170 : vector<4x1xi32>
    %172 = vector.shape_cast %171 : vector<4x1xi1> to vector<4x1xi1>
    %173 = vector.broadcast %172 : vector<4x1xi1> to vector<4x16xi1>
    %174 = arith.select %173, %169, %133 : vector<4x16xi1>, vector<4x16xf32>
    %175 = vector.shape_cast %171 : vector<4x1xi1> to vector<4x1xi1>
    %176 = vector.broadcast %175 : vector<4x1xi1> to vector<4x16xi1>
    %177 = arith.select %176, %167, %136 : vector<4x16xi1>, vector<4x16xf32>
    %178 = vector.extract_strided_slice %23 {offsets = [12, 0], sizes = [4, 16], strides = [1, 1]} : vector<36x16xf32> to vector<4x16xf32>
    %179 = vector.extract_strided_slice %30 {offsets = [12, 0], sizes = [4, 16], strides = [1, 1]} : vector<36x16xf32> to vector<4x16xf32>
    %180 = vector.extract_strided_slice %37 {offsets = [12, 0], sizes = [4, 16], strides = [1, 1]} : vector<36x16xf32> to vector<4x16xf32>
    %181 = vector.extract_strided_slice %44 {offsets = [12, 0], sizes = [4, 16], strides = [1, 1]} : vector<36x16xf32> to vector<4x16xf32>
    %cst_70 = arith.constant dense<0.000000e+00> : vector<4x16xf32>
    %182 = tpu.matmul %174, %46, %cst_70 {dimension_numbers = #tpu.dot_dimension_numbers<[1], [0], [0], [1], [0, 0, 1, 1], [], []>} : vector<4x16xf32>, vector<16x16xf32>, vector<4x16xf32> -> vector<4x16xf32>
    %183 = arith.addf %178, %182 : vector<4x16xf32>
    %184 = arith.negf %183 : vector<4x16xf32>
    %185 = math.exp %184 : vector<4x16xf32>
    %cst_71 = arith.constant 1.000000e+00 : f32
    %186 = vector.broadcast %cst_71 : f32 to vector<4x16xf32>
    %187 = arith.addf %186, %185 : vector<4x16xf32>
    %188 = arith.divf %186, %187 : vector<4x16xf32>
    %cst_72 = arith.constant dense<0.000000e+00> : vector<4x16xf32>
    %189 = tpu.matmul %174, %48, %cst_72 {dimension_numbers = #tpu.dot_dimension_numbers<[1], [0], [0], [1], [0, 0, 1, 1], [], []>} : vector<4x16xf32>, vector<16x16xf32>, vector<4x16xf32> -> vector<4x16xf32>
    %190 = arith.addf %179, %189 : vector<4x16xf32>
    %191 = arith.negf %190 : vector<4x16xf32>
    %192 = math.exp %191 : vector<4x16xf32>
    %cst_73 = arith.constant 1.000000e+00 : f32
    %193 = vector.broadcast %cst_73 : f32 to vector<4x16xf32>
    %194 = arith.addf %193, %192 : vector<4x16xf32>
    %195 = arith.divf %193, %194 : vector<4x16xf32>
    %cst_74 = arith.constant dense<0.000000e+00> : vector<4x16xf32>
    %196 = tpu.matmul %174, %50, %cst_74 {dimension_numbers = #tpu.dot_dimension_numbers<[1], [0], [0], [1], [0, 0, 1, 1], [], []>} : vector<4x16xf32>, vector<16x16xf32>, vector<4x16xf32> -> vector<4x16xf32>
    %197 = arith.addf %180, %196 : vector<4x16xf32>
    %198 = math.tanh %197 : vector<4x16xf32>
    %cst_75 = arith.constant dense<0.000000e+00> : vector<4x16xf32>
    %199 = tpu.matmul %174, %52, %cst_75 {dimension_numbers = #tpu.dot_dimension_numbers<[1], [0], [0], [1], [0, 0, 1, 1], [], []>} : vector<4x16xf32>, vector<16x16xf32>, vector<4x16xf32> -> vector<4x16xf32>
    %200 = arith.addf %181, %199 : vector<4x16xf32>
    %201 = arith.negf %200 : vector<4x16xf32>
    %202 = math.exp %201 : vector<4x16xf32>
    %cst_76 = arith.constant 1.000000e+00 : f32
    %203 = vector.broadcast %cst_76 : f32 to vector<4x16xf32>
    %204 = arith.addf %203, %202 : vector<4x16xf32>
    %205 = arith.divf %203, %204 : vector<4x16xf32>
    %206 = arith.mulf %195, %177 : vector<4x16xf32>
    %207 = arith.mulf %188, %198 : vector<4x16xf32>
    %208 = arith.addf %206, %207 : vector<4x16xf32>
    %209 = math.tanh %208 : vector<4x16xf32>
    %210 = arith.mulf %205, %209 : vector<4x16xf32>
    %c3_i32 = arith.constant 3 : i32
    %211 = vector.broadcast %c3_i32 : i32 to vector<4x1xi32>
    %212 = arith.cmpi sgt, %16, %211 : vector<4x1xi32>
    %213 = vector.shape_cast %212 : vector<4x1xi1> to vector<4x1xi1>
    %214 = vector.broadcast %213 : vector<4x1xi1> to vector<4x16xi1>
    %215 = arith.select %214, %210, %174 : vector<4x16xi1>, vector<4x16xf32>
    %216 = vector.shape_cast %212 : vector<4x1xi1> to vector<4x1xi1>
    %217 = vector.broadcast %216 : vector<4x1xi1> to vector<4x16xi1>
    %218 = arith.select %217, %208, %177 : vector<4x16xi1>, vector<4x16xf32>
    %219 = vector.extract_strided_slice %23 {offsets = [16, 0], sizes = [4, 16], strides = [1, 1]} : vector<36x16xf32> to vector<4x16xf32>
    %220 = vector.extract_strided_slice %30 {offsets = [16, 0], sizes = [4, 16], strides = [1, 1]} : vector<36x16xf32> to vector<4x16xf32>
    %221 = vector.extract_strided_slice %37 {offsets = [16, 0], sizes = [4, 16], strides = [1, 1]} : vector<36x16xf32> to vector<4x16xf32>
    %222 = vector.extract_strided_slice %44 {offsets = [16, 0], sizes = [4, 16], strides = [1, 1]} : vector<36x16xf32> to vector<4x16xf32>
    %cst_77 = arith.constant dense<0.000000e+00> : vector<4x16xf32>
    %223 = tpu.matmul %215, %46, %cst_77 {dimension_numbers = #tpu.dot_dimension_numbers<[1], [0], [0], [1], [0, 0, 1, 1], [], []>} : vector<4x16xf32>, vector<16x16xf32>, vector<4x16xf32> -> vector<4x16xf32>
    %224 = arith.addf %219, %223 : vector<4x16xf32>
    %225 = arith.negf %224 : vector<4x16xf32>
    %226 = math.exp %225 : vector<4x16xf32>
    %cst_78 = arith.constant 1.000000e+00 : f32
    %227 = vector.broadcast %cst_78 : f32 to vector<4x16xf32>
    %228 = arith.addf %227, %226 : vector<4x16xf32>
    %229 = arith.divf %227, %228 : vector<4x16xf32>
    %cst_79 = arith.constant dense<0.000000e+00> : vector<4x16xf32>
    %230 = tpu.matmul %215, %48, %cst_79 {dimension_numbers = #tpu.dot_dimension_numbers<[1], [0], [0], [1], [0, 0, 1, 1], [], []>} : vector<4x16xf32>, vector<16x16xf32>, vector<4x16xf32> -> vector<4x16xf32>
    %231 = arith.addf %220, %230 : vector<4x16xf32>
    %232 = arith.negf %231 : vector<4x16xf32>
    %233 = math.exp %232 : vector<4x16xf32>
    %cst_80 = arith.constant 1.000000e+00 : f32
    %234 = vector.broadcast %cst_80 : f32 to vector<4x16xf32>
    %235 = arith.addf %234, %233 : vector<4x16xf32>
    %236 = arith.divf %234, %235 : vector<4x16xf32>
    %cst_81 = arith.constant dense<0.000000e+00> : vector<4x16xf32>
    %237 = tpu.matmul %215, %50, %cst_81 {dimension_numbers = #tpu.dot_dimension_numbers<[1], [0], [0], [1], [0, 0, 1, 1], [], []>} : vector<4x16xf32>, vector<16x16xf32>, vector<4x16xf32> -> vector<4x16xf32>
    %238 = arith.addf %221, %237 : vector<4x16xf32>
    %239 = math.tanh %238 : vector<4x16xf32>
    %cst_82 = arith.constant dense<0.000000e+00> : vector<4x16xf32>
    %240 = tpu.matmul %215, %52, %cst_82 {dimension_numbers = #tpu.dot_dimension_numbers<[1], [0], [0], [1], [0, 0, 1, 1], [], []>} : vector<4x16xf32>, vector<16x16xf32>, vector<4x16xf32> -> vector<4x16xf32>
    %241 = arith.addf %222, %240 : vector<4x16xf32>
    %242 = arith.negf %241 : vector<4x16xf32>
    %243 = math.exp %242 : vector<4x16xf32>
    %cst_83 = arith.constant 1.000000e+00 : f32
    %244 = vector.broadcast %cst_83 : f32 to vector<4x16xf32>
    %245 = arith.addf %244, %243 : vector<4x16xf32>
    %246 = arith.divf %244, %245 : vector<4x16xf32>
    %247 = arith.mulf %236, %218 : vector<4x16xf32>
    %248 = arith.mulf %229, %239 : vector<4x16xf32>
    %249 = arith.addf %247, %248 : vector<4x16xf32>
    %250 = math.tanh %249 : vector<4x16xf32>
    %251 = arith.mulf %246, %250 : vector<4x16xf32>
    %c4_i32 = arith.constant 4 : i32
    %252 = vector.broadcast %c4_i32 : i32 to vector<4x1xi32>
    %253 = arith.cmpi sgt, %16, %252 : vector<4x1xi32>
    %254 = vector.shape_cast %253 : vector<4x1xi1> to vector<4x1xi1>
    %255 = vector.broadcast %254 : vector<4x1xi1> to vector<4x16xi1>
    %256 = arith.select %255, %251, %215 : vector<4x16xi1>, vector<4x16xf32>
    %257 = vector.shape_cast %253 : vector<4x1xi1> to vector<4x1xi1>
    %258 = vector.broadcast %257 : vector<4x1xi1> to vector<4x16xi1>
    %259 = arith.select %258, %249, %218 : vector<4x16xi1>, vector<4x16xf32>
    %260 = vector.extract_strided_slice %23 {offsets = [20, 0], sizes = [4, 16], strides = [1, 1]} : vector<36x16xf32> to vector<4x16xf32>
    %261 = vector.extract_strided_slice %30 {offsets = [20, 0], sizes = [4, 16], strides = [1, 1]} : vector<36x16xf32> to vector<4x16xf32>
    %262 = vector.extract_strided_slice %37 {offsets = [20, 0], sizes = [4, 16], strides = [1, 1]} : vector<36x16xf32> to vector<4x16xf32>
    %263 = vector.extract_strided_slice %44 {offsets = [20, 0], sizes = [4, 16], strides = [1, 1]} : vector<36x16xf32> to vector<4x16xf32>
    %cst_84 = arith.constant dense<0.000000e+00> : vector<4x16xf32>
    %264 = tpu.matmul %256, %46, %cst_84 {dimension_numbers = #tpu.dot_dimension_numbers<[1], [0], [0], [1], [0, 0, 1, 1], [], []>} : vector<4x16xf32>, vector<16x16xf32>, vector<4x16xf32> -> vector<4x16xf32>
    %265 = arith.addf %260, %264 : vector<4x16xf32>
    %266 = arith.negf %265 : vector<4x16xf32>
    %267 = math.exp %266 : vector<4x16xf32>
    %cst_85 = arith.constant 1.000000e+00 : f32
    %268 = vector.broadcast %cst_85 : f32 to vector<4x16xf32>
    %269 = arith.addf %268, %267 : vector<4x16xf32>
    %270 = arith.divf %268, %269 : vector<4x16xf32>
    %cst_86 = arith.constant dense<0.000000e+00> : vector<4x16xf32>
    %271 = tpu.matmul %256, %48, %cst_86 {dimension_numbers = #tpu.dot_dimension_numbers<[1], [0], [0], [1], [0, 0, 1, 1], [], []>} : vector<4x16xf32>, vector<16x16xf32>, vector<4x16xf32> -> vector<4x16xf32>
    %272 = arith.addf %261, %271 : vector<4x16xf32>
    %273 = arith.negf %272 : vector<4x16xf32>
    %274 = math.exp %273 : vector<4x16xf32>
    %cst_87 = arith.constant 1.000000e+00 : f32
    %275 = vector.broadcast %cst_87 : f32 to vector<4x16xf32>
    %276 = arith.addf %275, %274 : vector<4x16xf32>
    %277 = arith.divf %275, %276 : vector<4x16xf32>
    %cst_88 = arith.constant dense<0.000000e+00> : vector<4x16xf32>
    %278 = tpu.matmul %256, %50, %cst_88 {dimension_numbers = #tpu.dot_dimension_numbers<[1], [0], [0], [1], [0, 0, 1, 1], [], []>} : vector<4x16xf32>, vector<16x16xf32>, vector<4x16xf32> -> vector<4x16xf32>
    %279 = arith.addf %262, %278 : vector<4x16xf32>
    %280 = math.tanh %279 : vector<4x16xf32>
    %cst_89 = arith.constant dense<0.000000e+00> : vector<4x16xf32>
    %281 = tpu.matmul %256, %52, %cst_89 {dimension_numbers = #tpu.dot_dimension_numbers<[1], [0], [0], [1], [0, 0, 1, 1], [], []>} : vector<4x16xf32>, vector<16x16xf32>, vector<4x16xf32> -> vector<4x16xf32>
    %282 = arith.addf %263, %281 : vector<4x16xf32>
    %283 = arith.negf %282 : vector<4x16xf32>
    %284 = math.exp %283 : vector<4x16xf32>
    %cst_90 = arith.constant 1.000000e+00 : f32
    %285 = vector.broadcast %cst_90 : f32 to vector<4x16xf32>
    %286 = arith.addf %285, %284 : vector<4x16xf32>
    %287 = arith.divf %285, %286 : vector<4x16xf32>
    %288 = arith.mulf %277, %259 : vector<4x16xf32>
    %289 = arith.mulf %270, %280 : vector<4x16xf32>
    %290 = arith.addf %288, %289 : vector<4x16xf32>
    %291 = math.tanh %290 : vector<4x16xf32>
    %292 = arith.mulf %287, %291 : vector<4x16xf32>
    %c5_i32 = arith.constant 5 : i32
    %293 = vector.broadcast %c5_i32 : i32 to vector<4x1xi32>
    %294 = arith.cmpi sgt, %16, %293 : vector<4x1xi32>
    %295 = vector.shape_cast %294 : vector<4x1xi1> to vector<4x1xi1>
    %296 = vector.broadcast %295 : vector<4x1xi1> to vector<4x16xi1>
    %297 = arith.select %296, %292, %256 : vector<4x16xi1>, vector<4x16xf32>
    %298 = vector.shape_cast %294 : vector<4x1xi1> to vector<4x1xi1>
    %299 = vector.broadcast %298 : vector<4x1xi1> to vector<4x16xi1>
    %300 = arith.select %299, %290, %259 : vector<4x16xi1>, vector<4x16xf32>
    %301 = vector.extract_strided_slice %23 {offsets = [24, 0], sizes = [4, 16], strides = [1, 1]} : vector<36x16xf32> to vector<4x16xf32>
    %302 = vector.extract_strided_slice %30 {offsets = [24, 0], sizes = [4, 16], strides = [1, 1]} : vector<36x16xf32> to vector<4x16xf32>
    %303 = vector.extract_strided_slice %37 {offsets = [24, 0], sizes = [4, 16], strides = [1, 1]} : vector<36x16xf32> to vector<4x16xf32>
    %304 = vector.extract_strided_slice %44 {offsets = [24, 0], sizes = [4, 16], strides = [1, 1]} : vector<36x16xf32> to vector<4x16xf32>
    %cst_91 = arith.constant dense<0.000000e+00> : vector<4x16xf32>
    %305 = tpu.matmul %297, %46, %cst_91 {dimension_numbers = #tpu.dot_dimension_numbers<[1], [0], [0], [1], [0, 0, 1, 1], [], []>} : vector<4x16xf32>, vector<16x16xf32>, vector<4x16xf32> -> vector<4x16xf32>
    %306 = arith.addf %301, %305 : vector<4x16xf32>
    %307 = arith.negf %306 : vector<4x16xf32>
    %308 = math.exp %307 : vector<4x16xf32>
    %cst_92 = arith.constant 1.000000e+00 : f32
    %309 = vector.broadcast %cst_92 : f32 to vector<4x16xf32>
    %310 = arith.addf %309, %308 : vector<4x16xf32>
    %311 = arith.divf %309, %310 : vector<4x16xf32>
    %cst_93 = arith.constant dense<0.000000e+00> : vector<4x16xf32>
    %312 = tpu.matmul %297, %48, %cst_93 {dimension_numbers = #tpu.dot_dimension_numbers<[1], [0], [0], [1], [0, 0, 1, 1], [], []>} : vector<4x16xf32>, vector<16x16xf32>, vector<4x16xf32> -> vector<4x16xf32>
    %313 = arith.addf %302, %312 : vector<4x16xf32>
    %314 = arith.negf %313 : vector<4x16xf32>
    %315 = math.exp %314 : vector<4x16xf32>
    %cst_94 = arith.constant 1.000000e+00 : f32
    %316 = vector.broadcast %cst_94 : f32 to vector<4x16xf32>
    %317 = arith.addf %316, %315 : vector<4x16xf32>
    %318 = arith.divf %316, %317 : vector<4x16xf32>
    %cst_95 = arith.constant dense<0.000000e+00> : vector<4x16xf32>
    %319 = tpu.matmul %297, %50, %cst_95 {dimension_numbers = #tpu.dot_dimension_numbers<[1], [0], [0], [1], [0, 0, 1, 1], [], []>} : vector<4x16xf32>, vector<16x16xf32>, vector<4x16xf32> -> vector<4x16xf32>
    %320 = arith.addf %303, %319 : vector<4x16xf32>
    %321 = math.tanh %320 : vector<4x16xf32>
    %cst_96 = arith.constant dense<0.000000e+00> : vector<4x16xf32>
    %322 = tpu.matmul %297, %52, %cst_96 {dimension_numbers = #tpu.dot_dimension_numbers<[1], [0], [0], [1], [0, 0, 1, 1], [], []>} : vector<4x16xf32>, vector<16x16xf32>, vector<4x16xf32> -> vector<4x16xf32>
    %323 = arith.addf %304, %322 : vector<4x16xf32>
    %324 = arith.negf %323 : vector<4x16xf32>
    %325 = math.exp %324 : vector<4x16xf32>
    %cst_97 = arith.constant 1.000000e+00 : f32
    %326 = vector.broadcast %cst_97 : f32 to vector<4x16xf32>
    %327 = arith.addf %326, %325 : vector<4x16xf32>
    %328 = arith.divf %326, %327 : vector<4x16xf32>
    %329 = arith.mulf %318, %300 : vector<4x16xf32>
    %330 = arith.mulf %311, %321 : vector<4x16xf32>
    %331 = arith.addf %329, %330 : vector<4x16xf32>
    %332 = math.tanh %331 : vector<4x16xf32>
    %333 = arith.mulf %328, %332 : vector<4x16xf32>
    %c6_i32 = arith.constant 6 : i32
    %334 = vector.broadcast %c6_i32 : i32 to vector<4x1xi32>
    %335 = arith.cmpi sgt, %16, %334 : vector<4x1xi32>
    %336 = vector.shape_cast %335 : vector<4x1xi1> to vector<4x1xi1>
    %337 = vector.broadcast %336 : vector<4x1xi1> to vector<4x16xi1>
    %338 = arith.select %337, %333, %297 : vector<4x16xi1>, vector<4x16xf32>
    %339 = vector.shape_cast %335 : vector<4x1xi1> to vector<4x1xi1>
    %340 = vector.broadcast %339 : vector<4x1xi1> to vector<4x16xi1>
    %341 = arith.select %340, %331, %300 : vector<4x16xi1>, vector<4x16xf32>
    %342 = vector.extract_strided_slice %23 {offsets = [28, 0], sizes = [4, 16], strides = [1, 1]} : vector<36x16xf32> to vector<4x16xf32>
    %343 = vector.extract_strided_slice %30 {offsets = [28, 0], sizes = [4, 16], strides = [1, 1]} : vector<36x16xf32> to vector<4x16xf32>
    %344 = vector.extract_strided_slice %37 {offsets = [28, 0], sizes = [4, 16], strides = [1, 1]} : vector<36x16xf32> to vector<4x16xf32>
    %345 = vector.extract_strided_slice %44 {offsets = [28, 0], sizes = [4, 16], strides = [1, 1]} : vector<36x16xf32> to vector<4x16xf32>
    %cst_98 = arith.constant dense<0.000000e+00> : vector<4x16xf32>
    %346 = tpu.matmul %338, %46, %cst_98 {dimension_numbers = #tpu.dot_dimension_numbers<[1], [0], [0], [1], [0, 0, 1, 1], [], []>} : vector<4x16xf32>, vector<16x16xf32>, vector<4x16xf32> -> vector<4x16xf32>
    %347 = arith.addf %342, %346 : vector<4x16xf32>
    %348 = arith.negf %347 : vector<4x16xf32>
    %349 = math.exp %348 : vector<4x16xf32>
    %cst_99 = arith.constant 1.000000e+00 : f32
    %350 = vector.broadcast %cst_99 : f32 to vector<4x16xf32>
    %351 = arith.addf %350, %349 : vector<4x16xf32>
    %352 = arith.divf %350, %351 : vector<4x16xf32>
    %cst_100 = arith.constant dense<0.000000e+00> : vector<4x16xf32>
    %353 = tpu.matmul %338, %48, %cst_100 {dimension_numbers = #tpu.dot_dimension_numbers<[1], [0], [0], [1], [0, 0, 1, 1], [], []>} : vector<4x16xf32>, vector<16x16xf32>, vector<4x16xf32> -> vector<4x16xf32>
    %354 = arith.addf %343, %353 : vector<4x16xf32>
    %355 = arith.negf %354 : vector<4x16xf32>
    %356 = math.exp %355 : vector<4x16xf32>
    %cst_101 = arith.constant 1.000000e+00 : f32
    %357 = vector.broadcast %cst_101 : f32 to vector<4x16xf32>
    %358 = arith.addf %357, %356 : vector<4x16xf32>
    %359 = arith.divf %357, %358 : vector<4x16xf32>
    %cst_102 = arith.constant dense<0.000000e+00> : vector<4x16xf32>
    %360 = tpu.matmul %338, %50, %cst_102 {dimension_numbers = #tpu.dot_dimension_numbers<[1], [0], [0], [1], [0, 0, 1, 1], [], []>} : vector<4x16xf32>, vector<16x16xf32>, vector<4x16xf32> -> vector<4x16xf32>
    %361 = arith.addf %344, %360 : vector<4x16xf32>
    %362 = math.tanh %361 : vector<4x16xf32>
    %cst_103 = arith.constant dense<0.000000e+00> : vector<4x16xf32>
    %363 = tpu.matmul %338, %52, %cst_103 {dimension_numbers = #tpu.dot_dimension_numbers<[1], [0], [0], [1], [0, 0, 1, 1], [], []>} : vector<4x16xf32>, vector<16x16xf32>, vector<4x16xf32> -> vector<4x16xf32>
    %364 = arith.addf %345, %363 : vector<4x16xf32>
    %365 = arith.negf %364 : vector<4x16xf32>
    %366 = math.exp %365 : vector<4x16xf32>
    %cst_104 = arith.constant 1.000000e+00 : f32
    %367 = vector.broadcast %cst_104 : f32 to vector<4x16xf32>
    %368 = arith.addf %367, %366 : vector<4x16xf32>
    %369 = arith.divf %367, %368 : vector<4x16xf32>
    %370 = arith.mulf %359, %341 : vector<4x16xf32>
    %371 = arith.mulf %352, %362 : vector<4x16xf32>
    %372 = arith.addf %370, %371 : vector<4x16xf32>
    %373 = math.tanh %372 : vector<4x16xf32>
    %374 = arith.mulf %369, %373 : vector<4x16xf32>
    %c7_i32 = arith.constant 7 : i32
    %375 = vector.broadcast %c7_i32 : i32 to vector<4x1xi32>
    %376 = arith.cmpi sgt, %16, %375 : vector<4x1xi32>
    %377 = vector.shape_cast %376 : vector<4x1xi1> to vector<4x1xi1>
    %378 = vector.broadcast %377 : vector<4x1xi1> to vector<4x16xi1>
    %379 = arith.select %378, %374, %338 : vector<4x16xi1>, vector<4x16xf32>
    %380 = vector.shape_cast %376 : vector<4x1xi1> to vector<4x1xi1>
    %381 = vector.broadcast %380 : vector<4x1xi1> to vector<4x16xi1>
    %382 = arith.select %381, %372, %341 : vector<4x16xi1>, vector<4x16xf32>
    %383 = vector.extract_strided_slice %23 {offsets = [32, 0], sizes = [4, 16], strides = [1, 1]} : vector<36x16xf32> to vector<4x16xf32>
    %384 = vector.extract_strided_slice %30 {offsets = [32, 0], sizes = [4, 16], strides = [1, 1]} : vector<36x16xf32> to vector<4x16xf32>
    %385 = vector.extract_strided_slice %37 {offsets = [32, 0], sizes = [4, 16], strides = [1, 1]} : vector<36x16xf32> to vector<4x16xf32>
    %386 = vector.extract_strided_slice %44 {offsets = [32, 0], sizes = [4, 16], strides = [1, 1]} : vector<36x16xf32> to vector<4x16xf32>
    %cst_105 = arith.constant dense<0.000000e+00> : vector<4x16xf32>
    %387 = tpu.matmul %379, %46, %cst_105 {dimension_numbers = #tpu.dot_dimension_numbers<[1], [0], [0], [1], [0, 0, 1, 1], [], []>} : vector<4x16xf32>, vector<16x16xf32>, vector<4x16xf32> -> vector<4x16xf32>
    %388 = arith.addf %383, %387 : vector<4x16xf32>
    %389 = arith.negf %388 : vector<4x16xf32>
    %390 = math.exp %389 : vector<4x16xf32>
    %cst_106 = arith.constant 1.000000e+00 : f32
    %391 = vector.broadcast %cst_106 : f32 to vector<4x16xf32>
    %392 = arith.addf %391, %390 : vector<4x16xf32>
    %393 = arith.divf %391, %392 : vector<4x16xf32>
    %cst_107 = arith.constant dense<0.000000e+00> : vector<4x16xf32>
    %394 = tpu.matmul %379, %48, %cst_107 {dimension_numbers = #tpu.dot_dimension_numbers<[1], [0], [0], [1], [0, 0, 1, 1], [], []>} : vector<4x16xf32>, vector<16x16xf32>, vector<4x16xf32> -> vector<4x16xf32>
    %395 = arith.addf %384, %394 : vector<4x16xf32>
    %396 = arith.negf %395 : vector<4x16xf32>
    %397 = math.exp %396 : vector<4x16xf32>
    %cst_108 = arith.constant 1.000000e+00 : f32
    %398 = vector.broadcast %cst_108 : f32 to vector<4x16xf32>
    %399 = arith.addf %398, %397 : vector<4x16xf32>
    %400 = arith.divf %398, %399 : vector<4x16xf32>
    %cst_109 = arith.constant dense<0.000000e+00> : vector<4x16xf32>
    %401 = tpu.matmul %379, %50, %cst_109 {dimension_numbers = #tpu.dot_dimension_numbers<[1], [0], [0], [1], [0, 0, 1, 1], [], []>} : vector<4x16xf32>, vector<16x16xf32>, vector<4x16xf32> -> vector<4x16xf32>
    %402 = arith.addf %385, %401 : vector<4x16xf32>
    %403 = math.tanh %402 : vector<4x16xf32>
    %cst_110 = arith.constant dense<0.000000e+00> : vector<4x16xf32>
    %404 = tpu.matmul %379, %52, %cst_110 {dimension_numbers = #tpu.dot_dimension_numbers<[1], [0], [0], [1], [0, 0, 1, 1], [], []>} : vector<4x16xf32>, vector<16x16xf32>, vector<4x16xf32> -> vector<4x16xf32>
    %405 = arith.addf %386, %404 : vector<4x16xf32>
    %406 = arith.negf %405 : vector<4x16xf32>
    %407 = math.exp %406 : vector<4x16xf32>
    %cst_111 = arith.constant 1.000000e+00 : f32
    %408 = vector.broadcast %cst_111 : f32 to vector<4x16xf32>
    %409 = arith.addf %408, %407 : vector<4x16xf32>
    %410 = arith.divf %408, %409 : vector<4x16xf32>
    %411 = arith.mulf %400, %382 : vector<4x16xf32>
    %412 = arith.mulf %393, %403 : vector<4x16xf32>
    %413 = arith.addf %411, %412 : vector<4x16xf32>
    %414 = math.tanh %413 : vector<4x16xf32>
    %415 = arith.mulf %410, %414 : vector<4x16xf32>
    %c8_i32 = arith.constant 8 : i32
    %416 = vector.broadcast %c8_i32 : i32 to vector<4x1xi32>
    %417 = arith.cmpi sgt, %16, %416 : vector<4x1xi32>
    %418 = vector.shape_cast %417 : vector<4x1xi1> to vector<4x1xi1>
    %419 = vector.broadcast %418 : vector<4x1xi1> to vector<4x16xi1>
    %420 = arith.select %419, %415, %379 : vector<4x16xi1>, vector<4x16xf32>
    %c0_112 = arith.constant 0 : index
    %c0_113 = arith.constant 0 : index
    %c0_114 = arith.constant 0 : index
    %421 = vector.load %arg8[%c0_112, %c0_113, %c0_114] : memref<4x16x32xf32, #tpu.memory_space<vmem>>, vector<1x16x32xf32>
    %422 = vector.shape_cast %421 : vector<1x16x32xf32> to vector<16x32xf32>
    %cst_115 = arith.constant dense<0.000000e+00> : vector<4x32xf32>
    %423 = tpu.matmul %15, %422, %cst_115 {dimension_numbers = #tpu.dot_dimension_numbers<[1], [0], [0], [1], [0, 0, 1, 1], [], []>} : vector<4x16xf32>, vector<16x32xf32>, vector<4x32xf32> -> vector<4x32xf32>
    %c0_116 = arith.constant 0 : index
    %c0_117 = arith.constant 0 : index
    %c0_118 = arith.constant 0 : index
    %424 = vector.load %arg9[%c0_116, %c0_117, %c0_118] : memref<4x16x32xf32, #tpu.memory_space<vmem>>, vector<1x16x32xf32>
    %425 = vector.shape_cast %424 : vector<1x16x32xf32> to vector<16x32xf32>
    %cst_119 = arith.constant dense<0.000000e+00> : vector<4x32xf32>
    %426 = tpu.matmul %420, %425, %cst_119 {dimension_numbers = #tpu.dot_dimension_numbers<[1], [0], [0], [1], [0, 0, 1, 1], [], []>} : vector<4x16xf32>, vector<16x32xf32>, vector<4x32xf32> -> vector<4x32xf32>
    %427 = arith.addf %423, %426 : vector<4x32xf32>
    %c0_120 = arith.constant 0 : index
    %c0_121 = arith.constant 0 : index
    %c0_122 = arith.constant 0 : index
    %428 = vector.load %arg11[%c0_120, %c0_121, %c0_122] : memref<4x1x32xf32, #tpu.memory_space<vmem>>, vector<1x1x32xf32>
    %429 = vector.shape_cast %428 : vector<1x1x32xf32> to vector<1x32xf32>
    %430 = vector.broadcast %429 : vector<1x32xf32> to vector<4x32xf32>
    %431 = arith.addf %427, %430 : vector<4x32xf32>
    %c1_123 = arith.constant 1 : index
    %c0_124 = arith.constant 0 : index
    %c0_125 = arith.constant 0 : index
    %432 = vector.load %arg8[%c1_123, %c0_124, %c0_125] : memref<4x16x32xf32, #tpu.memory_space<vmem>>, vector<1x16x32xf32>
    %433 = vector.shape_cast %432 : vector<1x16x32xf32> to vector<16x32xf32>
    %cst_126 = arith.constant dense<0.000000e+00> : vector<4x32xf32>
    %434 = tpu.matmul %15, %433, %cst_126 {dimension_numbers = #tpu.dot_dimension_numbers<[1], [0], [0], [1], [0, 0, 1, 1], [], []>} : vector<4x16xf32>, vector<16x32xf32>, vector<4x32xf32> -> vector<4x32xf32>
    %c1_127 = arith.constant 1 : index
    %c0_128 = arith.constant 0 : index
    %c0_129 = arith.constant 0 : index
    %435 = vector.load %arg9[%c1_127, %c0_128, %c0_129] : memref<4x16x32xf32, #tpu.memory_space<vmem>>, vector<1x16x32xf32>
    %436 = vector.shape_cast %435 : vector<1x16x32xf32> to vector<16x32xf32>
    %cst_130 = arith.constant dense<0.000000e+00> : vector<4x32xf32>
    %437 = tpu.matmul %420, %436, %cst_130 {dimension_numbers = #tpu.dot_dimension_numbers<[1], [0], [0], [1], [0, 0, 1, 1], [], []>} : vector<4x16xf32>, vector<16x32xf32>, vector<4x32xf32> -> vector<4x32xf32>
    %438 = arith.addf %434, %437 : vector<4x32xf32>
    %c1_131 = arith.constant 1 : index
    %c0_132 = arith.constant 0 : index
    %c0_133 = arith.constant 0 : index
    %439 = vector.load %arg11[%c1_131, %c0_132, %c0_133] : memref<4x1x32xf32, #tpu.memory_space<vmem>>, vector<1x1x32xf32>
    %440 = vector.shape_cast %439 : vector<1x1x32xf32> to vector<1x32xf32>
    %441 = vector.broadcast %440 : vector<1x32xf32> to vector<4x32xf32>
    %442 = arith.addf %438, %441 : vector<4x32xf32>
    %c2_134 = arith.constant 2 : index
    %c0_135 = arith.constant 0 : index
    %c0_136 = arith.constant 0 : index
    %443 = vector.load %arg8[%c2_134, %c0_135, %c0_136] : memref<4x16x32xf32, #tpu.memory_space<vmem>>, vector<1x16x32xf32>
    %444 = vector.shape_cast %443 : vector<1x16x32xf32> to vector<16x32xf32>
    %cst_137 = arith.constant dense<0.000000e+00> : vector<4x32xf32>
    %445 = tpu.matmul %15, %444, %cst_137 {dimension_numbers = #tpu.dot_dimension_numbers<[1], [0], [0], [1], [0, 0, 1, 1], [], []>} : vector<4x16xf32>, vector<16x32xf32>, vector<4x32xf32> -> vector<4x32xf32>
    %c2_138 = arith.constant 2 : index
    %c0_139 = arith.constant 0 : index
    %c0_140 = arith.constant 0 : index
    %446 = vector.load %arg9[%c2_138, %c0_139, %c0_140] : memref<4x16x32xf32, #tpu.memory_space<vmem>>, vector<1x16x32xf32>
    %447 = vector.shape_cast %446 : vector<1x16x32xf32> to vector<16x32xf32>
    %cst_141 = arith.constant dense<0.000000e+00> : vector<4x32xf32>
    %448 = tpu.matmul %420, %447, %cst_141 {dimension_numbers = #tpu.dot_dimension_numbers<[1], [0], [0], [1], [0, 0, 1, 1], [], []>} : vector<4x16xf32>, vector<16x32xf32>, vector<4x32xf32> -> vector<4x32xf32>
    %449 = arith.addf %445, %448 : vector<4x32xf32>
    %c2_142 = arith.constant 2 : index
    %c0_143 = arith.constant 0 : index
    %c0_144 = arith.constant 0 : index
    %450 = vector.load %arg11[%c2_142, %c0_143, %c0_144] : memref<4x1x32xf32, #tpu.memory_space<vmem>>, vector<1x1x32xf32>
    %451 = vector.shape_cast %450 : vector<1x1x32xf32> to vector<1x32xf32>
    %452 = vector.broadcast %451 : vector<1x32xf32> to vector<4x32xf32>
    %453 = arith.addf %449, %452 : vector<4x32xf32>
    %c3_145 = arith.constant 3 : index
    %c0_146 = arith.constant 0 : index
    %c0_147 = arith.constant 0 : index
    %454 = vector.load %arg8[%c3_145, %c0_146, %c0_147] : memref<4x16x32xf32, #tpu.memory_space<vmem>>, vector<1x16x32xf32>
    %455 = vector.shape_cast %454 : vector<1x16x32xf32> to vector<16x32xf32>
    %cst_148 = arith.constant dense<0.000000e+00> : vector<4x32xf32>
    %456 = tpu.matmul %15, %455, %cst_148 {dimension_numbers = #tpu.dot_dimension_numbers<[1], [0], [0], [1], [0, 0, 1, 1], [], []>} : vector<4x16xf32>, vector<16x32xf32>, vector<4x32xf32> -> vector<4x32xf32>
    %c3_149 = arith.constant 3 : index
    %c0_150 = arith.constant 0 : index
    %c0_151 = arith.constant 0 : index
    %457 = vector.load %arg9[%c3_149, %c0_150, %c0_151] : memref<4x16x32xf32, #tpu.memory_space<vmem>>, vector<1x16x32xf32>
    %458 = vector.shape_cast %457 : vector<1x16x32xf32> to vector<16x32xf32>
    %cst_152 = arith.constant dense<0.000000e+00> : vector<4x32xf32>
    %459 = tpu.matmul %420, %458, %cst_152 {dimension_numbers = #tpu.dot_dimension_numbers<[1], [0], [0], [1], [0, 0, 1, 1], [], []>} : vector<4x16xf32>, vector<16x32xf32>, vector<4x32xf32> -> vector<4x32xf32>
    %460 = arith.addf %456, %459 : vector<4x32xf32>
    %c3_153 = arith.constant 3 : index
    %c0_154 = arith.constant 0 : index
    %c0_155 = arith.constant 0 : index
    %461 = vector.load %arg11[%c3_153, %c0_154, %c0_155] : memref<4x1x32xf32, #tpu.memory_space<vmem>>, vector<1x1x32xf32>
    %462 = vector.shape_cast %461 : vector<1x1x32xf32> to vector<1x32xf32>
    %463 = vector.broadcast %462 : vector<1x32xf32> to vector<4x32xf32>
    %464 = arith.addf %460, %463 : vector<4x32xf32>
    %c0_156 = arith.constant 0 : index
    %c0_157 = arith.constant 0 : index
    %c0_158 = arith.constant 0 : index
    %465 = vector.load %arg10[%c0_156, %c0_157, %c0_158] : memref<4x32x32xf32, #tpu.memory_space<vmem>>, vector<1x32x32xf32>
    %466 = vector.shape_cast %465 : vector<1x32x32xf32> to vector<32x32xf32>
    %c1_159 = arith.constant 1 : index
    %c0_160 = arith.constant 0 : index
    %c0_161 = arith.constant 0 : index
    %467 = vector.load %arg10[%c1_159, %c0_160, %c0_161] : memref<4x32x32xf32, #tpu.memory_space<vmem>>, vector<1x32x32xf32>
    %468 = vector.shape_cast %467 : vector<1x32x32xf32> to vector<32x32xf32>
    %c2_162 = arith.constant 2 : index
    %c0_163 = arith.constant 0 : index
    %c0_164 = arith.constant 0 : index
    %469 = vector.load %arg10[%c2_162, %c0_163, %c0_164] : memref<4x32x32xf32, #tpu.memory_space<vmem>>, vector<1x32x32xf32>
    %470 = vector.shape_cast %469 : vector<1x32x32xf32> to vector<32x32xf32>
    %c3_165 = arith.constant 3 : index
    %c0_166 = arith.constant 0 : index
    %c0_167 = arith.constant 0 : index
    %471 = vector.load %arg10[%c3_165, %c0_166, %c0_167] : memref<4x32x32xf32, #tpu.memory_space<vmem>>, vector<1x32x32xf32>
    %472 = vector.shape_cast %471 : vector<1x32x32xf32> to vector<32x32xf32>
    %cst_168 = arith.constant 0.000000e+00 : f32
    %473 = vector.broadcast %cst_168 : f32 to vector<1x32xf32>
    %cst_169 = arith.constant 0.000000e+00 : f32
    %474 = vector.broadcast %cst_169 : f32 to vector<1x32xf32>
    %475 = vector.extract_strided_slice %431 {offsets = [0, 0], sizes = [1, 32], strides = [1, 1]} : vector<4x32xf32> to vector<1x32xf32>
    %476 = vector.extract_strided_slice %442 {offsets = [0, 0], sizes = [1, 32], strides = [1, 1]} : vector<4x32xf32> to vector<1x32xf32>
    %477 = vector.extract_strided_slice %453 {offsets = [0, 0], sizes = [1, 32], strides = [1, 1]} : vector<4x32xf32> to vector<1x32xf32>
    %478 = vector.extract_strided_slice %464 {offsets = [0, 0], sizes = [1, 32], strides = [1, 1]} : vector<4x32xf32> to vector<1x32xf32>
    %cst_170 = arith.constant dense<0.000000e+00> : vector<1x32xf32>
    %479 = tpu.matmul %473, %466, %cst_170 {dimension_numbers = #tpu.dot_dimension_numbers<[1], [0], [0], [1], [0, 0, 1, 1], [], []>} : vector<1x32xf32>, vector<32x32xf32>, vector<1x32xf32> -> vector<1x32xf32>
    %480 = arith.addf %475, %479 : vector<1x32xf32>
    %481 = arith.negf %480 : vector<1x32xf32>
    %482 = math.exp %481 : vector<1x32xf32>
    %cst_171 = arith.constant 1.000000e+00 : f32
    %483 = vector.broadcast %cst_171 : f32 to vector<1x32xf32>
    %484 = arith.addf %483, %482 : vector<1x32xf32>
    %485 = arith.divf %483, %484 : vector<1x32xf32>
    %cst_172 = arith.constant dense<0.000000e+00> : vector<1x32xf32>
    %486 = tpu.matmul %473, %468, %cst_172 {dimension_numbers = #tpu.dot_dimension_numbers<[1], [0], [0], [1], [0, 0, 1, 1], [], []>} : vector<1x32xf32>, vector<32x32xf32>, vector<1x32xf32> -> vector<1x32xf32>
    %487 = arith.addf %476, %486 : vector<1x32xf32>
    %488 = arith.negf %487 : vector<1x32xf32>
    %489 = math.exp %488 : vector<1x32xf32>
    %cst_173 = arith.constant 1.000000e+00 : f32
    %490 = vector.broadcast %cst_173 : f32 to vector<1x32xf32>
    %491 = arith.addf %490, %489 : vector<1x32xf32>
    %492 = arith.divf %490, %491 : vector<1x32xf32>
    %cst_174 = arith.constant dense<0.000000e+00> : vector<1x32xf32>
    %493 = tpu.matmul %473, %470, %cst_174 {dimension_numbers = #tpu.dot_dimension_numbers<[1], [0], [0], [1], [0, 0, 1, 1], [], []>} : vector<1x32xf32>, vector<32x32xf32>, vector<1x32xf32> -> vector<1x32xf32>
    %494 = arith.addf %477, %493 : vector<1x32xf32>
    %495 = math.tanh %494 : vector<1x32xf32>
    %cst_175 = arith.constant dense<0.000000e+00> : vector<1x32xf32>
    %496 = tpu.matmul %473, %472, %cst_175 {dimension_numbers = #tpu.dot_dimension_numbers<[1], [0], [0], [1], [0, 0, 1, 1], [], []>} : vector<1x32xf32>, vector<32x32xf32>, vector<1x32xf32> -> vector<1x32xf32>
    %497 = arith.addf %478, %496 : vector<1x32xf32>
    %498 = arith.negf %497 : vector<1x32xf32>
    %499 = math.exp %498 : vector<1x32xf32>
    %cst_176 = arith.constant 1.000000e+00 : f32
    %500 = vector.broadcast %cst_176 : f32 to vector<1x32xf32>
    %501 = arith.addf %500, %499 : vector<1x32xf32>
    %502 = arith.divf %500, %501 : vector<1x32xf32>
    %503 = arith.mulf %492, %474 : vector<1x32xf32>
    %504 = arith.mulf %485, %495 : vector<1x32xf32>
    %505 = arith.addf %503, %504 : vector<1x32xf32>
    %506 = math.tanh %505 : vector<1x32xf32>
    %507 = arith.mulf %502, %506 : vector<1x32xf32>
    %508 = vector.extract_strided_slice %431 {offsets = [1, 0], sizes = [1, 32], strides = [1, 1]} : vector<4x32xf32> to vector<1x32xf32>
    %509 = vector.extract_strided_slice %442 {offsets = [1, 0], sizes = [1, 32], strides = [1, 1]} : vector<4x32xf32> to vector<1x32xf32>
    %510 = vector.extract_strided_slice %453 {offsets = [1, 0], sizes = [1, 32], strides = [1, 1]} : vector<4x32xf32> to vector<1x32xf32>
    %511 = vector.extract_strided_slice %464 {offsets = [1, 0], sizes = [1, 32], strides = [1, 1]} : vector<4x32xf32> to vector<1x32xf32>
    %cst_177 = arith.constant dense<0.000000e+00> : vector<1x32xf32>
    %512 = tpu.matmul %507, %466, %cst_177 {dimension_numbers = #tpu.dot_dimension_numbers<[1], [0], [0], [1], [0, 0, 1, 1], [], []>} : vector<1x32xf32>, vector<32x32xf32>, vector<1x32xf32> -> vector<1x32xf32>
    %513 = arith.addf %508, %512 : vector<1x32xf32>
    %514 = arith.negf %513 : vector<1x32xf32>
    %515 = math.exp %514 : vector<1x32xf32>
    %cst_178 = arith.constant 1.000000e+00 : f32
    %516 = vector.broadcast %cst_178 : f32 to vector<1x32xf32>
    %517 = arith.addf %516, %515 : vector<1x32xf32>
    %518 = arith.divf %516, %517 : vector<1x32xf32>
    %cst_179 = arith.constant dense<0.000000e+00> : vector<1x32xf32>
    %519 = tpu.matmul %507, %468, %cst_179 {dimension_numbers = #tpu.dot_dimension_numbers<[1], [0], [0], [1], [0, 0, 1, 1], [], []>} : vector<1x32xf32>, vector<32x32xf32>, vector<1x32xf32> -> vector<1x32xf32>
    %520 = arith.addf %509, %519 : vector<1x32xf32>
    %521 = arith.negf %520 : vector<1x32xf32>
    %522 = math.exp %521 : vector<1x32xf32>
    %cst_180 = arith.constant 1.000000e+00 : f32
    %523 = vector.broadcast %cst_180 : f32 to vector<1x32xf32>
    %524 = arith.addf %523, %522 : vector<1x32xf32>
    %525 = arith.divf %523, %524 : vector<1x32xf32>
    %cst_181 = arith.constant dense<0.000000e+00> : vector<1x32xf32>
    %526 = tpu.matmul %507, %470, %cst_181 {dimension_numbers = #tpu.dot_dimension_numbers<[1], [0], [0], [1], [0, 0, 1, 1], [], []>} : vector<1x32xf32>, vector<32x32xf32>, vector<1x32xf32> -> vector<1x32xf32>
    %527 = arith.addf %510, %526 : vector<1x32xf32>
    %528 = math.tanh %527 : vector<1x32xf32>
    %cst_182 = arith.constant dense<0.000000e+00> : vector<1x32xf32>
    %529 = tpu.matmul %507, %472, %cst_182 {dimension_numbers = #tpu.dot_dimension_numbers<[1], [0], [0], [1], [0, 0, 1, 1], [], []>} : vector<1x32xf32>, vector<32x32xf32>, vector<1x32xf32> -> vector<1x32xf32>
    %530 = arith.addf %511, %529 : vector<1x32xf32>
    %531 = arith.negf %530 : vector<1x32xf32>
    %532 = math.exp %531 : vector<1x32xf32>
    %cst_183 = arith.constant 1.000000e+00 : f32
    %533 = vector.broadcast %cst_183 : f32 to vector<1x32xf32>
    %534 = arith.addf %533, %532 : vector<1x32xf32>
    %535 = arith.divf %533, %534 : vector<1x32xf32>
    %536 = arith.mulf %525, %505 : vector<1x32xf32>
    %537 = arith.mulf %518, %528 : vector<1x32xf32>
    %538 = arith.addf %536, %537 : vector<1x32xf32>
    %539 = math.tanh %538 : vector<1x32xf32>
    %540 = arith.mulf %535, %539 : vector<1x32xf32>
    %541 = vector.extract_strided_slice %431 {offsets = [2, 0], sizes = [1, 32], strides = [1, 1]} : vector<4x32xf32> to vector<1x32xf32>
    %542 = vector.extract_strided_slice %442 {offsets = [2, 0], sizes = [1, 32], strides = [1, 1]} : vector<4x32xf32> to vector<1x32xf32>
    %543 = vector.extract_strided_slice %453 {offsets = [2, 0], sizes = [1, 32], strides = [1, 1]} : vector<4x32xf32> to vector<1x32xf32>
    %544 = vector.extract_strided_slice %464 {offsets = [2, 0], sizes = [1, 32], strides = [1, 1]} : vector<4x32xf32> to vector<1x32xf32>
    %cst_184 = arith.constant dense<0.000000e+00> : vector<1x32xf32>
    %545 = tpu.matmul %540, %466, %cst_184 {dimension_numbers = #tpu.dot_dimension_numbers<[1], [0], [0], [1], [0, 0, 1, 1], [], []>} : vector<1x32xf32>, vector<32x32xf32>, vector<1x32xf32> -> vector<1x32xf32>
    %546 = arith.addf %541, %545 : vector<1x32xf32>
    %547 = arith.negf %546 : vector<1x32xf32>
    %548 = math.exp %547 : vector<1x32xf32>
    %cst_185 = arith.constant 1.000000e+00 : f32
    %549 = vector.broadcast %cst_185 : f32 to vector<1x32xf32>
    %550 = arith.addf %549, %548 : vector<1x32xf32>
    %551 = arith.divf %549, %550 : vector<1x32xf32>
    %cst_186 = arith.constant dense<0.000000e+00> : vector<1x32xf32>
    %552 = tpu.matmul %540, %468, %cst_186 {dimension_numbers = #tpu.dot_dimension_numbers<[1], [0], [0], [1], [0, 0, 1, 1], [], []>} : vector<1x32xf32>, vector<32x32xf32>, vector<1x32xf32> -> vector<1x32xf32>
    %553 = arith.addf %542, %552 : vector<1x32xf32>
    %554 = arith.negf %553 : vector<1x32xf32>
    %555 = math.exp %554 : vector<1x32xf32>
    %cst_187 = arith.constant 1.000000e+00 : f32
    %556 = vector.broadcast %cst_187 : f32 to vector<1x32xf32>
    %557 = arith.addf %556, %555 : vector<1x32xf32>
    %558 = arith.divf %556, %557 : vector<1x32xf32>
    %cst_188 = arith.constant dense<0.000000e+00> : vector<1x32xf32>
    %559 = tpu.matmul %540, %470, %cst_188 {dimension_numbers = #tpu.dot_dimension_numbers<[1], [0], [0], [1], [0, 0, 1, 1], [], []>} : vector<1x32xf32>, vector<32x32xf32>, vector<1x32xf32> -> vector<1x32xf32>
    %560 = arith.addf %543, %559 : vector<1x32xf32>
    %561 = math.tanh %560 : vector<1x32xf32>
    %cst_189 = arith.constant dense<0.000000e+00> : vector<1x32xf32>
    %562 = tpu.matmul %540, %472, %cst_189 {dimension_numbers = #tpu.dot_dimension_numbers<[1], [0], [0], [1], [0, 0, 1, 1], [], []>} : vector<1x32xf32>, vector<32x32xf32>, vector<1x32xf32> -> vector<1x32xf32>
    %563 = arith.addf %544, %562 : vector<1x32xf32>
    %564 = arith.negf %563 : vector<1x32xf32>
    %565 = math.exp %564 : vector<1x32xf32>
    %cst_190 = arith.constant 1.000000e+00 : f32
    %566 = vector.broadcast %cst_190 : f32 to vector<1x32xf32>
    %567 = arith.addf %566, %565 : vector<1x32xf32>
    %568 = arith.divf %566, %567 : vector<1x32xf32>
    %569 = arith.mulf %558, %538 : vector<1x32xf32>
    %570 = arith.mulf %551, %561 : vector<1x32xf32>
    %571 = arith.addf %569, %570 : vector<1x32xf32>
    %572 = math.tanh %571 : vector<1x32xf32>
    %573 = arith.mulf %568, %572 : vector<1x32xf32>
    %574 = vector.extract_strided_slice %431 {offsets = [3, 0], sizes = [1, 32], strides = [1, 1]} : vector<4x32xf32> to vector<1x32xf32>
    %575 = vector.extract_strided_slice %442 {offsets = [3, 0], sizes = [1, 32], strides = [1, 1]} : vector<4x32xf32> to vector<1x32xf32>
    %576 = vector.extract_strided_slice %453 {offsets = [3, 0], sizes = [1, 32], strides = [1, 1]} : vector<4x32xf32> to vector<1x32xf32>
    %577 = vector.extract_strided_slice %464 {offsets = [3, 0], sizes = [1, 32], strides = [1, 1]} : vector<4x32xf32> to vector<1x32xf32>
    %cst_191 = arith.constant dense<0.000000e+00> : vector<1x32xf32>
    %578 = tpu.matmul %573, %466, %cst_191 {dimension_numbers = #tpu.dot_dimension_numbers<[1], [0], [0], [1], [0, 0, 1, 1], [], []>} : vector<1x32xf32>, vector<32x32xf32>, vector<1x32xf32> -> vector<1x32xf32>
    %579 = arith.addf %574, %578 : vector<1x32xf32>
    %580 = arith.negf %579 : vector<1x32xf32>
    %581 = math.exp %580 : vector<1x32xf32>
    %cst_192 = arith.constant 1.000000e+00 : f32
    %582 = vector.broadcast %cst_192 : f32 to vector<1x32xf32>
    %583 = arith.addf %582, %581 : vector<1x32xf32>
    %584 = arith.divf %582, %583 : vector<1x32xf32>
    %cst_193 = arith.constant dense<0.000000e+00> : vector<1x32xf32>
    %585 = tpu.matmul %573, %468, %cst_193 {dimension_numbers = #tpu.dot_dimension_numbers<[1], [0], [0], [1], [0, 0, 1, 1], [], []>} : vector<1x32xf32>, vector<32x32xf32>, vector<1x32xf32> -> vector<1x32xf32>
    %586 = arith.addf %575, %585 : vector<1x32xf32>
    %587 = arith.negf %586 : vector<1x32xf32>
    %588 = math.exp %587 : vector<1x32xf32>
    %cst_194 = arith.constant 1.000000e+00 : f32
    %589 = vector.broadcast %cst_194 : f32 to vector<1x32xf32>
    %590 = arith.addf %589, %588 : vector<1x32xf32>
    %591 = arith.divf %589, %590 : vector<1x32xf32>
    %cst_195 = arith.constant dense<0.000000e+00> : vector<1x32xf32>
    %592 = tpu.matmul %573, %470, %cst_195 {dimension_numbers = #tpu.dot_dimension_numbers<[1], [0], [0], [1], [0, 0, 1, 1], [], []>} : vector<1x32xf32>, vector<32x32xf32>, vector<1x32xf32> -> vector<1x32xf32>
    %593 = arith.addf %576, %592 : vector<1x32xf32>
    %594 = math.tanh %593 : vector<1x32xf32>
    %cst_196 = arith.constant dense<0.000000e+00> : vector<1x32xf32>
    %595 = tpu.matmul %573, %472, %cst_196 {dimension_numbers = #tpu.dot_dimension_numbers<[1], [0], [0], [1], [0, 0, 1, 1], [], []>} : vector<1x32xf32>, vector<32x32xf32>, vector<1x32xf32> -> vector<1x32xf32>
    %596 = arith.addf %577, %595 : vector<1x32xf32>
    %597 = arith.negf %596 : vector<1x32xf32>
    %598 = math.exp %597 : vector<1x32xf32>
    %cst_197 = arith.constant 1.000000e+00 : f32
    %599 = vector.broadcast %cst_197 : f32 to vector<1x32xf32>
    %600 = arith.addf %599, %598 : vector<1x32xf32>
    %601 = arith.divf %599, %600 : vector<1x32xf32>
    %602 = arith.mulf %591, %571 : vector<1x32xf32>
    %603 = arith.mulf %584, %594 : vector<1x32xf32>
    %604 = arith.addf %602, %603 : vector<1x32xf32>
    %605 = math.tanh %604 : vector<1x32xf32>
    %606 = arith.mulf %601, %605 : vector<1x32xf32>
    %607 = tpu.concatenate %507, %540, %573, %606 in 0 : vector<1x32xf32>, vector<1x32xf32>, vector<1x32xf32>, vector<1x32xf32> -> vector<4x32xf32>
    %c0_198 = arith.constant 0 : index
    %c0_199 = arith.constant 0 : index
    %608 = vector.load %arg12[%c0_198, %c0_199] : memref<32x3xf32, #tpu.memory_space<vmem>>, vector<32x3xf32>
    %cst_200 = arith.constant dense<0.000000e+00> : vector<4x3xf32>
    %609 = tpu.matmul %607, %608, %cst_200 {dimension_numbers = #tpu.dot_dimension_numbers<[1], [0], [0], [1], [0, 0, 1, 1], [], []>} : vector<4x32xf32>, vector<32x3xf32>, vector<4x3xf32> -> vector<4x3xf32>
    %c0_201 = arith.constant 0 : index
    %c0_202 = arith.constant 0 : index
    %610 = vector.load %arg13[%c0_201, %c0_202] : memref<1x3xf32, #tpu.memory_space<vmem>>, vector<1x3xf32>
    %611 = vector.broadcast %610 : vector<1x3xf32> to vector<4x3xf32>
    %612 = arith.addf %609, %611 : vector<4x3xf32>
    %c0_203 = arith.constant 0 : index
    %c0_204 = arith.constant 0 : index
    %613 = vector.load %arg14[%c0_203, %c0_204] : memref<4x3xf32, #tpu.memory_space<vmem>>, vector<4x3xf32>
    tpu.vector_store %arg14[%c0_203, %c0_204], %612 {strides = array<i32>} : memref<4x3xf32, #tpu.memory_space<vmem>>, vector<4x3xf32>,
    return
  }
}

</mosaic_0001>

<bundles_post_ra>
// kernel: lstm_tagger_forward.1
= control target key start
LH: loop header
LB: loop body
LE: loop exit
PB: predicated region body
PF: predicated region fallthrough
CT: control target
= control target key end

     0   :  { %19 = vsyncpa [#allocation3], 0  ;;  %s8172_s0 = inlined_call_operand.vmem [shape: s32[36,1], index: 0, kind: input, shape index: {}]   ;;  %s8173_s1 = inlined_call_operand.vmem [shape: s32[4,1], index: 1, kind: input, shape index: {}]   ;;  %s8174_s2 = inlined_call_operand.vmem [shape: s32[4,1], index: 2, kind: input, shape index: {}]   ;;  %s8175_s3 = inlined_call_operand.vmem [shape: f32[12,8], index: 3, kind: input, shape index: {}]   ;;  %s8176_s4 = inlined_call_operand.vmem [shape: f32[4,16], index: 4, kind: input, shape index: {}]   ;;  %s8177_s5 = inlined_call_operand.vmem [shape: f32[4,8,16], index: 5, kind: input, shape index: {}]   ;;  %s8178_s6 = inlined_call_operand.vmem [shape: f32[4,16,16], index: 6, kind: input, shape index: {}]   ;;  %s8179_s7 = inlined_call_operand.vmem [shape: f32[4,1,16], index: 7, kind: input, shape index: {}]   ;;  %s8180_s8 = inlined_call_operand.hbm [shape: f32[4,16,32], index: 8, kind: input, shape index: {}]   ;;  %s8181_s9 = inlined_call_operand.hbm [shape: f32[4,16,32], index: 9, kind: input, shape index: {}]   ;;  %s8182_s10 = inlined_call_operand.hbm [shape: f32[4,32,32], index: 10, kind: input, shape index: {}]   ;;  %s8183_s11 = inlined_call_operand.vmem [shape: f32[4,1,32], index: 11, kind: input, shape index: {}]   ;;  %s8184_s12 = inlined_call_operand.vmem [shape: f32[32,3], index: 12, kind: input, shape index: {}]   ;;  %s8185_s13 = inlined_call_operand.hbm [shape: f32[1,3], index: 13, kind: input, shape index: {}]   ;;  %s8186_s14 = inlined_call_operand.hbm [shape: f32[4,3], index: 14, kind: output, shape index: {}]  }
   0x1   :  { %20 = vsyncpa [#allocation6], 0 }
   0x2   :  { %21 = vsyncpa [#allocation9], 0 }
   0x3   :  { %22 = vsyncpa [#allocation4], 0  ;;  %s7081_s29 = smov [#allocation5]   ;;  %s7082_s15 = smov [#allocation2]  }
   0x4   :  { %s56_s30 = sshll.u32 %s7081_s29, 4  ;;  %s44_s16 = sshll.u32 %s7082_s15, 4  ;;  %s57_s30 = int_to_ptr.vmem [resolvable:$true] %s56_s30  ;;  %s45_s16 = int_to_ptr.vmem [resolvable:$true] %s44_s16 }
   0x5   :  { %s6981_s17 = scalar_lea.vmem %s57_s30, 1024  ;;  %p6986_p1 = scmp.lt.s32.totalorder %s57_s30, %s57_s30 }
   0x6   :  { %p6982_p0 = scmp.ne.s32.totalorder %s57_s30, %s6981_s17  ;;  %p6987_p2 = scmp.lt.s32.totalorder %s6981_s17, %s6981_s17 }
   0x8   :  { %p6988_p3 = por %p6987_p2, %p6986_p1 }
   0xa   :  { %p6989_p4 = pnand %p6988_p3, %p6982_p0 }
   0xc   :  { %6992 = shalt.err (!%p6989_p4)
}
   0xd   :  { %s7083_s18 = smov 128   ;;  %s7084_s19 = smov 8  }
   0xe   :  { %62 = dma.hbm_to_vmem [thread:$0]  %s8181_s9, 1024, %s57_s30, [#allocation6], %s7083_s18, %s7083_s18, %s7084_s19  }
   0xf   :  { %s7001_s22 = scalar_lea.vmem %s45_s16, 1024  ;;  %p7006_p6 = scmp.lt.s32.totalorder %s45_s16, %s45_s16 }
  0x10   :  { %p7002_p5 = scmp.ne.s32.totalorder %s45_s16, %s7001_s22  ;;  %p7007_p7 = scmp.lt.s32.totalorder %s7001_s22, %s7001_s22 }
  0x12   :  { %p7008_p8 = por %p7007_p7, %p7006_p6 }
  0x14   :  { %p7009_p9 = pnand %p7008_p8, %p7002_p5 }
  0x16   :  { %7012 = shalt.err (!%p7009_p9)
}
  0x17   :  { %50 = dma.hbm_to_vmem [thread:$0]  %s8180_s8, 1024, %s45_s16, [#allocation3], %s7083_s18, %s7083_s18, %s7084_s19  }
  0x18   :  { %s7085_s25 = smov [#allocation7]   ;;  %s7086_s27 = smov [#allocation8]  }
  0x19   :  { %s68_s26 = sshll.u32 %s7085_s25, 4  ;;  %s85_s28 = sshll.u32 %s7086_s27, 4  ;;  %s69_s26 = int_to_ptr.vmem [resolvable:$true] %s68_s26  ;;  %s86_s28 = int_to_ptr.vmem [resolvable:$true] %s85_s28 }
  0x1a   :  { %s7021_s29 = scalar_lea.vmem %s69_s26, 2048  ;;  %p7026_p11 = scmp.lt.s32.totalorder %s69_s26, %s69_s26 }
  0x1b   :  { %p7022_p10 = scmp.ne.s32.totalorder %s69_s26, %s7021_s29  ;;  %p7027_p12 = scmp.lt.s32.totalorder %s7021_s29, %s7021_s29 }
  0x1d   :  { %p7028_p13 = por %p7027_p12, %p7026_p11 }
  0x1f   :  { %p7029_p0 = pnand %p7028_p13, %p7022_p10 }
  0x21   :  { %7032 = shalt.err (!%p7029_p0)
}
  0x22   :  { %74 = dma.hbm_to_vmem [thread:$0]  %s8182_s10, 2048, %s69_s26, [#allocation6], %s7083_s18, %s7083_s18, %s7084_s19  }
  0x23   :  { %s7041_s15 = scalar_lea.vmem %s86_s28, 16  ;;  %s7045_s8 = scalar_lea.vmem %s86_s28, 32 }
  0x24   :  { %p7042_p1 = scmp.ne.s32.totalorder %s86_s28, %s7041_s15  ;;  %p7046_p2 = scmp.lt.s32.totalorder %s86_s28, %s86_s28 }
  0x25   :  { %p7047_p3 = scmp.lt.s32.totalorder %s7045_s8, %s7041_s15 }
  0x27   :  { %p7048_p4 = por %p7047_p3, %p7046_p2 }
  0x29   :  { %p7049_p5 = pnand %p7048_p4, %p7042_p1 }
  0x2b   :  { %7052 = shalt.err (!%p7049_p5)
}
  0x2c   :  { %88 = dma.hbm_to_vmem [thread:$0]  %s8185_s13, 16, %s86_s28, [#allocation9]  }
  0x2d   :  { %7073 = dma.done.wait [#allocation3], 1024  }
  0x2e   :  { %7074 = vsyncadd [#allocation3], 4294966272 }
  0x2f   :  { %7075 = dma.done.wait [#allocation6], 3072  }
  0x30   :  { %7076 = vsyncadd [#allocation6], 4294964224 }
  0x31   :  { %7077 = dma.done.wait [#allocation9], 16  }
  0x32   :  { %7078 = vsyncadd [#allocation9], 4294967280  ;;  %v7087_v0 = vmov 0   ;;  %v7088_v1 = vmov 0.0   ;;  %vm7089_vm0 = vmmov 0   ;;  %v103_v2 = vld [vmem:[%s8172_s0 + $0x10] sm:$0xff]  ;;  %v106_v21 = vlaneseq }
  0x33   :  { %6756 = vset.pattern.permute.xlu1 %v7087_v0  ;;  %6755 = vset.pattern.permute.xlu0 %v7087_v0  ;;  %v101_v3 = vld [vmem:[%s8172_s0] sm:$0xff]  ;;  %vm156_vm1 = vcmask 1043456   ;;  %v104_v4 = vld [vmem:[%s8172_s0 + $0x18] sm:$0xff]  ;;  %v102_v5 = vld [vmem:[%s8172_s0 + $0x8] sm:$0xff]  ;;  %vm140_vm11 = vcmask 97280  }
  0x34   :  { %6158 = vmatprep.subr.mxu0 %v7088_v1  ;;  %6182 = vmatprep.subr.mxu1 %v7088_v1  ;;  %v139_v6 = vld [vmem:[%s8175_s3 + $0x8] sm:$0xf]  ;;  %v138_v7 = vld [vmem:[%s8175_s3] sm:$0xff]  ;;  %v107_v22 = vand.u32 127, %v106_v21  ;;  %v5786_v37 = vld [vmem:[%s8177_s5 + $0x10] sm:$0xff] }
  0x35   :  { %6162 = vmatprep.mubr.msk.f32.mxu0 %vm7089_vm0, %v7088_v1  ;;  %6184 = vmatprep.mubr.msk.f32.mxu1 %vm7089_vm0, %v7088_v1  ;;  %v335_v8 = vld [vmem:[%s8174_s2] sm:$0xf]  ;;  %v5778_v36 = vld [vmem:[%s8177_s5 + $0x8] sm:$0xff]  ;;  %v5794_v39 = vld [vmem:[%s8177_s5 + $0x18] sm:$0xff] }
  0x36   :  { %115 = vperm.xlu1 %6756, %v103_v2   ;;  %109 = vperm.xlu0 %6755, %v101_v3   ;;  %v250_v9 = vld [vmem:[%s8173_s1] sm:$0xf]  ;;  %vm1407_vm2 = vcmp.gt.s32.totalorder %v335_v8, 1  ;;  %vm1073_vm3 = vcmp.gt.s32.totalorder %v335_v8, 0  ;;  %vm2066_vm4 = vcmp.gt.s32.totalorder %v335_v8, 3  ;;  %vm1732_vm5 = vcmp.gt.s32.totalorder %v335_v8, 2 }
  0x37   :  { %6159 = vmatpush3.msk.msra.mxu0 %vm156_vm1, %v139_v6  ;;  %v105_v10 = vld [vmem:[%s8172_s0 + $0x20] sm:$0xf]  ;;  %v1408_v11 = vsel %vm1407_vm2, 1, %v7087_v0  ;;  %v1074_v12 = vsel %vm1073_vm3, 1, %v7087_v0  ;;  %v2067_v13 = vsel %vm2066_vm4, 1, %v7087_v0  ;;  %v1733_v14 = vsel %vm1732_vm5, 1, %v7087_v0 }
  0x38   :  { %6160 = vmatprep.subr.mxu0 %v7088_v1  ;;  %vm2725_vm6 = vcmp.gt.s32.totalorder %v335_v8, 5  ;;  %vm2391_vm7 = vcmp.gt.s32.totalorder %v335_v8, 4  ;;  %vm3384_vm8 = vcmp.gt.s32.totalorder %v335_v8, 7  ;;  %vm3050_vm9 = vcmp.gt.s32.totalorder %v335_v8, 6  ;;  %v336_v19 = vld [vmem:[%s8177_s5] sm:$0xff]  ;;  %v7291_v49 = vld [vmem:[%s8178_s6 + $0x8] sm:$0xff] }
  0x39   :  { %6161 = vmatpush3.msra.mxu0 %v138_v7  ;;  %v2726_v15 = vsel %vm2725_vm6, 1, %v7087_v0  ;;  %v2392_v16 = vsel %vm2391_vm7, 1, %v7087_v0  ;;  %v3385_v17 = vsel %vm3384_vm8, 1, %v7087_v0  ;;  %v3051_v18 = vsel %vm3050_vm9, 1, %v7087_v0  ;;  %6183 = vmatpush3.msra.mxu1 %v336_v19  ;;  %v257_v24 = vld [vmem:[%s8176_s4] sm:$0xf] }
  0x3a   :  { %118 = vperm.xlu1 %6756, %v104_v4   ;;  %112 = vperm.xlu0 %6755, %v102_v5   ;;  %vm3709_vm10 = vcmp.gt.s32.totalorder %v335_v8, 8  ;;  %vm258_vm3 = vcmask 31744   ;;  %vm344_vm4 = vcmask 64512   ;;  %v7300_v51 = vld [vmem:[%s8178_s6] sm:$0xff]  ;;  %v7311_v53 = vld [vmem:[%s8178_s6 + $0x18] sm:$0xff]  ;;  %v7325_v54 = vld [vmem:[%s8178_s6 + $0x10] sm:$0xff] }
  0x3b   :  { %6177 = vmatprep.subr.mxu0 %v7088_v1  ;;  %v3710_v20 = vsel %vm3709_vm10, 1, %v7087_v0  ;;  %6216 = vmatprep.subr.mxu1 %v7088_v1  ;;  %v7356_v55 = vld [vmem:[%s8178_s6 + $0x28] sm:$0xff]  ;;  %v7364_v56 = vld [vmem:[%s8178_s6 + $0x20] sm:$0xff]  ;;  %v7373_v57 = vld [vmem:[%s8178_s6 + $0x38] sm:$0xff]  ;;  %vm761_vm6 = vcmask 130048  }
  0x3c   :  { %v7381_v58 = vld [vmem:[%s8178_s6 + $0x30] sm:$0xff]  ;;  %v5772_v63 = vld [vmem:[%s8179_s7] ss:$0 sm:$0xff]  ;;  %v5780_v0 = vld [vmem:[%s8179_s7 + $0x1] ss:$0 sm:$0xff] }
  0x3e   :  { %252 = vperm.xlu1 %6756, %v250_v9   ;;  %121 = vperm.xlu0 %6755, %v105_v10  }
  0x42   :  { %1410 = vperm.xlu1 %6756, %v1408_v11   ;;  %1076 = vperm.xlu0 %6755, %v1074_v12  }
  0x46   :  { %2069 = vperm.xlu1 %6756, %v2067_v13   ;;  %1735 = vperm.xlu0 %6755, %v1733_v14  }
  0x4a   :  { %2728 = vperm.xlu1 %6756, %v2726_v15   ;;  %2394 = vperm.xlu0 %6755, %v2392_v16  }
  0x4e   :  { %3387 = vperm.xlu1 %6756, %v3385_v17   ;;  %3053 = vperm.xlu0 %6755, %v3051_v18  }
  0x52   :  { %3712 = vperm.xlu0 %6755, %v3710_v20  }
  0xb1   :  { %v110_v23 = vpop.permute.xlu0 %109  ;;  %v116_v26 = vpop.permute.xlu1 %115 }
  0xb2   :  { %vm123_vm12 = vcmp.eq.s32.totalorder %v107_v22, %v110_v23  ;;  %vm125_vm13 = vcmp.eq.s32.totalorder %v107_v22, %v116_v26 }
  0xb3   :  { %v5758_v25 = vsel %vm123_vm12, 1.0, %v7088_v1  ;;  %v5760_v29 = vsel %vm125_vm13, 1.0, %v7088_v1 }
  0xb4   :  { %6163 = vmatmul.mubr.msk.f32.vlgmr.msra.gmra.mxu0 %vm140_vm11, %v5758_v25 }
  0xb5   :  { %v113_v27 = vpop.permute.xlu0 %112  ;;  %6165 = vmatprep.mubr.msk.f32.mxu0 %vm7089_vm0, %v7088_v1  ;;  %6178 = vmatpush3.msk.msra.mxu0 %vm156_vm1, %v257_v24  ;;  %v119_v30 = vpop.permute.xlu1 %118 }
  0xb6   :  { %vm124_vm14 = vcmp.eq.s32.totalorder %v107_v22, %v113_v27  ;;  %6199 = vmatprep.subr.mxu0 %v7088_v1  ;;  %vm126_vm15 = vcmp.eq.s32.totalorder %v107_v22, %v119_v30  ;;  %v5788_v30 = vld [vmem:[%s8179_s7 + $0x2] ss:$0 sm:$0xff] }
  0xb7   :  { %v5759_v28 = vsel %vm124_vm14, 1.0, %v7088_v1  ;;  %v5761_v32 = vsel %vm126_vm15, 1.0, %v7088_v1  ;;  %vm4358_vm15 = vcmask 261120  }
  0xb8   :  { %6166 = vmatmul.mubr.msk.f32.gmra.mxu0 %vm140_vm11, %v5759_v28 }
  0xb9   :  { %6168 = vmatprep.mubr.msk.f32.mxu0 %vm7089_vm0, %v7088_v1  ;;  %v122_v31 = vpop.permute.xlu0 %121  ;;  %v253_v33 = vpop.permute.xlu1 %252 }
  0xba   :  { %vm127_vm1 = vcmp.eq.s32.totalorder %v107_v22, %v122_v31  ;;  %vm254_vm2 = vcmp.eq.s32.totalorder %v107_v22, %v253_v33  ;;  %v5796_v31 = vld [vmem:[%s8179_s7 + $0x3] ss:$0 sm:$0xff] }
  0xbb   :  { %v5762_v34 = vsel %vm127_vm1, 1.0, %v7088_v1  ;;  %v5769_v35 = vsel %vm254_vm2, 1.0, %v7088_v1  ;;  %vm5649_vm1 = vcmask 1040384   ;;  %vm5651_vm2 = vcmask 1041408  }
  0xbc   :  { %6169 = vmatmul.mubr.msk.f32.gmra.mxu0 %vm140_vm11, %v5760_v29 }
  0xbd   :  { %6171 = vmatprep.mubr.msk.f32.mxu0 %vm7089_vm0, %v7088_v1 }
  0xc0   :  { %6172 = vmatmul.mubr.msk.f32.gmra.mxu0 %vm140_vm11, %v5761_v32 }
  0xc1   :  { %6174 = vmatprep.mubr.msk.f32.mxu0 %vm7089_vm0, %v7088_v1 }
  0xc4   :  { %6175 = vmatmul.mubr.msk.f32.gmra.mxu0 %vm140_vm11, %v5762_v34 }
  0xc5   :  { %6179 = vmatprep.mubr.msk.f32.mxu0 %vm7089_vm0, %v7088_v1 }
  0xc8   :  { %6180 = vmatmul.mubr.msk.f32.vlgmr.msra.gmra.mxu0 %vm258_vm3, %v5769_v35  ;;  %vm5739_vm3 = vcmask 19456  }
  0xc9   :  { %6201 = vmatprep.mubr.msk.f32.mxu0 %vm7089_vm0, %v7088_v1  ;;  %6200 = vmatpush3.msra.mxu0 %v5778_v36 }
  0xca   :  { %6233 = vmatprep.subr.mxu0 %v7088_v1 }
 0x174   :  { %v226_v38 = vpop.f32.mrf.mxu0 }
 0x175   :  { %6185 = vmatmul.mubr.msk.f32.vlgmr.msra.gmra.mxu1 %vm344_vm4, %v226_v38  ;;  %6202 = vmatmul.mubr.msk.f32.vlgmr.msra.gmra.mxu0 %vm344_vm4, %v226_v38 }
 0x176   :  { %6217 = vmatpush3.msra.mxu1 %v5786_v37  ;;  %v6164_v40 = vpop.f32.mrf.mxu0  ;;  %6187 = vmatprep.mubr.msk.f32.mxu1 %vm7089_vm0, %v7088_v1 }
 0x177   :  { %6204 = vmatprep.mubr.msk.f32.mxu0 %vm7089_vm0, %v7088_v1  ;;  %6234 = vmatpush3.msra.mxu0 %v5794_v39 }
 0x178   :  { %v231_v41 = vpop.f32.mrf.mxu0  ;;  %6250 = vmatprep.subr.mxu1 %v7088_v1  ;;  %6285 = vmatprep.subr.mxu0 %v7088_v1 }
 0x179   :  { %6188 = vmatmul.mubr.msk.f32.gmra.mxu1 %vm344_vm4, %v231_v41  ;;  %6205 = vmatmul.mubr.msk.f32.gmra.mxu0 %vm344_vm4, %v231_v41 }
 0x17a   :  { %v6167_v42 = vpop.f32.mrf.mxu0  ;;  %6190 = vmatprep.mubr.msk.f32.mxu1 %vm7089_vm0, %v7088_v1  ;;  %6207 = vmatprep.mubr.msk.f32.mxu0 %vm7089_vm0, %v7088_v1 }
 0x17c   :  { %v236_v43 = vpop.f32.mrf.mxu0 }
 0x17d   :  { %6191 = vmatmul.mubr.msk.f32.gmra.mxu1 %vm344_vm4, %v236_v43  ;;  %6208 = vmatmul.mubr.msk.f32.gmra.mxu0 %vm344_vm4, %v236_v43 }
 0x17e   :  { %v6170_v44 = vpop.f32.mrf.mxu0  ;;  %6193 = vmatprep.mubr.msk.f32.mxu1 %vm7089_vm0, %v7088_v1  ;;  %6210 = vmatprep.mubr.msk.f32.mxu0 %vm7089_vm0, %v7088_v1 }
 0x180   :  { %v241_v45 = vpop.f32.mrf.mxu0 }
 0x181   :  { %6194 = vmatmul.mubr.msk.f32.gmra.mxu1 %vm344_vm4, %v241_v45  ;;  %6211 = vmatmul.mubr.msk.f32.gmra.mxu0 %vm344_vm4, %v241_v45 }
 0x182   :  { %v6173_v46 = vpop.f32.mrf.mxu0  ;;  %6196 = vmatprep.mubr.msk.f32.mxu1 %vm7089_vm0, %v7088_v1  ;;  %6213 = vmatprep.mubr.msk.f32.mxu0 %vm7089_vm0, %v7088_v1 }
 0x184   :  { %v246_v47 = vpop.f32.mrf.mxu0 }
 0x185   :  { %6197 = vmatmul.mubr.msk.f32.gmra.mxu1 %vm344_vm4, %v246_v47  ;;  %6214 = vmatmul.mubr.msk.f32.gmra.mxu0 %vm344_vm4, %v246_v47 }
 0x186   :  { %v6176_v48 = vpop.f32.mrf.mxu0  ;;  %6218 = vmatprep.mubr.msk.f32.mxu1 %vm7089_vm0, %v7088_v1  ;;  %6235 = vmatprep.mubr.msk.f32.mxu0 %vm7089_vm0, %v7088_v1 }
 0x188   :  { %v7293_v50 = vpop.f32.mrf.mxu0 }
 0x189   :  { %6219 = vmatmul.mubr.msk.f32.vlgmr.msra.gmra.mxu1 %vm344_vm4, %v226_v38  ;;  %6236 = vmatmul.mubr.msk.f32.vlgmr.msra.gmra.mxu0 %vm344_vm4, %v226_v38 }
 0x18a   :  { %6251 = vmatpush3.msra.mxu1 %v7291_v49  ;;  %v6181_v52 = vpop.f32.mrf.mxu0  ;;  %6221 = vmatprep.mubr.msk.f32.mxu1 %vm7089_vm0, %v7088_v1 }
 0x18b   :  { %6238 = vmatprep.mubr.msk.f32.mxu0 %vm7089_vm0, %v7088_v1  ;;  %6252 = vmatprep.subr.mxu1 %v7088_v1 }
 0x18c   :  { %6253 = vmatpush3.msra.mxu1 %v7300_v51  ;;  %6286 = vmatpush3.msra.mxu0 %v7311_v53 }
 0x18d   :  { %6222 = vmatmul.mubr.msk.f32.gmra.mxu1 %vm344_vm4, %v231_v41  ;;  %6239 = vmatmul.mubr.msk.f32.gmra.mxu0 %vm344_vm4, %v231_v41 }
 0x18e   :  { %6224 = vmatprep.mubr.msk.f32.mxu1 %vm7089_vm0, %v7088_v1  ;;  %6241 = vmatprep.mubr.msk.f32.mxu0 %vm7089_vm0, %v7088_v1 }
 0x18f   :  { %6257 = vmatprep.subr.mxu1 %v7088_v1  ;;  %6287 = vmatprep.subr.mxu0 %v7088_v1 }
 0x190   :  { %6288 = vmatpush3.msra.mxu0 %v7325_v54 }
 0x191   :  { %6225 = vmatmul.mubr.msk.f32.gmra.mxu1 %vm344_vm4, %v236_v43  ;;  %6242 = vmatmul.mubr.msk.f32.gmra.mxu0 %vm344_vm4, %v236_v43 }
 0x192   :  { %6227 = vmatprep.mubr.msk.f32.mxu1 %vm7089_vm0, %v7088_v1  ;;  %6244 = vmatprep.mubr.msk.f32.mxu0 %vm7089_vm0, %v7088_v1 }
 0x193   :  { %6299 = vmatprep.subr.mxu0 %v7088_v1 }
 0x195   :  { %6228 = vmatmul.mubr.msk.f32.gmra.mxu1 %vm344_vm4, %v241_v45  ;;  %6245 = vmatmul.mubr.msk.f32.gmra.mxu0 %vm344_vm4, %v241_v45 }
 0x196   :  { %6230 = vmatprep.mubr.msk.f32.mxu1 %vm7089_vm0, %v7088_v1  ;;  %6247 = vmatprep.mubr.msk.f32.mxu0 %vm7089_vm0, %v7088_v1 }
 0x199   :  { %6231 = vmatmul.mubr.msk.f32.gmra.mxu1 %vm344_vm4, %v246_v47  ;;  %6248 = vmatmul.mubr.msk.f32.gmra.mxu0 %vm344_vm4, %v246_v47 }
 0x19a   :  { %6254 = vmatprep.mubr.msk.f32.mxu1 %vm7089_vm0, %v7088_v1  ;;  %6289 = vmatprep.mubr.msk.f32.mxu0 %vm7089_vm0, %v7088_v1 }
 0x19d   :  { %6255 = vmatmul.mubr.f32.vlgmr.msra.gmra.mxu1 %v7088_v1 }
 0x19e   :  { %6258 = vmatpush3.msra.mxu1 %v7311_v53  ;;  %6261 = vmatprep.mubr.msk.f32.mxu1 %vm7089_vm0, %v7088_v1 }
 0x19f   :  { %6259 = vmatprep.subr.mxu1 %v7088_v1 }
 0x1a0   :  { %6260 = vmatpush3.msra.mxu1 %v7325_v54 }
 0x1a1   :  { %6262 = vmatmul.mubr.f32.vlgmr.msra.gmra.mxu1 %v7088_v1  ;;  %6264 = vmatprep.subr.mxu1 %v7088_v1 }
 0x1a2   :  { %6265 = vmatpush3.msra.mxu1 %v7356_v55  ;;  %6268 = vmatprep.mubr.msk.f32.mxu1 %vm7089_vm0, %v7088_v1 }
 0x1a3   :  { %6266 = vmatprep.subr.mxu1 %v7088_v1 }
 0x1a4   :  { %6267 = vmatpush3.msra.mxu1 %v7364_v56 }
 0x1a5   :  { %6269 = vmatmul.mubr.f32.vlgmr.msra.gmra.mxu1 %v7088_v1  ;;  %6271 = vmatprep.subr.mxu1 %v7088_v1 }
 0x1a6   :  { %6272 = vmatpush3.msra.mxu1 %v7373_v57  ;;  %6275 = vmatprep.mubr.msk.f32.mxu1 %vm7089_vm0, %v7088_v1 }
 0x1a7   :  { %6273 = vmatprep.subr.mxu1 %v7088_v1 }
 0x1a8   :  { %6274 = vmatpush3.msra.mxu1 %v7381_v58 }
 0x1a9   :  { %6276 = vmatmul.mubr.f32.vlgmr.msra.gmra.mxu1 %v7088_v1  ;;  %6278 = vmatprep.subr.mxu1 %v7088_v1 }
 0x1aa   :  { %6279 = vmatpush3.msra.mxu1 %v7291_v49  ;;  %6282 = vmatprep.mubr.msk.f32.mxu1 %vm7089_vm0, %v7088_v1 }
 0x1ab   :  { %6280 = vmatprep.subr.mxu1 %v7088_v1 }
 0x1ac   :  { %6281 = vmatpush3.msra.mxu1 %v7300_v51 }
 0x1ad   :  { %6292 = vmatprep.subr.mxu1 %v7088_v1 }
 0x235   :  { %v426_v59 = vpop.f32.mrf.mxu1  ;;  %v7396_v60 = vpop.f32.mrf.mxu0 }
 0x237   :  { %v6186_v61 = vpop.f32.mrf.mxu1  ;;  %v6203_v62 = vpop.f32.mrf.mxu0 }
 0x239   :  { %v431_v2 = vpop.f32.mrf.mxu1  ;;  %v531_v3 = vpop.f32.mrf.mxu0 }
 0x23a   :  { %v7404_v4 = vadd.f32 %v5772_v63, %v431_v2  ;;  %v7406_v5 = vadd.f32 %v5780_v0, %v531_v3 }
 0x23b   :  { %v6189_v6 = vpop.f32.mrf.mxu1  ;;  %v6206_v7 = vpop.f32.mrf.mxu0 }
 0x23d   :  { %v436_v8 = vpop.f32.mrf.mxu1  ;;  %v536_v9 = vpop.f32.mrf.mxu0 }
 0x23e   :  { %v7408_v10 = vadd.f32 %v5772_v63, %v436_v8  ;;  %v7410_v11 = vadd.f32 %v5780_v0, %v536_v9  ;;  %v7442_v8 = vadd.f32 %v5772_v63, %v426_v59 }
 0x23f   :  { %v6192_v12 = vpop.f32.mrf.mxu1  ;;  %v6209_v13 = vpop.f32.mrf.mxu0 }
 0x241   :  { %v441_v14 = vpop.f32.mrf.mxu1  ;;  %v541_v15 = vpop.f32.mrf.mxu0 }
 0x242   :  { %v7412_v16 = vadd.f32 %v5772_v63, %v441_v14  ;;  %v7414_v17 = vadd.f32 %v5780_v0, %v541_v15  ;;  %v7446_v14 = vadd.f32 %v5780_v0, %v7396_v60 }
 0x243   :  { %v6195_v18 = vpop.f32.mrf.mxu1  ;;  %v6212_v19 = vpop.f32.mrf.mxu0 }
 0x245   :  { %v446_v20 = vpop.f32.mrf.mxu1  ;;  %v546_v21 = vpop.f32.mrf.mxu0 }
 0x246   :  { %v7416_v22 = vadd.f32 %v5772_v63, %v446_v20  ;;  %v7418_v23 = vadd.f32 %v5780_v0, %v546_v21 }
 0x247   :  { %v6198_v24 = vpop.f32.mrf.mxu1  ;;  %v6215_v25 = vpop.f32.mrf.mxu0 }
 0x249   :  { %v626_v26 = vpop.f32.mrf.mxu1  ;;  %v726_v27 = vpop.f32.mrf.mxu0 }
 0x24b   :  { %v6220_v28 = vpop.f32.mrf.mxu1  ;;  %v6237_v29 = vpop.f32.mrf.mxu0 }
 0x24c   :  { %v7449_v28 = vadd.f32 %v5796_v31, %v726_v27 }
 0x24d   :  { %v631_v32 = vpop.f32.mrf.mxu1  ;;  %v731_v33 = vpop.f32.mrf.mxu0 }
 0x24e   :  { %v7426_v34 = vadd.f32 %v5788_v30, %v631_v32  ;;  %v7428_v35 = vadd.f32 %v5796_v31, %v731_v33  ;;  %v7452_v33 = vadd.f32 %v5788_v30, %v626_v26 }
 0x24f   :  { %v6223_v36 = vpop.f32.mrf.mxu1  ;;  %v6240_v37 = vpop.f32.mrf.mxu0 }
 0x251   :  { %v636_v38 = vpop.f32.mrf.mxu1  ;;  %v736_v39 = vpop.f32.mrf.mxu0 }
 0x252   :  { %v7430_v40 = vadd.f32 %v5788_v30, %v636_v38  ;;  %v7432_v41 = vadd.f32 %v5796_v31, %v736_v39 }
 0x253   :  { %v6226_v42 = vpop.f32.mrf.mxu1  ;;  %v6243_v43 = vpop.f32.mrf.mxu0 }
 0x255   :  { %v641_v44 = vpop.f32.mrf.mxu1  ;;  %v741_v45 = vpop.f32.mrf.mxu0 }
 0x256   :  { %v7434_v46 = vadd.f32 %v5788_v30, %v641_v44  ;;  %v7436_v47 = vadd.f32 %v5796_v31, %v741_v45  ;;  %v1077_v44 = vpop.permute.xlu0 %1076 }
 0x257   :  { %v6229_v48 = vpop.f32.mrf.mxu1  ;;  %v6246_v52 = vpop.f32.mrf.mxu0  ;;  %vm1078_vm5 = vcmp.eq.s32.totalorder %v1077_v44, 1 }
 0x259   :  { %v646_v61 = vpop.f32.mrf.mxu1  ;;  %v746_v62 = vpop.f32.mrf.mxu0 }
 0x25a   :  { %v7438_v2 = vadd.f32 %v5788_v30, %v646_v61  ;;  %v7440_v3 = vadd.f32 %v5796_v31, %v746_v62 }
 0x25b   :  { %v6232_v6 = vpop.f32.mrf.mxu1  ;;  %v6249_v7 = vpop.f32.mrf.mxu0 }
 0x25d   :  { %v831_v9 = vpop.f32.mrf.mxu1 }
 0x25e   :  { %v835_v12 = vadd.f32 %v831_v9, %v7442_v8 }
 0x25f   :  { %v6256_v13 = vpop.f32.mrf.mxu1 }
 0x260   :  { %v5808_v15 = vmul.f32 -1.442695, %v835_v12 }
 0x261   :  { %v908_v18 = vpop.f32.mrf.mxu1 }
 0x262   :  { %6757 = vpow2.f32 %v5808_v15  ;;  %v912_v19 = vadd.f32 %v908_v18, %v7446_v14 }
 0x263   :  { %v6263_v20 = vpop.f32.mrf.mxu1 }
 0x264   :  { %v5809_v21 = vmul.f32 -1.442695, %v912_v19 }
 0x265   :  { %v985_v24 = vpop.f32.mrf.mxu1 }
 0x266   :  { %6759 = vpow2.f32 %v5809_v21  ;;  %v989_v36 = vadd.f32 %v985_v24, %v7452_v33 }
 0x267   :  { %v6270_v25 = vpop.f32.mrf.mxu1 }
 0x269   :  { %v1057_v59 = vpop.f32.mrf.mxu1 }
 0x26a   :  { %v1061_v63 = vadd.f32 %v1057_v59, %v7449_v28 }
 0x26b   :  { %v6277_v29 = vpop.f32.mrf.mxu1 }
 0x26c   :  { %v5810_v60 = vmul.f32 -1.442695, %v1061_v63 }
 0x26e   :  { %6761 = vpow2.f32 %v5810_v60 }
 0x26f   :  { %v6758_v32 = vpop.eup %6757 }
 0x270   :  { %v839_v0 = vadd.f32 1.0, %v6758_v32 }
 0x272   :  { %6763 = vrcp.f32 %v839_v0 }
 0x273   :  { %v6760_v37 = vpop.eup %6759  ;;  %6765 = vtanh.f32 %v989_v36 }
 0x274   :  { %v916_v38 = vadd.f32 1.0, %v6760_v37 }
 0x276   :  { %6767 = vrcp.f32 %v916_v38 }
 0x27b   :  { %v6762_v39 = vpop.eup %6761 }
 0x27c   :  { %v1065_v43 = vadd.f32 1.0, %v6762_v39 }
 0x27e   :  { %6769 = vrcp.f32 %v1065_v43 }
 0x27f   :  { %v6764_v27 = vpop.eup %6763 }
 0x280   :  { %v6766_v31 = vpop.eup %6765 }
 0x281   :  { %v1069_v48 = vmul.f32 %v6766_v31, %v6764_v27 }
 0x283   :  { %v6768_v42 = vpop.eup %6767 }
 0x284   :  { %v1068_v45 = vmul.f32 0.0, %v6768_v42 }
 0x286   :  { %v1070_v26 = vadd.f32 %v1069_v48, %v1068_v45 }
 0x288   :  { %6771 = vtanh.f32 %v1070_v26  ;;  %v7455_v30 = vsel %vm1078_vm5, %v1070_v26, 0.0  ;;  %v1411_v26 = vpop.permute.xlu1 %1410 }
 0x289   :  { %v1400_v43 = vrot.slane %v7455_v30, 4  ;;  %vm1412_vm7 = vcmp.eq.s32.totalorder %v1411_v26, 1 }
 0x28b   :  { %v6770_v52 = vpop.eup %6769 }
 0x295   :  { %v6772_v61 = vpop.eup %6771 }
 0x296   :  { %v1072_v62 = vmul.f32 %v6772_v61, %v6770_v52 }
 0x298   :  { %v7457_v6 = vsel %vm1078_vm5, %v1072_v62, 0.0 }
 0x299   :  { %6283 = vmatmul.mubr.msk.f32.vlgmr.msra.gmra.mxu1 %vm761_vm6, %v7457_v6  ;;  %6290 = vmatmul.mubr.msk.f32.vlgmr.msra.gmra.mxu0 %vm761_vm6, %v7457_v6 }
 0x29a   :  { %6293 = vmatpush3.msra.mxu1 %v7356_v55  ;;  %6300 = vmatpush3.msra.mxu0 %v7373_v57 }
 0x29b   :  { %6294 = vmatprep.subr.mxu1 %v7088_v1  ;;  %6301 = vmatprep.subr.mxu0 %v7088_v1 }
 0x29c   :  { %6295 = vmatpush3.msra.mxu1 %v7364_v56  ;;  %6296 = vmatprep.mubr.msk.f32.mxu1 %vm7089_vm0, %v7088_v1 }
 0x29d   :  { %6302 = vmatpush3.msra.mxu0 %v7381_v58  ;;  %6303 = vmatprep.mubr.msk.f32.mxu0 %vm7089_vm0, %v7088_v1 }
 0x29e   :  { %6297 = vmatmul.mubr.msk.f32.vlgmr.msra.gmra.mxu1 %vm761_vm6, %v7457_v6  ;;  %6304 = vmatmul.mubr.msk.f32.vlgmr.msra.gmra.mxu0 %vm761_vm6, %v7457_v6 }
 0x29f   :  { %6306 = vmatprep.subr.mxu1 %v7088_v1  ;;  %6313 = vmatprep.subr.mxu0 %v7088_v1 }
 0x2a0   :  { %6307 = vmatpush3.msra.mxu1 %v7291_v49  ;;  %6314 = vmatpush3.msra.mxu0 %v7311_v53 }
 0x2a1   :  { %6308 = vmatprep.subr.mxu1 %v7088_v1  ;;  %6315 = vmatprep.subr.mxu0 %v7088_v1 }
 0x2a2   :  { %6309 = vmatpush3.msra.mxu1 %v7300_v51  ;;  %6316 = vmatpush3.msra.mxu0 %v7325_v54 }
 0x2a3   :  { %6310 = vmatprep.mubr.msk.f32.mxu1 %vm7089_vm0, %v7088_v1  ;;  %6317 = vmatprep.mubr.msk.f32.mxu0 %vm7089_vm0, %v7088_v1 }
 0x2a4   :  { %6320 = vmatprep.subr.mxu1 %v7088_v1  ;;  %6327 = vmatprep.subr.mxu0 %v7088_v1 }
 0x359   :  { %v1150_v7 = vpop.f32.mrf.mxu1  ;;  %v1230_v9 = vpop.f32.mrf.mxu0 }
 0x35a   :  { %v1155_v12 = vrot.slane %v1150_v7, 4  ;;  %v1235_v13 = vrot.slane %v1230_v9, 4 }
 0x35b   :  { %v6284_v15 = vpop.f32.mrf.mxu1  ;;  %v6291_v18 = vpop.f32.mrf.mxu0 }
 0x35c   :  { %v1157_v19 = vadd.f32 %v1155_v12, %v7442_v8  ;;  %v1237_v20 = vadd.f32 %v1235_v13, %v7446_v14 }
 0x35e   :  { %v5812_v21 = vmul.f32 -1.442695, %v1157_v19  ;;  %v5814_v24 = vmul.f32 -1.442695, %v1237_v20  ;;  %v1310_v25 = vpop.f32.mrf.mxu1  ;;  %v1385_v59 = vpop.f32.mrf.mxu0 }
 0x35f   :  { %v1390_v32 = vrot.slane %v1385_v59, 4  ;;  %v1315_v0 = vrot.slane %v1310_v25, 4 }
 0x360   :  { %6773 = vpow2.f32 %v5812_v21  ;;  %v6298_v63 = vpop.f32.mrf.mxu1  ;;  %v6305_v29 = vpop.f32.mrf.mxu0 }
 0x361   :  { %6775 = vpow2.f32 %v5814_v24  ;;  %v1392_v60 = vadd.f32 %v1390_v32, %v7449_v28  ;;  %v1317_v37 = vadd.f32 %v1315_v0, %v7452_v33 }
 0x363   :  { %v5817_v36 = vmul.f32 -1.442695, %v1392_v60 }
 0x365   :  { %6777 = vpow2.f32 %v5817_v36 }
 0x366   :  { %6779 = vtanh.f32 %v1317_v37 }
 0x36d   :  { %v6774_v38 = vpop.eup %6773 }
 0x36e   :  { %v6776_v39 = vpop.eup %6775  ;;  %v1161_v8 = vadd.f32 1.0, %v6774_v38 }
 0x36f   :  { %v1241_v14 = vadd.f32 1.0, %v6776_v39 }
 0x370   :  { %6781 = vrcp.f32 %v1161_v8 }
 0x371   :  { %6783 = vrcp.f32 %v1241_v14 }
 0x372   :  { %v6778_v27 = vpop.eup %6777 }
 0x373   :  { %v6780_v31 = vpop.eup %6779  ;;  %v1396_v28 = vadd.f32 1.0, %v6778_v27 }
 0x375   :  { %6785 = vrcp.f32 %v1396_v28 }
 0x37d   :  { %v6782_v42 = vpop.eup %6781 }
 0x37e   :  { %v6784_v44 = vpop.eup %6783  ;;  %v1403_v45 = vmul.f32 %v6782_v42, %v6780_v31 }
 0x37f   :  { %v1402_v48 = vmul.f32 %v6784_v44, %v1400_v43  ;;  %v1736_v44 = vpop.permute.xlu0 %1735 }
 0x380   :  { %vm1737_vm8 = vcmp.eq.s32.totalorder %v1736_v44, 1 }
 0x381   :  { %v1404_v52 = vadd.f32 %v1403_v45, %v1402_v48 }
 0x382   :  { %v6786_v62 = vpop.eup %6785 }
 0x383   :  { %6787 = vtanh.f32 %v1404_v52  ;;  %v1418_v33 = vrot.slane %v1404_v52, 4 }
 0x385   :  { %v7497_v61 = vsel %vm1412_vm7, %v1418_v33, %v7455_v30 }
 0x390   :  { %v6788_v7 = vpop.eup %6787 }
 0x391   :  { %v1406_v9 = vmul.f32 %v6788_v7, %v6786_v62 }
 0x393   :  { %v1414_v12 = vrot.slane %v1406_v9, 4 }
 0x395   :  { %v7500_v13 = vsel %vm1412_vm7, %v1414_v12, %v7457_v6 }
 0x396   :  { %6311 = vmatmul.mubr.msk.f32.vlgmr.msra.gmra.mxu1 %vm761_vm6, %v7500_v13  ;;  %6318 = vmatmul.mubr.msk.f32.vlgmr.msra.gmra.mxu0 %vm761_vm6, %v7500_v13 }
 0x397   :  { %6321 = vmatpush3.msra.mxu1 %v7356_v55  ;;  %6328 = vmatpush3.msra.mxu0 %v7373_v57 }
 0x398   :  { %6322 = vmatprep.subr.mxu1 %v7088_v1  ;;  %6329 = vmatprep.subr.mxu0 %v7088_v1 }
 0x399   :  { %6323 = vmatpush3.msra.mxu1 %v7364_v56  ;;  %6324 = vmatprep.mubr.msk.f32.mxu1 %vm7089_vm0, %v7088_v1 }
 0x39a   :  { %6330 = vmatpush3.msra.mxu0 %v7381_v58  ;;  %6331 = vmatprep.mubr.msk.f32.mxu0 %vm7089_vm0, %v7088_v1 }
 0x39b   :  { %6325 = vmatmul.mubr.msk.f32.vlgmr.msra.gmra.mxu1 %vm761_vm6, %v7500_v13  ;;  %6332 = vmatmul.mubr.msk.f32.vlgmr.msra.gmra.mxu0 %vm761_vm6, %v7500_v13 }
 0x39c   :  { %6334 = vmatprep.subr.mxu1 %v7088_v1  ;;  %6341 = vmatprep.subr.mxu0 %v7088_v1 }
 0x39d   :  { %6335 = vmatpush3.msra.mxu1 %v7291_v49  ;;  %6342 = vmatpush3.msra.mxu0 %v7311_v53 }
 0x39e   :  { %6336 = vmatprep.subr.mxu1 %v7088_v1  ;;  %6343 = vmatprep.subr.mxu0 %v7088_v1 }
 0x39f   :  { %6337 = vmatpush3.msra.mxu1 %v7300_v51  ;;  %6344 = vmatpush3.msra.mxu0 %v7325_v54 }
 0x3a0   :  { %6338 = vmatprep.mubr.msk.f32.mxu1 %vm7089_vm0, %v7088_v1  ;;  %6345 = vmatprep.mubr.msk.f32.mxu0 %vm7089_vm0, %v7088_v1 }
 0x3a1   :  { %6348 = vmatprep.subr.mxu1 %v7088_v1  ;;  %6355 = vmatprep.subr.mxu0 %v7088_v1 }
 0x456   :  { %v1490_v30 = vpop.f32.mrf.mxu1  ;;  %v1567_v6 = vpop.f32.mrf.mxu0 }
 0x457   :  { %v1494_v15 = vadd.f32 %v1490_v30, %v7404_v4  ;;  %v1571_v18 = vadd.f32 %v1567_v6, %v7406_v5 }
 0x458   :  { %v6312_v19 = vpop.f32.mrf.mxu1  ;;  %v6319_v20 = vpop.f32.mrf.mxu0 }
 0x459   :  { %v5819_v21 = vmul.f32 -1.442695, %v1494_v15  ;;  %v5821_v24 = vmul.f32 -1.442695, %v1571_v18 }
 0x45b   :  { %6789 = vpow2.f32 %v5819_v21  ;;  %v1644_v25 = vpop.f32.mrf.mxu1  ;;  %v1716_v59 = vpop.f32.mrf.mxu0 }
 0x45c   :  { %6791 = vpow2.f32 %v5821_v24  ;;  %v1720_v32 = vadd.f32 %v1716_v59, %v7428_v35  ;;  %v1648_v0 = vadd.f32 %v1644_v25, %v7426_v34 }
 0x45d   :  { %v6326_v63 = vpop.f32.mrf.mxu1  ;;  %v6333_v29 = vpop.f32.mrf.mxu0 }
 0x45e   :  { %v5824_v60 = vmul.f32 -1.442695, %v1720_v32 }
 0x460   :  { %6793 = vpow2.f32 %v5824_v60 }
 0x461   :  { %6795 = vtanh.f32 %v1648_v0 }
 0x468   :  { %v6790_v36 = vpop.eup %6789 }
 0x469   :  { %v6792_v37 = vpop.eup %6791  ;;  %v1498_v38 = vadd.f32 1.0, %v6790_v36 }
 0x46a   :  { %v1575_v39 = vadd.f32 1.0, %v6792_v37 }
 0x46b   :  { %6797 = vrcp.f32 %v1498_v38 }
 0x46c   :  { %6799 = vrcp.f32 %v1575_v39 }
 0x46d   :  { %v6794_v8 = vpop.eup %6793 }
 0x46e   :  { %v6796_v14 = vpop.eup %6795  ;;  %v1724_v43 = vadd.f32 1.0, %v6794_v8 }
 0x470   :  { %6801 = vrcp.f32 %v1724_v43 }
 0x478   :  { %v6798_v27 = vpop.eup %6797 }
 0x479   :  { %v6800_v31 = vpop.eup %6799  ;;  %v1728_v42 = vmul.f32 %v6798_v27, %v6796_v14 }
 0x47a   :  { %v1727_v45 = vmul.f32 %v6800_v31, %v7497_v61 }
 0x47c   :  { %v1729_v28 = vadd.f32 %v1728_v42, %v1727_v45  ;;  %v2070_v42 = vpop.permute.xlu1 %2069 }
 0x47d   :  { %v6802_v26 = vpop.eup %6801  ;;  %vm2071_vm9 = vcmp.eq.s32.totalorder %v2070_v42, 1 }
 0x47e   :  { %6803 = vtanh.f32 %v1729_v28  ;;  %v7540_v48 = vsel %vm1737_vm8, %v1729_v28, %v7497_v61 }
 0x47f   :  { %v2059_v8 = vrot.slane %v7540_v48, 4 }
 0x48b   :  { %v6804_v52 = vpop.eup %6803 }
 0x48c   :  { %v1731_v33 = vmul.f32 %v6804_v52, %v6802_v26 }
 0x48e   :  { %v7543_v62 = vsel %vm1737_vm8, %v1731_v33, %v7500_v13 }
 0x48f   :  { %6339 = vmatmul.mubr.msk.f32.vlgmr.msra.gmra.mxu1 %vm761_vm6, %v7543_v62  ;;  %6346 = vmatmul.mubr.msk.f32.vlgmr.msra.gmra.mxu0 %vm761_vm6, %v7543_v62 }
 0x490   :  { %6349 = vmatpush3.msra.mxu1 %v7356_v55  ;;  %6356 = vmatpush3.msra.mxu0 %v7373_v57 }
 0x491   :  { %6350 = vmatprep.subr.mxu1 %v7088_v1  ;;  %6357 = vmatprep.subr.mxu0 %v7088_v1 }
 0x492   :  { %6351 = vmatpush3.msra.mxu1 %v7364_v56  ;;  %6352 = vmatprep.mubr.msk.f32.mxu1 %vm7089_vm0, %v7088_v1 }
 0x493   :  { %6358 = vmatpush3.msra.mxu0 %v7381_v58  ;;  %6359 = vmatprep.mubr.msk.f32.mxu0 %vm7089_vm0, %v7088_v1 }
 0x494   :  { %6353 = vmatmul.mubr.msk.f32.vlgmr.msra.gmra.mxu1 %vm761_vm6, %v7543_v62  ;;  %6360 = vmatmul.mubr.msk.f32.vlgmr.msra.gmra.mxu0 %vm761_vm6, %v7543_v62 }
 0x495   :  { %6362 = vmatprep.subr.mxu1 %v7088_v1  ;;  %6369 = vmatprep.subr.mxu0 %v7088_v1 }
 0x496   :  { %6363 = vmatpush3.msra.mxu1 %v7291_v49  ;;  %6370 = vmatpush3.msra.mxu0 %v7311_v53 }
 0x497   :  { %6364 = vmatprep.subr.mxu1 %v7088_v1  ;;  %6371 = vmatprep.subr.mxu0 %v7088_v1 }
 0x498   :  { %6365 = vmatpush3.msra.mxu1 %v7300_v51  ;;  %6372 = vmatpush3.msra.mxu0 %v7325_v54 }
 0x499   :  { %6366 = vmatprep.mubr.msk.f32.mxu1 %vm7089_vm0, %v7088_v1  ;;  %6373 = vmatprep.mubr.msk.f32.mxu0 %vm7089_vm0, %v7088_v1 }
 0x49a   :  { %6376 = vmatprep.subr.mxu1 %v7088_v1  ;;  %6383 = vmatprep.subr.mxu0 %v7088_v1 }
 0x54f   :  { %v1809_v61 = vpop.f32.mrf.mxu1  ;;  %v1889_v7 = vpop.f32.mrf.mxu0 }
 0x550   :  { %v1814_v9 = vrot.slane %v1809_v61, 4  ;;  %v1894_v12 = vrot.slane %v1889_v7, 4 }
 0x551   :  { %v6340_v13 = vpop.f32.mrf.mxu1  ;;  %v6347_v30 = vpop.f32.mrf.mxu0 }
 0x552   :  { %v1816_v6 = vadd.f32 %v1814_v9, %v7404_v4  ;;  %v1896_v15 = vadd.f32 %v1894_v12, %v7406_v5 }
 0x554   :  { %v5826_v18 = vmul.f32 -1.442695, %v1816_v6  ;;  %v5828_v19 = vmul.f32 -1.442695, %v1896_v15  ;;  %v1969_v20 = vpop.f32.mrf.mxu1  ;;  %v2044_v21 = vpop.f32.mrf.mxu0 }
 0x555   :  { %v2049_v59 = vrot.slane %v2044_v21, 4  ;;  %v1974_v29 = vrot.slane %v1969_v20, 4 }
 0x556   :  { %6805 = vpow2.f32 %v5826_v18  ;;  %v6354_v24 = vpop.f32.mrf.mxu1  ;;  %v6361_v25 = vpop.f32.mrf.mxu0 }
 0x557   :  { %6807 = vpow2.f32 %v5828_v19  ;;  %v2051_v63 = vadd.f32 %v2049_v59, %v7428_v35  ;;  %v1976_v60 = vadd.f32 %v1974_v29, %v7426_v34 }
 0x559   :  { %v5831_v32 = vmul.f32 -1.442695, %v2051_v63 }
 0x55b   :  { %6809 = vpow2.f32 %v5831_v32 }
 0x55c   :  { %6811 = vtanh.f32 %v1976_v60 }
 0x563   :  { %v6806_v0 = vpop.eup %6805 }
 0x564   :  { %v6808_v36 = vpop.eup %6807  ;;  %v1820_v4 = vadd.f32 1.0, %v6806_v0 }
 0x565   :  { %v1900_v5 = vadd.f32 1.0, %v6808_v36 }
 0x566   :  { %6813 = vrcp.f32 %v1820_v4 }
 0x567   :  { %6815 = vrcp.f32 %v1900_v5 }
 0x568   :  { %v6810_v37 = vpop.eup %6809 }
 0x569   :  { %v6812_v38 = vpop.eup %6811  ;;  %v2055_v35 = vadd.f32 1.0, %v6810_v37  ;;  %v2395_v37 = vpop.permute.xlu0 %2394 }
 0x56a   :  { %vm2396_vm10 = vcmp.eq.s32.totalorder %v2395_v37, 1 }
 0x56b   :  { %6817 = vrcp.f32 %v2055_v35 }
 0x573   :  { %v6814_v39 = vpop.eup %6813 }
 0x574   :  { %v6816_v14 = vpop.eup %6815  ;;  %v2062_v27 = vmul.f32 %v6814_v39, %v6812_v38 }
 0x575   :  { %v2061_v31 = vmul.f32 %v6816_v14, %v2059_v8 }
 0x577   :  { %v2063_v43 = vadd.f32 %v2062_v27, %v2061_v31 }
 0x578   :  { %v6818_v45 = vpop.eup %6817 }
 0x579   :  { %6819 = vtanh.f32 %v2063_v43  ;;  %v2077_v34 = vrot.slane %v2063_v43, 4 }
 0x57b   :  { %v7583_v44 = vsel %vm2071_vm9, %v2077_v34, %v7540_v48 }
 0x586   :  { %v6820_v28 = vpop.eup %6819 }
 0x587   :  { %v2065_v26 = vmul.f32 %v6820_v28, %v6818_v45 }
 0x589   :  { %v2073_v52 = vrot.slane %v2065_v26, 4 }
 0x58b   :  { %v7586_v33 = vsel %vm2071_vm9, %v2073_v52, %v7543_v62 }
 0x58c   :  { %6367 = vmatmul.mubr.msk.f32.vlgmr.msra.gmra.mxu1 %vm761_vm6, %v7586_v33  ;;  %6374 = vmatmul.mubr.msk.f32.vlgmr.msra.gmra.mxu0 %vm761_vm6, %v7586_v33 }
 0x58d   :  { %6377 = vmatpush3.msra.mxu1 %v7356_v55  ;;  %6384 = vmatpush3.msra.mxu0 %v7373_v57 }
 0x58e   :  { %6378 = vmatprep.subr.mxu1 %v7088_v1  ;;  %6385 = vmatprep.subr.mxu0 %v7088_v1 }
 0x58f   :  { %6379 = vmatpush3.msra.mxu1 %v7364_v56  ;;  %6380 = vmatprep.mubr.msk.f32.mxu1 %vm7089_vm0, %v7088_v1 }
 0x590   :  { %6386 = vmatpush3.msra.mxu0 %v7381_v58  ;;  %6387 = vmatprep.mubr.msk.f32.mxu0 %vm7089_vm0, %v7088_v1 }
 0x591   :  { %6381 = vmatmul.mubr.msk.f32.vlgmr.msra.gmra.mxu1 %vm761_vm6, %v7586_v33  ;;  %6388 = vmatmul.mubr.msk.f32.vlgmr.msra.gmra.mxu0 %vm761_vm6, %v7586_v33 }
 0x592   :  { %6390 = vmatprep.subr.mxu1 %v7088_v1  ;;  %6397 = vmatprep.subr.mxu0 %v7088_v1 }
 0x593   :  { %6391 = vmatpush3.msra.mxu1 %v7291_v49  ;;  %6398 = vmatpush3.msra.mxu0 %v7311_v53 }
 0x594   :  { %6392 = vmatprep.subr.mxu1 %v7088_v1  ;;  %6399 = vmatprep.subr.mxu0 %v7088_v1 }
 0x595   :  { %6393 = vmatpush3.msra.mxu1 %v7300_v51  ;;  %6400 = vmatpush3.msra.mxu0 %v7325_v54 }
 0x596   :  { %6394 = vmatprep.mubr.msk.f32.mxu1 %vm7089_vm0, %v7088_v1  ;;  %6401 = vmatprep.mubr.msk.f32.mxu0 %vm7089_vm0, %v7088_v1 }
 0x597   :  { %6404 = vmatprep.subr.mxu1 %v7088_v1  ;;  %6411 = vmatprep.subr.mxu0 %v7088_v1 }
 0x64c   :  { %v2149_v48 = vpop.f32.mrf.mxu1  ;;  %v2226_v62 = vpop.f32.mrf.mxu0 }
 0x64d   :  { %v2153_v61 = vadd.f32 %v2149_v48, %v7408_v10  ;;  %v2230_v7 = vadd.f32 %v2226_v62, %v7410_v11 }
 0x64e   :  { %v6368_v9 = vpop.f32.mrf.mxu1  ;;  %v6375_v12 = vpop.f32.mrf.mxu0 }
 0x64f   :  { %v5833_v13 = vmul.f32 -1.442695, %v2153_v61  ;;  %v5835_v30 = vmul.f32 -1.442695, %v2230_v7 }
 0x651   :  { %6821 = vpow2.f32 %v5833_v13  ;;  %v2303_v6 = vpop.f32.mrf.mxu1  ;;  %v2375_v15 = vpop.f32.mrf.mxu0 }
 0x652   :  { %6823 = vpow2.f32 %v5835_v30  ;;  %v2379_v20 = vadd.f32 %v2375_v15, %v7432_v41  ;;  %v2307_v24 = vadd.f32 %v2303_v6, %v7430_v40 }
 0x653   :  { %v6382_v18 = vpop.f32.mrf.mxu1  ;;  %v6389_v19 = vpop.f32.mrf.mxu0 }
 0x654   :  { %v5838_v21 = vmul.f32 -1.442695, %v2379_v20 }
 0x656   :  { %6825 = vpow2.f32 %v5838_v21 }
 0x657   :  { %6827 = vtanh.f32 %v2307_v24 }
 0x65e   :  { %v6822_v25 = vpop.eup %6821 }
 0x65f   :  { %v6824_v59 = vpop.eup %6823  ;;  %v2157_v63 = vadd.f32 1.0, %v6822_v25  ;;  %v2729_v25 = vpop.permute.xlu1 %2728 }
 0x660   :  { %v2234_v29 = vadd.f32 1.0, %v6824_v59  ;;  %vm2730_vm11 = vcmp.eq.s32.totalorder %v2729_v25, 1 }
 0x661   :  { %6829 = vrcp.f32 %v2157_v63 }
 0x662   :  { %6831 = vrcp.f32 %v2234_v29 }
 0x663   :  { %v6826_v32 = vpop.eup %6825 }
 0x664   :  { %v6828_v60 = vpop.eup %6827  ;;  %v2383_v5 = vadd.f32 1.0, %v6826_v32 }
 0x666   :  { %6833 = vrcp.f32 %v2383_v5 }
 0x66e   :  { %v6830_v0 = vpop.eup %6829 }
 0x66f   :  { %v6832_v36 = vpop.eup %6831  ;;  %v2387_v4 = vmul.f32 %v6830_v0, %v6828_v60 }
 0x670   :  { %v2386_v38 = vmul.f32 %v6832_v36, %v7583_v44 }
 0x672   :  { %v2388_v39 = vadd.f32 %v2387_v4, %v2386_v38 }
 0x673   :  { %v6834_v14 = vpop.eup %6833 }
 0x674   :  { %6835 = vtanh.f32 %v2388_v39  ;;  %v7626_v8 = vsel %vm2396_vm10, %v2388_v39, %v7583_v44 }
 0x675   :  { %v2718_v19 = vrot.slane %v7626_v8, 4 }
 0x681   :  { %v6836_v27 = vpop.eup %6835 }
 0x682   :  { %v2390_v35 = vmul.f32 %v6836_v27, %v6834_v14 }
 0x684   :  { %v7629_v31 = vsel %vm2396_vm10, %v2390_v35, %v7586_v33 }
 0x685   :  { %6395 = vmatmul.mubr.msk.f32.vlgmr.msra.gmra.mxu1 %vm761_vm6, %v7629_v31  ;;  %6402 = vmatmul.mubr.msk.f32.vlgmr.msra.gmra.mxu0 %vm761_vm6, %v7629_v31 }
 0x686   :  { %6405 = vmatpush3.msra.mxu1 %v7356_v55  ;;  %6412 = vmatpush3.msra.mxu0 %v7373_v57 }
 0x687   :  { %6406 = vmatprep.subr.mxu1 %v7088_v1  ;;  %6413 = vmatprep.subr.mxu0 %v7088_v1 }
 0x688   :  { %6407 = vmatpush3.msra.mxu1 %v7364_v56  ;;  %6408 = vmatprep.mubr.msk.f32.mxu1 %vm7089_vm0, %v7088_v1 }
 0x689   :  { %6414 = vmatpush3.msra.mxu0 %v7381_v58  ;;  %6415 = vmatprep.mubr.msk.f32.mxu0 %vm7089_vm0, %v7088_v1 }
 0x68a   :  { %6409 = vmatmul.mubr.msk.f32.vlgmr.msra.gmra.mxu1 %vm761_vm6, %v7629_v31  ;;  %6416 = vmatmul.mubr.msk.f32.vlgmr.msra.gmra.mxu0 %vm761_vm6, %v7629_v31 }
 0x68b   :  { %6418 = vmatprep.subr.mxu1 %v7088_v1  ;;  %6425 = vmatprep.subr.mxu0 %v7088_v1 }
 0x68c   :  { %6419 = vmatpush3.msra.mxu1 %v7291_v49  ;;  %6426 = vmatpush3.msra.mxu0 %v7311_v53 }
 0x68d   :  { %6420 = vmatprep.subr.mxu1 %v7088_v1  ;;  %6427 = vmatprep.subr.mxu0 %v7088_v1 }
 0x68e   :  { %6421 = vmatpush3.msra.mxu1 %v7300_v51  ;;  %6428 = vmatpush3.msra.mxu0 %v7325_v54 }
 0x68f   :  { %6422 = vmatprep.mubr.msk.f32.mxu1 %vm7089_vm0, %v7088_v1  ;;  %6429 = vmatprep.mubr.msk.f32.mxu0 %vm7089_vm0, %v7088_v1 }
 0x690   :  { %6432 = vmatprep.subr.mxu1 %v7088_v1  ;;  %6439 = vmatprep.subr.mxu0 %v7088_v1 }
 0x745   :  { %v2468_v49 = vpop.f32.mrf.mxu1  ;;  %v2548_v53 = vpop.f32.mrf.mxu0 }
 0x746   :  { %v2473_v42 = vrot.slane %v2468_v49, 4  ;;  %v2553_v43 = vrot.slane %v2548_v53, 4 }
 0x747   :  { %v6396_v34 = vpop.f32.mrf.mxu1  ;;  %v6403_v44 = vpop.f32.mrf.mxu0 }
 0x748   :  { %v2475_v51 = vadd.f32 %v2473_v42, %v7408_v10  ;;  %v2555_v54 = vadd.f32 %v2553_v43, %v7410_v11 }
 0x74a   :  { %v5840_v45 = vmul.f32 -1.442695, %v2475_v51  ;;  %v5842_v28 = vmul.f32 -1.442695, %v2555_v54  ;;  %v2628_v26 = vpop.f32.mrf.mxu1  ;;  %v2703_v52 = vpop.f32.mrf.mxu0 }
 0x74b   :  { %v2708_v62 = vrot.slane %v2703_v52, 4  ;;  %v2633_v7 = vrot.slane %v2628_v26, 4 }
 0x74c   :  { %6837 = vpow2.f32 %v5840_v45  ;;  %v6410_v33 = vpop.f32.mrf.mxu1  ;;  %v6417_v48 = vpop.f32.mrf.mxu0 }
 0x74d   :  { %6839 = vpow2.f32 %v5842_v28  ;;  %v2710_v61 = vadd.f32 %v2708_v62, %v7432_v41  ;;  %v2635_v12 = vadd.f32 %v2633_v7, %v7430_v40 }
 0x74f   :  { %v5845_v9 = vmul.f32 -1.442695, %v2710_v61  ;;  %v3054_v61 = vpop.permute.xlu0 %3053 }
 0x750   :  { %vm3055_vm12 = vcmp.eq.s32.totalorder %v3054_v61, 1  ;;  %v4186_v61 = vld [vmem:[#allocation2 + $0x38] sm:$0xff] }
 0x751   :  { %6841 = vpow2.f32 %v5845_v9 }
 0x752   :  { %6843 = vtanh.f32 %v2635_v12 }
 0x759   :  { %v6838_v13 = vpop.eup %6837 }
 0x75a   :  { %v6840_v30 = vpop.eup %6839  ;;  %v2479_v10 = vadd.f32 1.0, %v6838_v13 }
 0x75b   :  { %v2559_v11 = vadd.f32 1.0, %v6840_v30 }
 0x75c   :  { %6845 = vrcp.f32 %v2479_v10 }
 0x75d   :  { %6847 = vrcp.f32 %v2559_v11 }
 0x75e   :  { %v6842_v6 = vpop.eup %6841 }
 0x75f   :  { %v6844_v15 = vpop.eup %6843  ;;  %v2714_v41 = vadd.f32 1.0, %v6842_v6  ;;  %v7744_v6 = vld [vmem:[%s8178_s6 + $0x28] sm:$0xff] }
 0x761   :  { %6849 = vrcp.f32 %v2714_v41 }
 0x769   :  { %v6846_v18 = vpop.eup %6845 }
 0x76a   :  { %v6848_v20 = vpop.eup %6847  ;;  %v2721_v21 = vmul.f32 %v6846_v18, %v6844_v15  ;;  %v7750_v15 = vld [vmem:[%s8178_s6 + $0x38] sm:$0xff]  ;;  %v7758_v18 = vld [vmem:[%s8178_s6 + $0x20] sm:$0xff] }
 0x76b   :  { %v2720_v24 = vmul.f32 %v6848_v20, %v2718_v19  ;;  %v7766_v19 = vld [vmem:[%s8178_s6 + $0x30] sm:$0xff] }
 0x76d   :  { %v2722_v59 = vadd.f32 %v2721_v21, %v2720_v24 }
 0x76e   :  { %v6850_v29 = vpop.eup %6849 }
 0x76f   :  { %6851 = vtanh.f32 %v2722_v59  ;;  %v2736_v40 = vrot.slane %v2722_v59, 4 }
 0x771   :  { %v7669_v63 = vsel %vm2730_vm11, %v2736_v40, %v7626_v8 }
 0x77c   :  { %v6852_v32 = vpop.eup %6851 }
 0x77d   :  { %v2724_v60 = vmul.f32 %v6852_v32, %v6850_v29 }
 0x77f   :  { %v2732_v0 = vrot.slane %v2724_v60, 4 }
 0x781   :  { %v7672_v36 = vsel %vm2730_vm11, %v2732_v0, %v7629_v31 }
 0x782   :  { %6423 = vmatmul.mubr.msk.f32.vlgmr.msra.gmra.mxu1 %vm761_vm6, %v7672_v36  ;;  %6430 = vmatmul.mubr.msk.f32.vlgmr.msra.gmra.mxu0 %vm761_vm6, %v7672_v36 }
 0x783   :  { %6433 = vmatpush3.msra.mxu1 %v7356_v55  ;;  %6440 = vmatpush3.msra.mxu0 %v7373_v57  ;;  %v7697_v55 = vld [vmem:[%s8178_s6 + $0x8] sm:$0xff]  ;;  %v7711_v57 = vld [vmem:[%s8178_s6] sm:$0xff] }
 0x784   :  { %6434 = vmatprep.subr.mxu1 %v7088_v1  ;;  %6441 = vmatprep.subr.mxu0 %v7088_v1 }
 0x785   :  { %6435 = vmatpush3.msra.mxu1 %v7364_v56  ;;  %6436 = vmatprep.mubr.msk.f32.mxu1 %vm7089_vm0, %v7088_v1  ;;  %v7703_v56 = vld [vmem:[%s8178_s6 + $0x18] sm:$0xff] }
 0x786   :  { %6442 = vmatpush3.msra.mxu0 %v7381_v58  ;;  %6443 = vmatprep.mubr.msk.f32.mxu0 %vm7089_vm0, %v7088_v1  ;;  %v7717_v58 = vld [vmem:[%s8178_s6 + $0x10] sm:$0xff] }
 0x787   :  { %6437 = vmatmul.mubr.msk.f32.vlgmr.msra.gmra.mxu1 %vm761_vm6, %v7672_v36  ;;  %6444 = vmatmul.mubr.msk.f32.vlgmr.msra.gmra.mxu0 %vm761_vm6, %v7672_v36 }
 0x788   :  { %6446 = vmatprep.subr.mxu1 %v7088_v1  ;;  %6453 = vmatprep.subr.mxu0 %v7088_v1 }
 0x789   :  { %6447 = vmatpush3.msra.mxu1 %v7697_v55  ;;  %6454 = vmatpush3.msra.mxu0 %v7703_v56 }
 0x78a   :  { %6448 = vmatprep.subr.mxu1 %v7088_v1  ;;  %6455 = vmatprep.subr.mxu0 %v7088_v1 }
 0x78b   :  { %6449 = vmatpush3.msra.mxu1 %v7711_v57  ;;  %6456 = vmatpush3.msra.mxu0 %v7717_v58 }
 0x78c   :  { %6450 = vmatprep.mubr.msk.f32.mxu1 %vm7089_vm0, %v7088_v1  ;;  %6457 = vmatprep.mubr.msk.f32.mxu0 %vm7089_vm0, %v7088_v1 }
 0x78d   :  { %6460 = vmatprep.subr.mxu1 %v7088_v1  ;;  %6467 = vmatprep.subr.mxu0 %v7088_v1 }
 0x842   :  { %v2808_v4 = vpop.f32.mrf.mxu1  ;;  %v2885_v5 = vpop.f32.mrf.mxu0 }
 0x843   :  { %v2812_v37 = vadd.f32 %v2808_v4, %v7412_v16  ;;  %v2889_v38 = vadd.f32 %v2885_v5, %v7414_v17 }
 0x844   :  { %v6424_v39 = vpop.f32.mrf.mxu1  ;;  %v6431_v8 = vpop.f32.mrf.mxu0 }
 0x845   :  { %v5847_v14 = vmul.f32 -1.442695, %v2812_v37  ;;  %v5849_v27 = vmul.f32 -1.442695, %v2889_v38 }
 0x847   :  { %6853 = vpow2.f32 %v5847_v14  ;;  %v2962_v35 = vpop.f32.mrf.mxu1  ;;  %v3034_v31 = vpop.f32.mrf.mxu0 }
 0x848   :  { %6855 = vpow2.f32 %v5849_v27  ;;  %v3038_v42 = vadd.f32 %v3034_v31, %v7436_v47  ;;  %v2966_v34 = vadd.f32 %v2962_v35, %v7434_v46 }
 0x849   :  { %v6438_v49 = vpop.f32.mrf.mxu1  ;;  %v6445_v53 = vpop.f32.mrf.mxu0 }
 0x84a   :  { %v5852_v43 = vmul.f32 -1.442695, %v3038_v42  ;;  %v3388_v53 = vpop.permute.xlu1 %3387 }
 0x84b   :  { %vm3389_vm13 = vcmp.eq.s32.totalorder %v3388_v53, 1  ;;  %v3713_v53 = vpop.permute.xlu0 %3712 }
 0x84c   :  { %6857 = vpow2.f32 %v5852_v43  ;;  %vm3714_vm14 = vcmp.eq.s32.totalorder %v3713_v53, 1 }
 0x84d   :  { %6859 = vtanh.f32 %v2966_v34 }
 0x854   :  { %v6854_v44 = vpop.eup %6853 }
 0x855   :  { %v6856_v51 = vpop.eup %6855  ;;  %v2816_v54 = vadd.f32 1.0, %v6854_v44 }
 0x856   :  { %v2893_v45 = vadd.f32 1.0, %v6856_v51 }
 0x857   :  { %6861 = vrcp.f32 %v2816_v54 }
 0x858   :  { %6863 = vrcp.f32 %v2893_v45 }
 0x859   :  { %v6858_v28 = vpop.eup %6857 }
 0x85a   :  { %v6860_v26 = vpop.eup %6859  ;;  %v3042_v62 = vadd.f32 1.0, %v6858_v28  ;;  %v3717_v28 = vld [vmem:[#allocation2 + $0x8] sm:$0xff] }
 0x85c   :  { %6865 = vrcp.f32 %v3042_v62  ;;  %v4030_v62 = vld [vmem:[#allocation2 + $0x20] sm:$0xff] }
 0x864   :  { %v6862_v52 = vpop.eup %6861 }
 0x865   :  { %v6864_v33 = vpop.eup %6863  ;;  %v3046_v48 = vmul.f32 %v6862_v52, %v6860_v26  ;;  %v3716_v26 = vld [vmem:[#allocation2] sm:$0xff]  ;;  %v3876_v52 = vld [vmem:[#allocation2 + $0x18] sm:$0xff] }
 0x866   :  { %v3045_v7 = vmul.f32 %v6864_v33, %v7669_v63  ;;  %v3875_v33 = vld [vmem:[#allocation2 + $0x10] sm:$0xff] }
 0x868   :  { %v3047_v9 = vadd.f32 %v3046_v48, %v3045_v7  ;;  %v4031_v48 = vld [vmem:[#allocation2 + $0x28] sm:$0xff]  ;;  %v4185_v7 = vld [vmem:[#allocation2 + $0x30] sm:$0xff] }
 0x869   :  { %v6866_v13 = vpop.eup %6865 }
 0x86a   :  { %6867 = vtanh.f32 %v3047_v9  ;;  %v7732_v12 = vsel %vm3055_vm12, %v3047_v9, %v7669_v63  ;;  %v3719_v9 = vld [vmem:[#allocation5 + $0x8] sm:$0xff] }
 0x86b   :  { %v3377_v27 = vrot.slane %v7732_v12, 4 }
 0x877   :  { %v6868_v30 = vpop.eup %6867 }
 0x878   :  { %v3049_v10 = vmul.f32 %v6868_v30, %v6866_v13  ;;  %v7850_v13 = vld [vmem:[#allocation7 + $0x38] sm:$0xff]  ;;  %v7858_v30 = vld [vmem:[#allocation7 + $0x28] sm:$0xff] }
 0x87a   :  { %v7735_v11 = vsel %vm3055_vm12, %v3049_v10, %v7672_v36  ;;  %v7862_v10 = vld [vmem:[#allocation7 + $0x20] sm:$0xff] }
 0x87b   :  { %6451 = vmatmul.mubr.msk.f32.vlgmr.msra.gmra.mxu1 %vm761_vm6, %v7735_v11  ;;  %6458 = vmatmul.mubr.msk.f32.vlgmr.msra.gmra.mxu0 %vm761_vm6, %v7735_v11 }
 0x87c   :  { %6461 = vmatpush3.msra.mxu1 %v7744_v6  ;;  %6468 = vmatpush3.msra.mxu0 %v7750_v15 }
 0x87d   :  { %6462 = vmatprep.subr.mxu1 %v7088_v1  ;;  %6469 = vmatprep.subr.mxu0 %v7088_v1 }
 0x87e   :  { %6463 = vmatpush3.msra.mxu1 %v7758_v18  ;;  %6464 = vmatprep.mubr.msk.f32.mxu1 %vm7089_vm0, %v7088_v1 }
 0x87f   :  { %6470 = vmatpush3.msra.mxu0 %v7766_v19  ;;  %6471 = vmatprep.mubr.msk.f32.mxu0 %vm7089_vm0, %v7088_v1 }
 0x880   :  { %6465 = vmatmul.mubr.msk.f32.vlgmr.msra.gmra.mxu1 %vm761_vm6, %v7735_v11  ;;  %6472 = vmatmul.mubr.msk.f32.vlgmr.msra.gmra.mxu0 %vm761_vm6, %v7735_v11 }
 0x881   :  { %6474 = vmatprep.subr.mxu1 %v7088_v1  ;;  %6481 = vmatprep.subr.mxu0 %v7088_v1 }
 0x882   :  { %6475 = vmatpush3.msra.mxu1 %v7697_v55  ;;  %6482 = vmatpush3.msra.mxu0 %v7703_v56 }
 0x883   :  { %6476 = vmatprep.subr.mxu1 %v7088_v1  ;;  %6483 = vmatprep.subr.mxu0 %v7088_v1 }
 0x884   :  { %6477 = vmatpush3.msra.mxu1 %v7711_v57  ;;  %6484 = vmatpush3.msra.mxu0 %v7717_v58 }
 0x885   :  { %6478 = vmatprep.mubr.msk.f32.mxu1 %vm7089_vm0, %v7088_v1  ;;  %6485 = vmatprep.mubr.msk.f32.mxu0 %vm7089_vm0, %v7088_v1 }
 0x886   :  { %6488 = vmatprep.subr.mxu1 %v7088_v1  ;;  %6495 = vmatprep.subr.mxu0 %v7088_v1 }
 0x93b   :  { %v3127_v20 = vpop.f32.mrf.mxu1  ;;  %v3207_v21 = vpop.f32.mrf.mxu0 }
 0x93c   :  { %v3132_v41 = vrot.slane %v3127_v20, 4  ;;  %v3212_v24 = vrot.slane %v3207_v21, 4 }
 0x93d   :  { %v6452_v25 = vpop.f32.mrf.mxu1  ;;  %v6459_v59 = vpop.f32.mrf.mxu0 }
 0x93e   :  { %v3134_v40 = vadd.f32 %v3132_v41, %v7412_v16  ;;  %v3214_v63 = vadd.f32 %v3212_v24, %v7414_v17 }
 0x940   :  { %v5854_v29 = vmul.f32 -1.442695, %v3134_v40  ;;  %v5856_v32 = vmul.f32 -1.442695, %v3214_v63  ;;  %v3287_v60 = vpop.f32.mrf.mxu1  ;;  %v3362_v0 = vpop.f32.mrf.mxu0 }
 0x941   :  { %v3367_v56 = vrot.slane %v3362_v0, 4  ;;  %v3292_v58 = vrot.slane %v3287_v60, 4 }
 0x942   :  { %6869 = vpow2.f32 %v5854_v29  ;;  %v6466_v36 = vpop.f32.mrf.mxu1  ;;  %v6473_v55 = vpop.f32.mrf.mxu0 }
 0x943   :  { %6871 = vpow2.f32 %v5856_v32  ;;  %v3369_v57 = vadd.f32 %v3367_v56, %v7436_v47  ;;  %v3294_v5 = vadd.f32 %v3292_v58, %v7434_v46 }
 0x945   :  { %v5859_v4 = vmul.f32 -1.442695, %v3369_v57 }
 0x947   :  { %6873 = vpow2.f32 %v5859_v4 }
 0x948   :  { %6875 = vtanh.f32 %v3294_v5 }
 0x94f   :  { %v6870_v37 = vpop.eup %6869 }
 0x950   :  { %v6872_v38 = vpop.eup %6871  ;;  %v3138_v16 = vadd.f32 1.0, %v6870_v37 }
 0x951   :  { %v3218_v17 = vadd.f32 1.0, %v6872_v38 }
 0x952   :  { %6877 = vrcp.f32 %v3138_v16 }
 0x953   :  { %6879 = vrcp.f32 %v3218_v17 }
 0x954   :  { %v6874_v39 = vpop.eup %6873 }
 0x955   :  { %v6876_v8 = vpop.eup %6875  ;;  %v3373_v47 = vadd.f32 1.0, %v6874_v39 }
 0x957   :  { %6881 = vrcp.f32 %v3373_v47 }
 0x95f   :  { %v6878_v14 = vpop.eup %6877 }
 0x960   :  { %v6880_v35 = vpop.eup %6879  ;;  %v3380_v31 = vmul.f32 %v6878_v14, %v6876_v8 }
 0x961   :  { %v3379_v49 = vmul.f32 %v6880_v35, %v3377_v27 }
 0x963   :  { %v3381_v42 = vadd.f32 %v3380_v31, %v3379_v49 }
 0x964   :  { %v6882_v34 = vpop.eup %6881 }
 0x965   :  { %6883 = vtanh.f32 %v3381_v42  ;;  %v3395_v46 = vrot.slane %v3381_v42, 4 }
 0x967   :  { %v7795_v43 = vsel %vm3389_vm13, %v3395_v46, %v7732_v12  ;;  %v3718_v12 = vld [vmem:[#allocation5] sm:$0xff] }
 0x972   :  { %v6884_v44 = vpop.eup %6883 }
 0x973   :  { %v3383_v51 = vmul.f32 %v6884_v44, %v6882_v34  ;;  %v3879_v34 = vld [vmem:[#allocation5 + $0x18] sm:$0xff] }
 0x975   :  { %v3391_v54 = vrot.slane %v3383_v51, 4  ;;  %v3878_v51 = vld [vmem:[#allocation5 + $0x10] sm:$0xff] }
 0x977   :  { %v7798_v45 = vsel %vm3389_vm13, %v3391_v54, %v7735_v11  ;;  %v7867_v11 = vld [vmem:[#allocation7 + $0x78] sm:$0xff]  ;;  %v4033_v54 = vld [vmem:[#allocation5 + $0x20] sm:$0xff] }
 0x978   :  { %6479 = vmatmul.mubr.msk.f32.vlgmr.msra.gmra.mxu1 %vm761_vm6, %v7798_v45  ;;  %6486 = vmatmul.mubr.msk.f32.vlgmr.msra.gmra.mxu0 %vm761_vm6, %v7798_v45 }
 0x979   :  { %6489 = vmatpush3.msra.mxu1 %v7744_v6  ;;  %6496 = vmatpush3.msra.mxu0 %v7750_v15  ;;  %v7873_v6 = vld [vmem:[#allocation7 + $0x70] sm:$0xff]  ;;  %v7877_v15 = vld [vmem:[#allocation7 + $0x68] sm:$0xff] }
 0x97a   :  { %6490 = vmatprep.subr.mxu1 %v7088_v1  ;;  %6497 = vmatprep.subr.mxu0 %v7088_v1 }
 0x97b   :  { %6491 = vmatpush3.msra.mxu1 %v7758_v18  ;;  %6492 = vmatprep.mubr.msk.f32.mxu1 %vm7089_vm0, %v7088_v1  ;;  %v7881_v18 = vld [vmem:[#allocation7 + $0x60] sm:$0xff] }
 0x97c   :  { %6498 = vmatpush3.msra.mxu0 %v7766_v19  ;;  %6499 = vmatprep.mubr.msk.f32.mxu0 %vm7089_vm0, %v7088_v1 }
 0x97d   :  { %6493 = vmatmul.mubr.msk.f32.vlgmr.msra.gmra.mxu1 %vm761_vm6, %v7798_v45  ;;  %6500 = vmatmul.mubr.msk.f32.vlgmr.msra.gmra.mxu0 %vm761_vm6, %v7798_v45 }
 0x97e   :  { %6509 = vmatprep.subr.mxu0 %v7088_v1  ;;  %6513 = vmatprep.mubr.msk.f32.mxu0 %vm7089_vm0, %v7088_v1 }
 0x97f   :  { %6510 = vmatpush3.msra.mxu0 %v3717_v28  ;;  %6502 = vmatprep.subr.mxu1 %v7088_v1  ;;  %v4188_v28 = vld [vmem:[#allocation5 + $0x30] sm:$0xff] }
 0x980   :  { %6511 = vmatprep.subr.mxu0 %v7088_v1  ;;  %6506 = vmatprep.mubr.msk.f32.mxu1 %vm7089_vm0, %v7088_v1 }
 0x981   :  { %6512 = vmatpush3.msra.mxu0 %v3716_v26  ;;  %6503 = vmatpush3.msra.mxu1 %v3719_v9  ;;  %v7924_v26 = vld [vmem:[#allocation7 + $0x18] sm:$0xff]  ;;  %v7957_v9 = vld [vmem:[#allocation7 + $0x40] sm:$0xff] }
 0x982   :  { %6514 = vmatmul.mubr.msk.f32.vlgmr.msra.gmra.mxu0 %vm761_vm6, %v7293_v50  ;;  %6523 = vmatprep.subr.mxu0 %v7088_v1 }
 0x983   :  { %6524 = vmatpush3.msra.mxu0 %v3876_v52  ;;  %6527 = vmatprep.mubr.msk.f32.mxu0 %vm7089_vm0, %v7088_v1  ;;  %v7928_v52 = vld [vmem:[#allocation7 + $0x10] sm:$0xff] }
 0x984   :  { %6525 = vmatprep.subr.mxu0 %v7088_v1  ;;  %6504 = vmatprep.subr.mxu1 %v7088_v1 }
 0x985   :  { %6526 = vmatpush3.msra.mxu0 %v3875_v33  ;;  %6505 = vmatpush3.msra.mxu1 %v3718_v12  ;;  %v7934_v33 = vld [vmem:[#allocation7 + $0x8] sm:$0xff] }
 0x986   :  { %6528 = vmatmul.mubr.msk.f32.vlgmr.msra.gmra.mxu0 %vm761_vm6, %v7293_v50  ;;  %6537 = vmatprep.subr.mxu0 %v7088_v1 }
 0x987   :  { %6538 = vmatpush3.msra.mxu0 %v4031_v48  ;;  %6541 = vmatprep.mubr.msk.f32.mxu0 %vm7089_vm0, %v7088_v1  ;;  %v7938_v48 = vld [vmem:[#allocation7] sm:$0xff] }
 0x988   :  { %6539 = vmatprep.subr.mxu0 %v7088_v1  ;;  %6516 = vmatprep.subr.mxu1 %v7088_v1 }
 0x989   :  { %6540 = vmatpush3.msra.mxu0 %v4030_v62  ;;  %v7942_v62 = vld [vmem:[#allocation7 + $0x58] sm:$0xff] }
 0x98a   :  { %6542 = vmatmul.mubr.msk.f32.vlgmr.msra.gmra.mxu0 %vm761_vm6, %v7293_v50  ;;  %6551 = vmatprep.subr.mxu0 %v7088_v1 }
 0x98b   :  { %6552 = vmatpush3.msra.mxu0 %v4186_v61  ;;  %6555 = vmatprep.mubr.msk.f32.mxu0 %vm7089_vm0, %v7088_v1  ;;  %v7947_v61 = vld [vmem:[#allocation7 + $0x50] sm:$0xff] }
 0x98c   :  { %6553 = vmatprep.subr.mxu0 %v7088_v1 }
 0x98d   :  { %6554 = vmatpush3.msra.mxu0 %v4185_v7  ;;  %v7953_v7 = vld [vmem:[#allocation7 + $0x48] sm:$0xff] }
 0x98e   :  { %6556 = vmatmul.mubr.msk.f32.vlgmr.msra.gmra.mxu0 %vm761_vm6, %v7293_v50  ;;  %6569 = vmatprep.subr.mxu0 %v7088_v1  ;;  %v7854_v50 = vld [vmem:[#allocation7 + $0x30] sm:$0xff] }
 0x98f   :  { %6577 = vmatprep.mubr.msk.f32.mxu0 %vm7089_vm0, %v7088_v1  ;;  %6570 = vmatpush3.msra.mxu0 %v7850_v13 }
 0x990   :  { %6571 = vmatprep.subr.mxu0 %v7088_v1 }
 0x991   :  { %6572 = vmatpush3.msra.mxu0 %v7854_v50 }
 0x992   :  { %6573 = vmatprep.subr.mxu0 %v7088_v1 }
 0x993   :  { %6574 = vmatpush3.msra.mxu0 %v7858_v30 }
 0x994   :  { %6575 = vmatprep.subr.mxu0 %v7088_v1 }
 0x995   :  { %6576 = vmatpush3.msra.mxu0 %v7862_v10 }
 0x996   :  { %6578 = vmatmul.mubr.f32.vlgmr.msra.gmra.mxu0 %v7088_v1  ;;  %6591 = vmatprep.subr.mxu0 %v7088_v1 }
 0x997   :  { %6592 = vmatpush3.msra.mxu0 %v7867_v11  ;;  %6599 = vmatprep.mubr.msk.f32.mxu0 %vm7089_vm0, %v7088_v1 }
 0x998   :  { %6593 = vmatprep.subr.mxu0 %v7088_v1 }
 0x999   :  { %6594 = vmatpush3.msra.mxu0 %v7873_v6 }
 0x99a   :  { %6595 = vmatprep.subr.mxu0 %v7088_v1 }
 0x99b   :  { %6596 = vmatpush3.msra.mxu0 %v7877_v15 }
 0x99c   :  { %6597 = vmatprep.subr.mxu0 %v7088_v1 }
 0x99d   :  { %6598 = vmatpush3.msra.mxu0 %v7881_v18 }
 0x99e   :  { %6600 = vmatmul.mubr.f32.vlgmr.msra.gmra.mxu0 %v7088_v1  ;;  %6613 = vmatprep.subr.mxu0 %v7088_v1 }
 0x99f   :  { %6614 = vmatpush3.msra.mxu0 %v7850_v13  ;;  %6621 = vmatprep.mubr.msk.f32.mxu0 %vm7089_vm0, %v7088_v1 }
 0x9a0   :  { %6615 = vmatprep.subr.mxu0 %v7088_v1 }
 0x9a1   :  { %6616 = vmatpush3.msra.mxu0 %v7854_v50 }
 0x9a2   :  { %6617 = vmatprep.subr.mxu0 %v7088_v1 }
 0x9a3   :  { %6618 = vmatpush3.msra.mxu0 %v7858_v30 }
 0x9a4   :  { %6619 = vmatprep.subr.mxu0 %v7088_v1 }
 0x9a5   :  { %6620 = vmatpush3.msra.mxu0 %v7862_v10 }
 0x9a6   :  { %6635 = vmatprep.subr.mxu0 %v7088_v1 }
 0xa38   :  { %v3467_v19 = vpop.f32.mrf.mxu1  ;;  %v3544_v20 = vpop.f32.mrf.mxu0 }
 0xa39   :  { %v3471_v21 = vadd.f32 %v3467_v19, %v7416_v22  ;;  %v3548_v41 = vadd.f32 %v3544_v20, %v7418_v23 }
 0xa3a   :  { %v6480_v24 = vpop.f32.mrf.mxu1  ;;  %v6487_v25 = vpop.f32.mrf.mxu0 }
 0xa3b   :  { %v5861_v59 = vmul.f32 -1.442695, %v3471_v21  ;;  %v5863_v40 = vmul.f32 -1.442695, %v3548_v41 }
 0xa3d   :  { %6885 = vpow2.f32 %v5861_v59  ;;  %v3621_v63 = vpop.f32.mrf.mxu1  ;;  %v3693_v29 = vpop.f32.mrf.mxu0  ;;  %v5873_v59 = vld [vmem:[%s8183_s11 + $0x1] ss:$0 sm:$0xff] }
 0xa3e   :  { %6887 = vpow2.f32 %v5863_v40  ;;  %v3697_v36 = vadd.f32 %v3693_v29, %v7440_v3  ;;  %v3625_v23 = vadd.f32 %v3621_v63, %v7438_v2 }
 0xa3f   :  { %v6494_v32 = vpop.f32.mrf.mxu1  ;;  %v6501_v60 = vpop.f32.mrf.mxu0 }
 0xa40   :  { %v5866_v22 = vmul.f32 -1.442695, %v3697_v36 }
 0xa42   :  { %v7898_v0 = vpop.f32.mrf.mxu0  ;;  %6889 = vpow2.f32 %v5866_v22 }
 0xa43   :  { %6891 = vtanh.f32 %v3625_v23 }
 0xa44   :  { %v6515_v55 = vpop.f32.mrf.mxu0 }
 0xa46   :  { %v7901_v56 = vpop.f32.mrf.mxu0 }
 0xa48   :  { %v6529_v57 = vpop.f32.mrf.mxu0 }
 0xa4a   :  { %v6886_v58 = vpop.eup %6885  ;;  %v7904_v4 = vpop.f32.mrf.mxu0 }
 0xa4b   :  { %v6888_v5 = vpop.eup %6887  ;;  %v3475_v37 = vadd.f32 1.0, %v6886_v58  ;;  %v5869_v58 = vld [vmem:[%s8183_s11] ss:$0 sm:$0xff] }
 0xa4c   :  { %v3552_v38 = vadd.f32 1.0, %v6888_v5  ;;  %v6543_v16 = vpop.f32.mrf.mxu0 }
 0xa4d   :  { %6893 = vrcp.f32 %v3475_v37 }
 0xa4e   :  { %6895 = vrcp.f32 %v3552_v38  ;;  %v7906_v17 = vpop.f32.mrf.mxu0 }
 0xa4f   :  { %v6890_v39 = vpop.eup %6889 }
 0xa50   :  { %v6557_v3 = vpop.f32.mrf.mxu0  ;;  %v6892_v8 = vpop.eup %6891  ;;  %v3701_v35 = vadd.f32 1.0, %v6890_v39 }
 0xa51   :  { %v5881_v3 = vld [vmem:[%s8183_s11 + $0x3] ss:$0 sm:$0xff] }
 0xa52   :  { %6897 = vrcp.f32 %v3701_v35  ;;  %v5877_v35 = vld [vmem:[%s8183_s11 + $0x2] ss:$0 sm:$0xff] }
 0xa56   :  { %v4504_v12 = vpop.f32.mrf.mxu0 }
 0xa58   :  { %v6579_v19 = vpop.f32.mrf.mxu0 }
 0xa5a   :  { %v6894_v14 = vpop.eup %6893 }
 0xa5b   :  { %v6896_v27 = vpop.eup %6895  ;;  %v3705_v2 = vmul.f32 %v6894_v14, %v6892_v8 }
 0xa5c   :  { %v3704_v31 = vmul.f32 %v6896_v27, %v7795_v43  ;;  %v4034_v43 = vld [vmem:[#allocation5 + $0x28] sm:$0xff] }
 0xa5e   :  { %v3706_v47 = vadd.f32 %v3705_v2, %v3704_v31  ;;  %v4653_v20 = vpop.f32.mrf.mxu0 }
 0xa5f   :  { %v6898_v49 = vpop.eup %6897 }
 0xa60   :  { %6899 = vtanh.f32 %v3706_v47  ;;  %v6601_v21 = vpop.f32.mrf.mxu0 }
 0xa6d   :  { %v6900_v42 = vpop.eup %6899 }
 0xa6e   :  { %v3708_v46 = vmul.f32 %v6900_v42, %v6898_v49 }
 0xa70   :  { %v3715_v44 = vsel %vm3714_vm14, %v3708_v46, %v7798_v45  ;;  %v4189_v45 = vld [vmem:[#allocation5 + $0x38] sm:$0xff] }
 0xa71   :  { %6507 = vmatmul.mubr.msk.f32.vlgmr.msra.gmra.mxu1 %vm761_vm6, %v3715_v44 }
 0xa72   :  { %6517 = vmatpush3.msra.mxu1 %v3879_v34  ;;  %6520 = vmatprep.mubr.msk.f32.mxu1 %vm7089_vm0, %v7088_v1 }
 0xa73   :  { %6518 = vmatprep.subr.mxu1 %v7088_v1 }
 0xa74   :  { %6519 = vmatpush3.msra.mxu1 %v3878_v51 }
 0xa75   :  { %6530 = vmatprep.subr.mxu1 %v7088_v1  ;;  %6521 = vmatmul.mubr.msk.f32.vlgmr.msra.gmra.mxu1 %vm761_vm6, %v3715_v44 }
 0xa76   :  { %6531 = vmatpush3.msra.mxu1 %v4034_v43  ;;  %6534 = vmatprep.mubr.msk.f32.mxu1 %vm7089_vm0, %v7088_v1 }
 0xa77   :  { %6532 = vmatprep.subr.mxu1 %v7088_v1 }
 0xa78   :  { %6533 = vmatpush3.msra.mxu1 %v4033_v54 }
 0xa79   :  { %6544 = vmatprep.subr.mxu1 %v7088_v1  ;;  %6535 = vmatmul.mubr.msk.f32.vlgmr.msra.gmra.mxu1 %vm761_vm6, %v3715_v44 }
 0xa7a   :  { %6545 = vmatpush3.msra.mxu1 %v4189_v45  ;;  %6548 = vmatprep.mubr.msk.f32.mxu1 %vm7089_vm0, %v7088_v1 }
 0xa7b   :  { %6546 = vmatprep.subr.mxu1 %v7088_v1 }
 0xa7c   :  { %6547 = vmatpush3.msra.mxu1 %v4188_v28 }
 0xa7d   :  { %6558 = vmatprep.subr.mxu1 %v7088_v1  ;;  %6549 = vmatmul.mubr.msk.f32.vlgmr.msra.gmra.mxu1 %vm761_vm6, %v3715_v44 }
 0xa7e   :  { %6559 = vmatpush3.msra.mxu1 %v7924_v26  ;;  %6566 = vmatprep.mubr.msk.f32.mxu1 %vm7089_vm0, %v7088_v1 }
 0xa7f   :  { %6560 = vmatprep.subr.mxu1 %v7088_v1 }
 0xa80   :  { %6561 = vmatpush3.msra.mxu1 %v7928_v52 }
 0xa81   :  { %6562 = vmatprep.subr.mxu1 %v7088_v1 }
 0xa82   :  { %6563 = vmatpush3.msra.mxu1 %v7934_v33 }
 0xa83   :  { %6564 = vmatprep.subr.mxu1 %v7088_v1 }
 0xa84   :  { %6565 = vmatpush3.msra.mxu1 %v7938_v48 }
 0xa85   :  { %6567 = vmatmul.mubr.f32.vlgmr.msra.gmra.mxu1 %v7088_v1  ;;  %6580 = vmatprep.subr.mxu1 %v7088_v1 }
 0xa86   :  { %6581 = vmatpush3.msra.mxu1 %v7942_v62  ;;  %6588 = vmatprep.mubr.msk.f32.mxu1 %vm7089_vm0, %v7088_v1 }
 0xa87   :  { %6582 = vmatprep.subr.mxu1 %v7088_v1 }
 0xa88   :  { %6583 = vmatpush3.msra.mxu1 %v7947_v61 }
 0xa89   :  { %6584 = vmatprep.subr.mxu1 %v7088_v1 }
 0xa8a   :  { %6585 = vmatpush3.msra.mxu1 %v7953_v7 }
 0xa8b   :  { %6586 = vmatprep.subr.mxu1 %v7088_v1 }
 0xa8c   :  { %6587 = vmatpush3.msra.mxu1 %v7957_v9 }
 0xa8d   :  { %6589 = vmatmul.mubr.f32.vlgmr.msra.gmra.mxu1 %v7088_v1  ;;  %6602 = vmatprep.subr.mxu1 %v7088_v1 }
 0xa8e   :  { %6603 = vmatpush3.msra.mxu1 %v7924_v26  ;;  %6610 = vmatprep.mubr.msk.f32.mxu1 %vm7089_vm0, %v7088_v1 }
 0xa8f   :  { %6604 = vmatprep.subr.mxu1 %v7088_v1 }
 0xa90   :  { %6605 = vmatpush3.msra.mxu1 %v7928_v52 }
 0xa91   :  { %6606 = vmatprep.subr.mxu1 %v7088_v1 }
 0xa92   :  { %6607 = vmatpush3.msra.mxu1 %v7934_v33 }
 0xa93   :  { %6608 = vmatprep.subr.mxu1 %v7088_v1 }
 0xa94   :  { %6609 = vmatpush3.msra.mxu1 %v7938_v48 }
 0xa95   :  { %6624 = vmatprep.subr.mxu1 %v7088_v1 }
 0xb31   :  { %v3789_v41 = vpop.f32.mrf.mxu1 }
 0xb32   :  { %v3863_v23 = vadd.f32 %v7898_v0, %v3789_v41 }
 0xb33   :  { %v6508_v24 = vpop.f32.mrf.mxu1 }
 0xb34   :  { %v7985_v5 = vadd.f32 %v5869_v58, %v3863_v23 }
 0xb35   :  { %v3946_v25 = vpop.f32.mrf.mxu1 }
 0xb36   :  { %v4017_v40 = vadd.f32 %v7901_v56, %v3946_v25 }
 0xb37   :  { %v6522_v63 = vpop.f32.mrf.mxu1 }
 0xb38   :  { %v7978_v29 = vadd.f32 %v5873_v59, %v4017_v40 }
 0xb39   :  { %v4101_v32 = vpop.f32.mrf.mxu1 }
 0xb3a   :  { %v4508_v36 = vadd.f32 %v4504_v12, %v7978_v29  ;;  %v4172_v14 = vadd.f32 %v7904_v4, %v4101_v32 }
 0xb3b   :  { %v6536_v60 = vpop.f32.mrf.mxu1 }
 0xb3c   :  { %v5883_v57 = vmul.f32 -1.442695, %v4508_v36  ;;  %v7999_v31 = vadd.f32 %v5877_v35, %v4172_v14 }
 0xb3d   :  { %v4256_v55 = vpop.f32.mrf.mxu1 }
 0xb3e   :  { %6901 = vpow2.f32 %v5883_v57  ;;  %v4327_v38 = vadd.f32 %v7906_v17, %v4256_v55 }
 0xb3f   :  { %v6550_v22 = vpop.f32.mrf.mxu1 }
 0xb40   :  { %v7992_v0 = vadd.f32 %v5881_v3, %v4327_v38 }
 0xb42   :  { %v4657_v27 = vadd.f32 %v4653_v20, %v7992_v0 }
 0xb44   :  { %v5884_v47 = vmul.f32 -1.442695, %v4657_v27 }
 0xb45   :  { %v4427_v56 = vpop.f32.mrf.mxu1 }
 0xb46   :  { %v4431_v37 = vadd.f32 %v4427_v56, %v7985_v5 }
 0xb47   :  { %v6568_v16 = vpop.f32.mrf.mxu1 }
 0xb48   :  { %v5882_v39 = vmul.f32 -1.442695, %v4431_v37 }
 0xb4a   :  { %6903 = vpow2.f32 %v5882_v39 }
 0xb4b   :  { %v6902_v17 = vpop.eup %6901  ;;  %6905 = vpow2.f32 %v5884_v47 }
 0xb4c   :  { %v4512_v49 = vadd.f32 1.0, %v6902_v17 }
 0xb4d   :  { %v4581_v8 = vpop.f32.mrf.mxu1 }
 0xb4e   :  { %v4585_v53 = vadd.f32 %v4581_v8, %v7999_v31  ;;  %6907 = vrcp.f32 %v4512_v49 }
 0xb4f   :  { %v6590_v2 = vpop.f32.mrf.mxu1 }
 0xb50   :  { %6909 = vtanh.f32 %v4585_v53 }
 0xb57   :  { %v6904_v42 = vpop.eup %6903 }
 0xb58   :  { %v4435_v46 = vadd.f32 1.0, %v6904_v42  ;;  %v6906_v4 = vpop.eup %6905 }
 0xb59   :  { %v4661_v43 = vadd.f32 1.0, %v6906_v4 }
 0xb5a   :  { %6911 = vrcp.f32 %v4435_v46 }
 0xb5b   :  { %v6908_v34 = vpop.eup %6907  ;;  %6913 = vrcp.f32 %v4661_v43 }
 0xb5c   :  { %v4664_v54 = vmul.f32 0.0, %v6908_v34 }
 0xb5d   :  { %v6910_v44 = vpop.eup %6909 }
 0xb67   :  { %v6912_v51 = vpop.eup %6911 }
 0xb68   :  { %v4665_v45 = vmul.f32 %v6912_v51, %v6910_v44  ;;  %v6914_v12 = vpop.eup %6913 }
 0xb6a   :  { %v8002_v28 = vadd.f32 %v4665_v45, %v4664_v54 }
 0xb6c   :  { %6915 = vtanh.f32 %v8002_v28  ;;  %v4988_v17 = vrot.slane %v8002_v28, 7 }
 0xb79   :  { %v6916_v19 = vpop.eup %6915 }
 0xb7a   :  { %v8005_v20 = vmul.f32 %v6916_v19, %v6914_v12 }
 0xb7c   :  { %6611 = vmatmul.mubr.msk.f32.vlgmr.msra.gmra.mxu1 %vm4358_vm15, %v8005_v20  ;;  %6622 = vmatmul.mubr.msk.f32.vlgmr.msra.gmra.mxu0 %vm4358_vm15, %v8005_v20 }
 0xb7d   :  { %6625 = vmatpush3.msra.mxu1 %v7942_v62  ;;  %6636 = vmatpush3.msra.mxu0 %v7867_v11 }
 0xb7e   :  { %6626 = vmatprep.subr.mxu1 %v7088_v1  ;;  %6637 = vmatprep.subr.mxu0 %v7088_v1 }
 0xb7f   :  { %6627 = vmatpush3.msra.mxu1 %v7947_v61  ;;  %6638 = vmatpush3.msra.mxu0 %v7873_v6 }
 0xb80   :  { %6628 = vmatprep.subr.mxu1 %v7088_v1  ;;  %6639 = vmatprep.subr.mxu0 %v7088_v1 }
 0xb81   :  { %6629 = vmatpush3.msra.mxu1 %v7953_v7  ;;  %6640 = vmatpush3.msra.mxu0 %v7877_v15 }
 0xb82   :  { %6630 = vmatprep.subr.mxu1 %v7088_v1  ;;  %6641 = vmatprep.subr.mxu0 %v7088_v1 }
 0xb83   :  { %6631 = vmatpush3.msra.mxu1 %v7957_v9  ;;  %6632 = vmatprep.mubr.msk.f32.mxu1 %vm7089_vm0, %v7088_v1 }
 0xb84   :  { %6642 = vmatpush3.msra.mxu0 %v7881_v18  ;;  %6643 = vmatprep.mubr.msk.f32.mxu0 %vm7089_vm0, %v7088_v1 }
 0xb85   :  { %6633 = vmatmul.mubr.msk.f32.vlgmr.msra.gmra.mxu1 %vm4358_vm15, %v8005_v20  ;;  %6644 = vmatmul.mubr.msk.f32.vlgmr.msra.gmra.mxu0 %vm4358_vm15, %v8005_v20 }
 0xb86   :  { %6646 = vmatprep.subr.mxu1 %v7088_v1  ;;  %6657 = vmatprep.subr.mxu0 %v7088_v1 }
 0xb87   :  { %6647 = vmatpush3.msra.mxu1 %v7924_v26  ;;  %6658 = vmatpush3.msra.mxu0 %v7850_v13 }
 0xb88   :  { %6648 = vmatprep.subr.mxu1 %v7088_v1  ;;  %6659 = vmatprep.subr.mxu0 %v7088_v1 }
 0xb89   :  { %6649 = vmatpush3.msra.mxu1 %v7928_v52  ;;  %6660 = vmatpush3.msra.mxu0 %v7854_v50 }
 0xb8a   :  { %6650 = vmatprep.subr.mxu1 %v7088_v1  ;;  %6661 = vmatprep.subr.mxu0 %v7088_v1 }
 0xb8b   :  { %6651 = vmatpush3.msra.mxu1 %v7934_v33  ;;  %6662 = vmatpush3.msra.mxu0 %v7858_v30 }
 0xb8c   :  { %6652 = vmatprep.subr.mxu1 %v7088_v1  ;;  %6663 = vmatprep.subr.mxu0 %v7088_v1 }
 0xb8d   :  { %6653 = vmatpush3.msra.mxu1 %v7938_v48  ;;  %6664 = vmatpush3.msra.mxu0 %v7862_v10 }
 0xb8e   :  { %6654 = vmatprep.mubr.msk.f32.mxu1 %vm7089_vm0, %v7088_v1  ;;  %6665 = vmatprep.mubr.msk.f32.mxu0 %vm7089_vm0, %v7088_v1 }
 0xb8f   :  { %6668 = vmatprep.subr.mxu1 %v7088_v1  ;;  %6679 = vmatprep.subr.mxu0 %v7088_v1 }
 0xc3c   :  { %v4738_v21 = vpop.f32.mrf.mxu1  ;;  %v4818_v41 = vpop.f32.mrf.mxu0 }
 0xc3d   :  { %v4743_v24 = vrot.slane %v4738_v21, 7  ;;  %v4823_v25 = vrot.slane %v4818_v41, 7 }
 0xc3e   :  { %v6612_v59 = vpop.f32.mrf.mxu1  ;;  %v6623_v40 = vpop.f32.mrf.mxu0 }
 0xc3f   :  { %v4745_v63 = vadd.f32 %v4743_v24, %v7985_v5  ;;  %v4825_v32 = vadd.f32 %v4823_v25, %v7978_v29 }
 0xc41   :  { %v5886_v60 = vmul.f32 -1.442695, %v4745_v63  ;;  %v5888_v36 = vmul.f32 -1.442695, %v4825_v32 }
 0xc43   :  { %6917 = vpow2.f32 %v5886_v60 }
 0xc44   :  { %6919 = vpow2.f32 %v5888_v36 }
 0xc45   :  { %v4898_v55 = vpop.f32.mrf.mxu1  ;;  %v4973_v22 = vpop.f32.mrf.mxu0 }
 0xc46   :  { %v4978_v23 = vrot.slane %v4973_v22, 7  ;;  %v4903_v37 = vrot.slane %v4898_v55, 7 }
 0xc47   :  { %v6634_v57 = vpop.f32.mrf.mxu1  ;;  %v6645_v58 = vpop.f32.mrf.mxu0 }
 0xc48   :  { %v4980_v56 = vadd.f32 %v4978_v23, %v7992_v0  ;;  %v4905_v16 = vadd.f32 %v4903_v37, %v7999_v31 }
 0xc4a   :  { %v5891_v38 = vmul.f32 -1.442695, %v4980_v56 }
 0xc4c   :  { %6921 = vpow2.f32 %v5891_v38 }
 0xc4d   :  { %6923 = vtanh.f32 %v4905_v16 }
 0xc50   :  { %v6918_v3 = vpop.eup %6917 }
 0xc51   :  { %v6920_v39 = vpop.eup %6919  ;;  %v4749_v8 = vadd.f32 1.0, %v6918_v3 }
 0xc52   :  { %v4829_v14 = vadd.f32 1.0, %v6920_v39 }
 0xc53   :  { %6925 = vrcp.f32 %v4749_v8 }
 0xc54   :  { %6927 = vrcp.f32 %v4829_v14 }
 0xc59   :  { %v6922_v27 = vpop.eup %6921 }
 0xc5a   :  { %v6924_v2 = vpop.eup %6923  ;;  %v4984_v53 = vadd.f32 1.0, %v6922_v27 }
 0xc5c   :  { %6929 = vrcp.f32 %v4984_v53 }
 0xc60   :  { %v6926_v35 = vpop.eup %6925 }
 0xc61   :  { %v6928_v47 = vpop.eup %6927  ;;  %v4991_v49 = vmul.f32 %v6926_v35, %v6924_v2 }
 0xc62   :  { %v4990_v42 = vmul.f32 %v6928_v47, %v4988_v17 }
 0xc64   :  { %v8060_v46 = vadd.f32 %v4991_v49, %v4990_v42 }
 0xc66   :  { %6931 = vtanh.f32 %v8060_v46  ;;  %v5315_v23 = vrot.slane %v8060_v46, 7 }
 0xc69   :  { %v6930_v4 = vpop.eup %6929 }
 0xc73   :  { %v6932_v34 = vpop.eup %6931 }
 0xc74   :  { %v8063_v44 = vmul.f32 %v6932_v34, %v6930_v4 }
 0xc76   :  { %v4996_v51 = vrot.slane %v8063_v44, 1  ;;  %v5650_v8 = vsel %vm5649_vm1, %v8005_v20, %v8063_v44 }
 0xc78   :  { %6655 = vmatmul.mubr.msk.f32.vlgmr.msra.gmra.mxu1 %vm4358_vm15, %v4996_v51  ;;  %6666 = vmatmul.mubr.msk.f32.vlgmr.msra.gmra.mxu0 %vm4358_vm15, %v4996_v51 }
 0xc79   :  { %6669 = vmatpush3.msra.mxu1 %v7942_v62  ;;  %6680 = vmatpush3.msra.mxu0 %v7867_v11 }
 0xc7a   :  { %6670 = vmatprep.subr.mxu1 %v7088_v1  ;;  %6681 = vmatprep.subr.mxu0 %v7088_v1 }
 0xc7b   :  { %6671 = vmatpush3.msra.mxu1 %v7947_v61  ;;  %6682 = vmatpush3.msra.mxu0 %v7873_v6 }
 0xc7c   :  { %6672 = vmatprep.subr.mxu1 %v7088_v1  ;;  %6683 = vmatprep.subr.mxu0 %v7088_v1 }
 0xc7d   :  { %6673 = vmatpush3.msra.mxu1 %v7953_v7  ;;  %6684 = vmatpush3.msra.mxu0 %v7877_v15 }
 0xc7e   :  { %6674 = vmatprep.subr.mxu1 %v7088_v1  ;;  %6685 = vmatprep.subr.mxu0 %v7088_v1 }
 0xc7f   :  { %6675 = vmatpush3.msra.mxu1 %v7957_v9  ;;  %6676 = vmatprep.mubr.msk.f32.mxu1 %vm7089_vm0, %v7088_v1 }
 0xc80   :  { %6686 = vmatpush3.msra.mxu0 %v7881_v18  ;;  %6687 = vmatprep.mubr.msk.f32.mxu0 %vm7089_vm0, %v7088_v1 }
 0xc81   :  { %6677 = vmatmul.mubr.msk.f32.vlgmr.msra.gmra.mxu1 %vm4358_vm15, %v4996_v51  ;;  %6688 = vmatmul.mubr.msk.f32.vlgmr.msra.gmra.mxu0 %vm4358_vm15, %v4996_v51 }
 0xc82   :  { %6690 = vmatprep.subr.mxu1 %v7088_v1  ;;  %6701 = vmatprep.subr.mxu0 %v7088_v1 }
 0xc83   :  { %6691 = vmatpush3.msra.mxu1 %v7924_v26  ;;  %6702 = vmatpush3.msra.mxu0 %v7850_v13 }
 0xc84   :  { %6692 = vmatprep.subr.mxu1 %v7088_v1  ;;  %6703 = vmatprep.subr.mxu0 %v7088_v1 }
 0xc85   :  { %6693 = vmatpush3.msra.mxu1 %v7928_v52  ;;  %6704 = vmatpush3.msra.mxu0 %v7854_v50 }
 0xc86   :  { %6694 = vmatprep.subr.mxu1 %v7088_v1  ;;  %6705 = vmatprep.subr.mxu0 %v7088_v1 }
 0xc87   :  { %6695 = vmatpush3.msra.mxu1 %v7934_v33  ;;  %6706 = vmatpush3.msra.mxu0 %v7858_v30 }
 0xc88   :  { %6696 = vmatprep.subr.mxu1 %v7088_v1  ;;  %6707 = vmatprep.subr.mxu0 %v7088_v1 }
 0xc89   :  { %6697 = vmatpush3.msra.mxu1 %v7938_v48  ;;  %6708 = vmatpush3.msra.mxu0 %v7862_v10 }
 0xc8a   :  { %6698 = vmatprep.mubr.msk.f32.mxu1 %vm7089_vm0, %v7088_v1  ;;  %6709 = vmatprep.mubr.msk.f32.mxu0 %vm7089_vm0, %v7088_v1 }
 0xc8b   :  { %6712 = vmatprep.subr.mxu1 %v7088_v1  ;;  %6723 = vmatprep.subr.mxu0 %v7088_v1 }
 0xd38   :  { %v5065_v13 = vpop.f32.mrf.mxu1  ;;  %v5145_v50 = vpop.f32.mrf.mxu0 }
 0xd39   :  { %v5070_v30 = vrot.slane %v5065_v13, 6  ;;  %v5150_v26 = vrot.slane %v5145_v50, 6 }
 0xd3a   :  { %v6656_v52 = vpop.f32.mrf.mxu1  ;;  %v6667_v33 = vpop.f32.mrf.mxu0 }
 0xd3b   :  { %v5072_v48 = vadd.f32 %v5070_v30, %v7985_v5  ;;  %v5152_v10 = vadd.f32 %v5150_v26, %v7978_v29 }
 0xd3d   :  { %v5893_v43 = vmul.f32 -1.442695, %v5072_v48  ;;  %v5895_v54 = vmul.f32 -1.442695, %v5152_v10 }
 0xd3f   :  { %6933 = vpow2.f32 %v5893_v43 }
 0xd40   :  { %6935 = vpow2.f32 %v5895_v54 }
 0xd41   :  { %v5225_v45 = vpop.f32.mrf.mxu1  ;;  %v5300_v28 = vpop.f32.mrf.mxu0 }
 0xd42   :  { %v5305_v12 = vrot.slane %v5300_v28, 6  ;;  %v5230_v24 = vrot.slane %v5225_v45, 6 }
 0xd43   :  { %v6678_v19 = vpop.f32.mrf.mxu1  ;;  %v6689_v21 = vpop.f32.mrf.mxu0 }
 0xd44   :  { %v5307_v41 = vadd.f32 %v5305_v12, %v7992_v0  ;;  %v5232_v59 = vadd.f32 %v5230_v24, %v7999_v31  ;;  %v5906_v21 = vld [vmem:[#allocation8] ss:$0 sm:$0xff] }
 0xd46   :  { %v5898_v25 = vmul.f32 -1.442695, %v5307_v41 }
 0xd48   :  { %6937 = vpow2.f32 %v5898_v25 }
 0xd49   :  { %6939 = vtanh.f32 %v5232_v59 }
 0xd4c   :  { %v6934_v40 = vpop.eup %6933 }
 0xd4d   :  { %v6936_v63 = vpop.eup %6935  ;;  %v5076_v32 = vadd.f32 1.0, %v6934_v40 }
 0xd4e   :  { %v5156_v60 = vadd.f32 1.0, %v6936_v63 }
 0xd4f   :  { %6941 = vrcp.f32 %v5076_v32 }
 0xd50   :  { %6943 = vrcp.f32 %v5156_v60 }
 0xd55   :  { %v6938_v36 = vpop.eup %6937 }
 0xd56   :  { %v6940_v55 = vpop.eup %6939  ;;  %v5311_v56 = vadd.f32 1.0, %v6938_v36 }
 0xd58   :  { %6945 = vrcp.f32 %v5311_v56 }
 0xd5c   :  { %v6942_v22 = vpop.eup %6941 }
 0xd5d   :  { %v6944_v57 = vpop.eup %6943  ;;  %v5318_v58 = vmul.f32 %v6942_v22, %v6940_v55 }
 0xd5e   :  { %v5317_v37 = vmul.f32 %v6944_v57, %v5315_v23 }
 0xd60   :  { %v8115_v38 = vadd.f32 %v5318_v58, %v5317_v37 }
 0xd62   :  { %6947 = vtanh.f32 %v8115_v38  ;;  %v5642_v48 = vrot.slane %v8115_v38, 7 }
 0xd65   :  { %v6946_v16 = vpop.eup %6945 }
 0xd6f   :  { %v6948_v3 = vpop.eup %6947 }
 0xd70   :  { %v5321_v39 = vmul.f32 %v6948_v3, %v6946_v16 }
 0xd72   :  { %v5323_v14 = vrot.slane %v5321_v39, 2  ;;  %v8120_v27 = vsel %vm5651_vm2, %v5650_v8, %v5321_v39 }
 0xd74   :  { %6699 = vmatmul.mubr.msk.f32.vlgmr.msra.gmra.mxu1 %vm4358_vm15, %v5323_v14  ;;  %6710 = vmatmul.mubr.msk.f32.vlgmr.msra.gmra.mxu0 %vm4358_vm15, %v5323_v14 }
 0xd75   :  { %6713 = vmatpush3.msra.mxu1 %v7942_v62  ;;  %6724 = vmatpush3.msra.mxu0 %v7867_v11  ;;  %v5658_v11 = vld [vmem:[%s8184_s12 + $0x18] sm:$0xff] }
 0xd76   :  { %6714 = vmatprep.subr.mxu1 %v7088_v1  ;;  %6725 = vmatprep.subr.mxu0 %v7088_v1 }
 0xd77   :  { %6715 = vmatpush3.msra.mxu1 %v7947_v61  ;;  %6726 = vmatpush3.msra.mxu0 %v7873_v6  ;;  %v5657_v6 = vld [vmem:[%s8184_s12 + $0x10] sm:$0xff] }
 0xd78   :  { %6716 = vmatprep.subr.mxu1 %v7088_v1  ;;  %6727 = vmatprep.subr.mxu0 %v7088_v1 }
 0xd79   :  { %6717 = vmatpush3.msra.mxu1 %v7953_v7  ;;  %6728 = vmatpush3.msra.mxu0 %v7877_v15  ;;  %v5656_v15 = vld [vmem:[%s8184_s12 + $0x8] sm:$0xff] }
 0xd7a   :  { %6718 = vmatprep.subr.mxu1 %v7088_v1  ;;  %6729 = vmatprep.subr.mxu0 %v7088_v1 }
 0xd7b   :  { %6719 = vmatpush3.msra.mxu1 %v7957_v9  ;;  %6720 = vmatprep.mubr.msk.f32.mxu1 %vm7089_vm0, %v7088_v1 }
 0xd7c   :  { %6730 = vmatpush3.msra.mxu0 %v7881_v18  ;;  %6731 = vmatprep.mubr.msk.f32.mxu0 %vm7089_vm0, %v7088_v1  ;;  %v5655_v18 = vld [vmem:[%s8184_s12] sm:$0xff]  ;;  %s7090_s12 = smov [#allocation10]  }
 0xd7d   :  { %6721 = vmatmul.mubr.msk.f32.vlgmr.msra.gmra.mxu1 %vm4358_vm15, %v5323_v14  ;;  %6732 = vmatmul.mubr.msk.f32.vlgmr.msra.gmra.mxu0 %vm4358_vm15, %v5323_v14  ;;  %s5747_s5 = sshll.u32 %s7090_s12, 4  ;;  %s5748_s5 = int_to_ptr.vmem [resolvable:$true] %s5747_s5 }
 0xd7e   :  { %6734 = vmatprep.subr.mxu1 %v7088_v1  ;;  %6742 = vmatprep.mubr.msk.f32.mxu1 %vm7089_vm0, %v7088_v1  ;;  %vm5653_vm0 = vcmask 1042432   ;;  %s7053_s19 = scalar_lea.vmem %s5748_s5, 64  ;;  %p7058_p7 = scmp.lt.s32.totalorder %s5748_s5, %s5748_s5 }
 0xd7f   :  { %6735 = vmatpush3.msra.mxu1 %v5658_v11  ;;  %p7054_p6 = scmp.ne.s32.totalorder %s5748_s5, %s7053_s19  ;;  %p7059_p8 = scmp.lt.s32.totalorder %s7053_s19, %s7053_s19 }
 0xd80   :  { %6736 = vmatprep.subr.mxu1 %v7088_v1 }
 0xd81   :  { %6737 = vmatpush3.msra.mxu1 %v5657_v6  ;;  %p7060_p9 = por %p7059_p8, %p7058_p7 }
 0xd82   :  { %6738 = vmatprep.subr.mxu1 %v7088_v1 }
 0xd83   :  { %6739 = vmatpush3.msra.mxu1 %v5656_v15  ;;  %p7061_p10 = pnand %p7060_p9, %p7054_p6 }
 0xd84   :  { %6740 = vmatprep.subr.mxu1 %v7088_v1 }
 0xd85   :  { %6741 = vmatpush3.msra.mxu1 %v5655_v18 }
 0xe34   :  { %v5392_v62 = vpop.f32.mrf.mxu1  ;;  %v5472_v61 = vpop.f32.mrf.mxu0 }
 0xe35   :  { %v5397_v7 = vrot.slane %v5392_v62, 5  ;;  %v5477_v9 = vrot.slane %v5472_v61, 5 }
 0xe36   :  { %v6700_v20 = vpop.f32.mrf.mxu1  ;;  %v6711_v2 = vpop.f32.mrf.mxu0 }
 0xe37   :  { %v5399_v35 = vadd.f32 %v5397_v7, %v7985_v5  ;;  %v5479_v17 = vadd.f32 %v5477_v9, %v7978_v29 }
 0xe39   :  { %v5900_v47 = vmul.f32 -1.442695, %v5399_v35  ;;  %v5902_v49 = vmul.f32 -1.442695, %v5479_v17 }
 0xe3b   :  { %6949 = vpow2.f32 %v5900_v47 }
 0xe3c   :  { %6951 = vpow2.f32 %v5902_v49 }
 0xe3d   :  { %v5552_v53 = vpop.f32.mrf.mxu1  ;;  %v5627_v42 = vpop.f32.mrf.mxu0 }
 0xe3e   :  { %v5632_v46 = vrot.slane %v5627_v42, 5  ;;  %v5557_v44 = vrot.slane %v5552_v53, 5 }
 0xe3f   :  { %v6722_v4 = vpop.f32.mrf.mxu1  ;;  %v6733_v1 = vpop.f32.mrf.mxu0 }
 0xe40   :  { %v5634_v34 = vadd.f32 %v5632_v46, %v7992_v0  ;;  %v5559_v13 = vadd.f32 %v5557_v44, %v7999_v31 }
 0xe42   :  { %v5905_v51 = vmul.f32 -1.442695, %v5634_v34 }
 0xe44   :  { %6953 = vpow2.f32 %v5905_v51 }
 0xe45   :  { %6955 = vtanh.f32 %v5559_v13 }
 0xe48   :  { %v6950_v50 = vpop.eup %6949 }
 0xe49   :  { %v6952_v30 = vpop.eup %6951  ;;  %v5403_v5 = vadd.f32 1.0, %v6950_v50 }
 0xe4a   :  { %v5483_v29 = vadd.f32 1.0, %v6952_v30 }
 0xe4b   :  { %6957 = vrcp.f32 %v5403_v5 }
 0xe4c   :  { %6959 = vrcp.f32 %v5483_v29 }
 0xe51   :  { %v6954_v26 = vpop.eup %6953 }
 0xe52   :  { %v6956_v52 = vpop.eup %6955  ;;  %v5638_v0 = vadd.f32 1.0, %v6954_v26 }
 0xe54   :  { %6961 = vrcp.f32 %v5638_v0 }
 0xe58   :  { %v6958_v33 = vpop.eup %6957 }
 0xe59   :  { %v6960_v10 = vpop.eup %6959  ;;  %v5645_v43 = vmul.f32 %v6958_v33, %v6956_v52 }
 0xe5a   :  { %v5644_v54 = vmul.f32 %v6960_v10, %v5642_v48 }
 0xe5c   :  { %v5646_v45 = vadd.f32 %v5645_v43, %v5644_v54 }
 0xe5e   :  { %6963 = vtanh.f32 %v5646_v45 }
 0xe61   :  { %v6962_v31 = vpop.eup %6961 }
 0xe6b   :  { %v6964_v28 = vpop.eup %6963 }
 0xe6c   :  { %v5648_v12 = vmul.f32 %v6964_v28, %v6962_v31 }
 0xe6e   :  { %v5654_v19 = vsel %vm5653_vm0, %v8120_v27, %v5648_v12 }
 0xe6f   :  { %6743 = vmatmul.mubr.msk.f32.vlgmr.msra.gmra.mxu1 %vm4358_vm15, %v5654_v19 }
 0xf2f   :  { %v5735_v41 = vpop.f32.mrf.mxu1 }
 0xf30   :  { %v5736_v24 = vadd.f32 %v5906_v21, %v5735_v41 }
 0xf31   :  { %v6744_v25 = vpop.f32.mrf.mxu1 }
 0xf32   :  { %5740 = vst.msk [vmem:[#allocation10] sm:$0xf] %vm5739_vm3, %v5736_v24 }
 0xf33   :  { %7064 = shalt.err (!%p7061_p10)
}
 0xf34   :  { %5750 = dma.vmem_to_hbm [thread:$0]  %s5748_s5, 64, %s8186_s14, [#allocation4]  }
 0xf35   :  { %7079 = dma.done.wait [#allocation4], 64  }
 0xf36   :  { %7080 = vsyncadd [#allocation4], 4294967232 }
 0xf37   :  { %5754 = vsyncpa [#allocation3], 1 }
 0xf38   :  { %5755 = vsyncpa [#allocation6], 1 }
 0xf39   :  { %5756 = vsyncpa [#allocation9], 1 }
 0xf3a   :  { %5757 = vsyncpa [#allocation4], 1 }

</bundles_post_ra>
